<compile_context>
chip_gen: v6e
topology: v6e:2x2x1
jax: 0.10.0
libtpu: 0.0.40
codegen_flags: <defaults>
</compile_context>

<pallas_src>
import jax
import jax.numpy as jnp
from jax import lax
from jax.experimental import pallas as pl
from jax.experimental.pallas import tpu as pltpu


_VMEM_SPEC = pl.BlockSpec(memory_space=pltpu.MemorySpace.VMEM)
_KH = 3  # 3x3 kernels


# ----------------------------------------------------------------------------
# Fused Pallas kernel
# ----------------------------------------------------------------------------
def _fused_policy_kernel(x_ref, wk1_ref, b1c_ref, wk2_ref, b2c_ref,
                         w1f_ref, b1h_ref, w2h_ref, b2h_ref,
                         mean_ref, logstd_ref,
                         pad1_ref, pad2_ref, y2_ref, feat_ref):
    """Fused CNNStochasticPolicy forward (single grid point, all VMEM).

    x_ref   : (N, H, W*Cin)        f32   NHWC input, one row per (n, h)
    wk1_ref : (3, W*Cin, W*C1)     bf16  banded conv1 weights, one per kh tap
    b1c_ref : (1, W*C1)            f32   conv1 bias tiled over w
    wk2_ref : (3, W*C1, W*C2)      bf16  banded conv2 weights
    b2c_ref : (1, W*C2)            f32
    w1f_ref : (H*W*C2, 2*hidden)   bf16  both heads' W1 (rows in (h,w,c) order)
    b1h_ref : (1, 2*hidden)        f32
    w2h_ref : (2*hidden, 2*out)    f32   block-diagonal [mean_w2 | logstd_w2]
    b2h_ref : (1, 2*out)           f32
    outputs : mean (N, out) f32, log_std (N, out) f32
    scratch : pad1 (N, H+2, W*Cin), pad2 (N, H+2, W*C1),
              y2 (N, H, W*C2), feat (N, H*W*C2)   -- all f32 VMEM
    """
    f32 = jnp.float32
    bf16 = jnp.bfloat16

    n_batch, h, _ = x_ref.shape
    wc1 = wk1_ref.shape[2]          # W * C1
    wc2 = wk2_ref.shape[2]          # W * C2
    out_f = w2h_ref.shape[1] // 2

    # Zero-pad along H only; the W zero padding is folded into the banded
    # conv weights built in prepare_params().
    pad1_ref[...] = jnp.zeros(pad1_ref.shape, f32)
    pad2_ref[...] = jnp.zeros(pad2_ref.shape, f32)
    pad1_ref[:, 1:h + 1, :] = x_ref[...]

    b1c = b1c_ref[...]
    b2c = b2c_ref[...]

    for n in range(n_batch):
        # conv1 + ReLU: 3 row-tap matmuls, lane-dense (W*C1)-wide output rows.
        acc1 = jnp.zeros((h, wc1), f32)
        for kh in range(_KH):
            acc1 += jnp.dot(pad1_ref[n, kh:kh + h, :].astype(bf16),
                            wk1_ref[kh], preferred_element_type=f32)
        pad2_ref[n, 1:h + 1, :] = jnp.maximum(acc1 + b1c, 0.0)

        # conv2 + ReLU: lane-dense (W*C2)-wide output rows.
        acc2 = jnp.zeros((h, wc2), f32)
        for kh in range(_KH):
            acc2 += jnp.dot(pad2_ref[n, kh:kh + h, :].astype(bf16),
                            wk2_ref[kh], preferred_element_type=f32)
        y2_ref[n] = jnp.maximum(acc2 + b2c, 0.0)

    # Flatten to one (h, w, c)-ordered feature row per sample, entirely in
    # VMEM (the NCHW flatten permutation is folded into the head weights).
    for n in range(n_batch):
        for hh in range(h):
            feat_ref[n:n + 1, hh * wc2:(hh + 1) * wc2] = y2_ref[n, hh:hh + 1, :]

    # Both heads fused: one lane-dense (flat, 128) dot + one block-diag dot.
    hid = jnp.dot(feat_ref[...].astype(bf16), w1f_ref[...],
                  preferred_element_type=f32)
    hid = jnp.maximum(hid + b1h_ref[...], 0.0)
    out = jnp.dot(hid, w2h_ref[...], preferred_element_type=f32) + b2h_ref[...]
    mean_ref[...] = out[:, :out_f]
    logstd_ref[...] = out[:, out_f:2 * out_f]


# ----------------------------------------------------------------------------
# One-time weight re-layout (banded conv weights, fused/permuted heads)
# ----------------------------------------------------------------------------
def _banded_conv_weight(w_oihw, width):
    """PyTorch (Cout,Cin,3,3) conv weight -> (3, W*Cin, W*Cout) banded matrices.

    wk[kh][wi*Cin + cin, w*Cout + cout] = w_oihw[cout, cin, kh, wi - w + 1]
    for 0 <= wi - w + 1 < 3, else 0 (which implements the W zero padding).
    """
    cout, cin, kh, kw = w_oihw.shape
    wi = jnp.arange(width)[None, :, None]
    wo = jnp.arange(width)[None, None, :]
    kk = jnp.arange(kw)[:, None, None]
    sel = (wi == wo + kk - 1).astype(jnp.float32)                 # (kw, W, W)
    wt = jnp.transpose(w_oihw, (2, 3, 1, 0)).astype(jnp.float32)  # (kh,kw,ci,co)
    wk = jnp.einsum('kpw,hkio->hpiwo', sel, wt)
    return wk.reshape(kh, width * cin, width * cout)


def prepare_params(params, image_hw):
    """One-time weight preparation for the fused kernel (not paid per step)."""
    h, w = image_hw
    c1 = params["conv1_w"].shape[0]
    c2 = params["conv2_w"].shape[0]
    hidden = params["mean_w1"].shape[1]
    out_f = params["mean_w2"].shape[1]

    wk1 = _banded_conv_weight(params["conv1_w"], w).astype(jnp.bfloat16)
    wk2 = _banded_conv_weight(params["conv2_w"], w).astype(jnp.bfloat16)
    b1c = jnp.tile(params["conv1_b"], w).reshape(1, w * c1).astype(jnp.float32)
    b2c = jnp.tile(params["conv2_b"], w).reshape(1, w * c2).astype(jnp.float32)

    # Fuse both heads' first layers into one (flat, 2*hidden) matrix and fold
    # the PyTorch NCHW flatten order (c, h, w) -> kernel order (h, w, c) into
    # its rows.
    w1cat = jnp.concatenate([params["mean_w1"], params["logstd_w1"]], axis=1)
    w1f = (w1cat.reshape(c2, h, w, 2 * hidden)
           .transpose(1, 2, 0, 3)
           .reshape(h * w * c2, 2 * hidden)
           .astype(jnp.bfloat16))
    b1h = jnp.concatenate([params["mean_b1"], params["logstd_b1"]]
                          ).reshape(1, 2 * hidden).astype(jnp.float32)

    # Second layers as one block-diagonal matrix -> single dot, split outputs.
    w2h = jnp.zeros((2 * hidden, 2 * out_f), jnp.float32)
    w2h = w2h.at[:hidden, :out_f].set(params["mean_w2"])
    w2h = w2h.at[hidden:, out_f:].set(params["logstd_w2"])
    b2h = jnp.concatenate([params["mean_b2"], params["logstd_b2"]]
                          ).reshape(1, 2 * out_f).astype(jnp.float32)

    return {"wk1": wk1, "b1c": b1c, "wk2": wk2, "b2c": b2c,
            "w1f": w1f, "b1h": b1h, "w2h": w2h, "b2h": b2h}


# ----------------------------------------------------------------------------
# Forward pass (CNNStochasticPolicy)
# ----------------------------------------------------------------------------
def cnn_stochastic_policy_forward(x_nchw, prep):
    """Fused Pallas forward.  `prep` comes from prepare_params()."""
    n, c, h, w = x_nchw.shape
    c1 = prep["wk1"].shape[2] // w
    c2 = prep["wk2"].shape[2] // w
    out_f = prep["b2h"].shape[1] // 2

    # NCHW -> (n, h, w*c) rows; the only XLA glue left (a few KiB).
    x2d = jnp.transpose(x_nchw, (0, 2, 3, 1)).reshape(n, h, w * c)

    mean, log_std = pl.pallas_call(
        _fused_policy_kernel,
        out_shape=(jax.ShapeDtypeStruct((n, out_f), jnp.float32),
                   jax.ShapeDtypeStruct((n, out_f), jnp.float32)),
        in_specs=[_VMEM_SPEC] * 9,
        out_specs=(_VMEM_SPEC, _VMEM_SPEC),
        scratch_shapes=[
            pltpu.VMEM((n, h + 2, w * c), jnp.float32),    # H-padded conv1 input
            pltpu.VMEM((n, h + 2, w * c1), jnp.float32),   # H-padded conv2 input
            pltpu.VMEM((n, h, w * c2), jnp.float32),       # conv2 output
            pltpu.VMEM((n, h * w * c2), jnp.float32),      # flattened features
        ],
    )(x2d, prep["wk1"], prep["b1c"], prep["wk2"], prep["b2c"],
      prep["w1f"], prep["b1h"], prep["w2h"], prep["b2h"])
    # TODO(synk): for large batch / image sizes, add an N-tiled grid with
    # dimension_semantics=("parallel",) (v7x megacore) and a vmem limit.
    return mean, log_std


# ----------------------------------------------------------------------------
# Pure-JAX reference (PyTorch semantics, all f32) for correctness checking
# ----------------------------------------------------------------------------
def reference_forward(x_nchw, params):
    def conv(x, w, b):
        y = lax.conv_general_dilated(
            x, w, window_strides=(1, 1), padding=((1, 1), (1, 1)),
            dimension_numbers=("NCHW", "OIHW", "NCHW"))
        return jnp.maximum(y + b[None, :, None, None], 0.0)

    y = conv(x_nchw, params["conv1_w"], params["conv1_b"])
    y = conv(y, params["conv2_w"], params["conv2_b"])
    f = y.reshape(y.shape[0], -1)

    def mlp(f, w1, b1, w2, b2):
        h = jnp.maximum(f @ w1 + b1, 0.0)
        return h @ w2 + b2

    mean = mlp(f, params["mean_w1"], params["mean_b1"],
               params["mean_w2"], params["mean_b2"])
    log_std = mlp(f, params["logstd_w1"], params["logstd_b1"],
                  params["logstd_w2"], params["logstd_b2"])
    return mean, log_std


# ----------------------------------------------------------------------------
# Deterministic parameter initialization
# ----------------------------------------------------------------------------
def init_params(key, in_ch, h, w, out_features, c1=16, c2=32, hidden=64):
    ks = jax.random.split(key, 12)
    flat = c2 * h * w
    s = 0.05
    p = {
        "conv1_w": jax.random.normal(ks[0], (c1, in_ch, 3, 3), jnp.float32) * s,
        "conv1_b": jax.random.normal(ks[1], (c1,), jnp.float32) * s,
        "conv2_w": jax.random.normal(ks[2], (c2, c1, 3, 3), jnp.float32) * s,
        "conv2_b": jax.random.normal(ks[3], (c2,), jnp.float32) * s,
        "mean_w1": jax.random.normal(ks[4], (flat, hidden), jnp.float32) * s,
        "mean_b1": jax.random.normal(ks[5], (hidden,), jnp.float32) * s,
        "mean_w2": jax.random.normal(ks[6], (hidden, out_features), jnp.float32) * s,
        "mean_b2": jax.random.normal(ks[7], (out_features,), jnp.float32) * s,
        "logstd_w1": jax.random.normal(ks[8], (flat, hidden), jnp.float32) * s,
        "logstd_b1": jax.random.normal(ks[9], (hidden,), jnp.float32) * s,
        "logstd_w2": jax.random.normal(ks[10], (hidden, out_features), jnp.float32) * s,
        "logstd_b2": jax.random.normal(ks[11], (out_features,), jnp.float32) * s,
    }
    return p


if __name__ == "__main__":
    key = jax.random.PRNGKey(0)
    k_x, k_p = jax.random.split(key)

    # in_features = (4, 16, 16), out_features = 8, batch = 2
    N, C, H, W = 2, 4, 16, 16
    OUT = 8

    x = jax.random.normal(k_x, (N, C, H, W), jnp.float32)
    params = init_params(k_p, C, H, W, OUT)

    prep = prepare_params(params, (H, W))          # one-time weight re-layout
    fwd = jax.jit(cnn_stochastic_policy_forward)
    mean, log_std = fwd(x, prep)
    jax.block_until_ready((mean, log_std))

    ref_mean, ref_log_std = reference_forward(x, params)
    assert mean.shape == (N, OUT) and log_std.shape == (N, OUT)
    # bf16 matmul operands (f32 accumulation) vs. the all-f32 reference.
    assert jnp.allclose(mean, ref_mean, rtol=2e-2, atol=2e-2), "mean mismatch"
    assert jnp.allclose(log_std, ref_log_std, rtol=2e-2, atol=2e-2), "log_std mismatch"

    print("KERNEL_OK")
</pallas_src>

<mosaic_0001>
module attributes {stable_mosaic.version = 11 : i64} {
  func.func @_fused_policy_kernel(%arg0: memref<2x16x64xf32, #tpu.memory_space<vmem>>, %arg1: memref<3x64x256xbf16, #tpu.memory_space<vmem>>, %arg2: memref<1x256xf32, #tpu.memory_space<vmem>>, %arg3: memref<3x256x512xbf16, #tpu.memory_space<vmem>>, %arg4: memref<1x512xf32, #tpu.memory_space<vmem>>, %arg5: memref<8192x128xbf16, #tpu.memory_space<vmem>>, %arg6: memref<1x128xf32, #tpu.memory_space<vmem>>, %arg7: memref<128x16xf32, #tpu.memory_space<vmem>>, %arg8: memref<1x16xf32, #tpu.memory_space<vmem>>, %arg9: memref<2x8xf32, #tpu.memory_space<vmem>>, %arg10: memref<2x8xf32, #tpu.memory_space<vmem>>, %arg11: memref<2x18x64xf32, #tpu.memory_space<vmem>>, %arg12: memref<2x18x256xf32, #tpu.memory_space<vmem>>, %arg13: memref<2x16x512xf32, #tpu.memory_space<vmem>>, %arg14: memref<2x8192xf32, #tpu.memory_space<vmem>>) attributes {dimension_semantics = [], scalar_prefetch = 0 : i64, scratch_operands = 4 : i64, tpu.core_type = #tpu.core_type<tc>} {
    %cst = arith.constant 0.000000e+00 : f32
    %0 = vector.broadcast %cst : f32 to vector<2x18x64xf32>
    %c0 = arith.constant 0 : index
    %c0_0 = arith.constant 0 : index
    %c0_1 = arith.constant 0 : index
    %1 = vector.load %arg11[%c0, %c0_0, %c0_1] : memref<2x18x64xf32, #tpu.memory_space<vmem>>, vector<2x18x64xf32>
    tpu.vector_store %arg11[%c0, %c0_0, %c0_1], %0 {strides = array<i32>} : memref<2x18x64xf32, #tpu.memory_space<vmem>>, vector<2x18x64xf32>,
    %cst_2 = arith.constant 0.000000e+00 : f32
    %2 = vector.broadcast %cst_2 : f32 to vector<2x18x256xf32>
    %c0_3 = arith.constant 0 : index
    %c0_4 = arith.constant 0 : index
    %c0_5 = arith.constant 0 : index
    %3 = vector.load %arg12[%c0_3, %c0_4, %c0_5] : memref<2x18x256xf32, #tpu.memory_space<vmem>>, vector<2x18x256xf32>
    tpu.vector_store %arg12[%c0_3, %c0_4, %c0_5], %2 {strides = array<i32>} : memref<2x18x256xf32, #tpu.memory_space<vmem>>, vector<2x18x256xf32>,
    %c0_6 = arith.constant 0 : index
    %c0_7 = arith.constant 0 : index
    %c0_8 = arith.constant 0 : index
    %4 = vector.load %arg0[%c0_6, %c0_7, %c0_8] : memref<2x16x64xf32, #tpu.memory_space<vmem>>, vector<2x16x64xf32>
    %c0_9 = arith.constant 0 : index
    %c1 = arith.constant 1 : index
    %c0_10 = arith.constant 0 : index
    %5 = vector.load %arg11[%c0_9, %c1, %c0_10] : memref<2x18x64xf32, #tpu.memory_space<vmem>>, vector<2x16x64xf32>
    tpu.vector_store %arg11[%c0_9, %c1, %c0_10], %4 {strides = array<i32>} : memref<2x18x64xf32, #tpu.memory_space<vmem>>, vector<2x16x64xf32>,
    %c0_11 = arith.constant 0 : index
    %c0_12 = arith.constant 0 : index
    %6 = vector.load %arg2[%c0_11, %c0_12] : memref<1x256xf32, #tpu.memory_space<vmem>>, vector<1x256xf32>
    %c0_13 = arith.constant 0 : index
    %c0_14 = arith.constant 0 : index
    %7 = vector.load %arg4[%c0_13, %c0_14] : memref<1x512xf32, #tpu.memory_space<vmem>>, vector<1x512xf32>
    %cst_15 = arith.constant 0.000000e+00 : f32
    %8 = vector.broadcast %cst_15 : f32 to vector<16x256xf32>
    %c0_16 = arith.constant 0 : index
    %c0_17 = arith.constant 0 : index
    %c0_18 = arith.constant 0 : index
    %9 = vector.load %arg11[%c0_16, %c0_17, %c0_18] : memref<2x18x64xf32, #tpu.memory_space<vmem>>, vector<1x16x64xf32>
    %10 = vector.shape_cast %9 : vector<1x16x64xf32> to vector<16x64xf32>
    %11 = arith.truncf %10 : vector<16x64xf32> to vector<16x64xbf16>
    %c0_19 = arith.constant 0 : index
    %c0_20 = arith.constant 0 : index
    %c0_21 = arith.constant 0 : index
    %12 = vector.load %arg1[%c0_19, %c0_20, %c0_21] : memref<3x64x256xbf16, #tpu.memory_space<vmem>>, vector<1x64x256xbf16>
    %13 = vector.shape_cast %12 : vector<1x64x256xbf16> to vector<64x256xbf16>
    %cst_22 = arith.constant dense<0.000000e+00> : vector<16x256xf32>
    %14 = tpu.matmul %11, %13, %cst_22 {dimension_numbers = #tpu.dot_dimension_numbers<[1], [0], [0], [1], [0, 0, 1, 1], [], []>} : vector<16x64xbf16>, vector<64x256xbf16>, vector<16x256xf32> -> vector<16x256xf32>
    %15 = arith.addf %8, %14 : vector<16x256xf32>
    %c0_23 = arith.constant 0 : index
    %c1_24 = arith.constant 1 : index
    %c0_25 = arith.constant 0 : index
    %16 = vector.load %arg11[%c0_23, %c1_24, %c0_25] : memref<2x18x64xf32, #tpu.memory_space<vmem>>, vector<1x16x64xf32>
    %17 = vector.shape_cast %16 : vector<1x16x64xf32> to vector<16x64xf32>
    %18 = arith.truncf %17 : vector<16x64xf32> to vector<16x64xbf16>
    %c1_26 = arith.constant 1 : index
    %c0_27 = arith.constant 0 : index
    %c0_28 = arith.constant 0 : index
    %19 = vector.load %arg1[%c1_26, %c0_27, %c0_28] : memref<3x64x256xbf16, #tpu.memory_space<vmem>>, vector<1x64x256xbf16>
    %20 = vector.shape_cast %19 : vector<1x64x256xbf16> to vector<64x256xbf16>
    %cst_29 = arith.constant dense<0.000000e+00> : vector<16x256xf32>
    %21 = tpu.matmul %18, %20, %cst_29 {dimension_numbers = #tpu.dot_dimension_numbers<[1], [0], [0], [1], [0, 0, 1, 1], [], []>} : vector<16x64xbf16>, vector<64x256xbf16>, vector<16x256xf32> -> vector<16x256xf32>
    %22 = arith.addf %15, %21 : vector<16x256xf32>
    %c0_30 = arith.constant 0 : index
    %c2 = arith.constant 2 : index
    %c0_31 = arith.constant 0 : index
    %23 = vector.load %arg11[%c0_30, %c2, %c0_31] : memref<2x18x64xf32, #tpu.memory_space<vmem>>, vector<1x16x64xf32>
    %24 = vector.shape_cast %23 : vector<1x16x64xf32> to vector<16x64xf32>
    %25 = arith.truncf %24 : vector<16x64xf32> to vector<16x64xbf16>
    %c2_32 = arith.constant 2 : index
    %c0_33 = arith.constant 0 : index
    %c0_34 = arith.constant 0 : index
    %26 = vector.load %arg1[%c2_32, %c0_33, %c0_34] : memref<3x64x256xbf16, #tpu.memory_space<vmem>>, vector<1x64x256xbf16>
    %27 = vector.shape_cast %26 : vector<1x64x256xbf16> to vector<64x256xbf16>
    %cst_35 = arith.constant dense<0.000000e+00> : vector<16x256xf32>
    %28 = tpu.matmul %25, %27, %cst_35 {dimension_numbers = #tpu.dot_dimension_numbers<[1], [0], [0], [1], [0, 0, 1, 1], [], []>} : vector<16x64xbf16>, vector<64x256xbf16>, vector<16x256xf32> -> vector<16x256xf32>
    %29 = arith.addf %22, %28 : vector<16x256xf32>
    %30 = vector.broadcast %6 : vector<1x256xf32> to vector<16x256xf32>
    %31 = arith.addf %29, %30 : vector<16x256xf32>
    %cst_36 = arith.constant 0.000000e+00 : f32
    %32 = vector.broadcast %cst_36 : f32 to vector<16x256xf32>
    %33 = arith.maximumf %31, %32 : vector<16x256xf32>
    %c0_37 = arith.constant 0 : index
    %c1_38 = arith.constant 1 : index
    %c0_39 = arith.constant 0 : index
    %34 = vector.load %arg12[%c0_37, %c1_38, %c0_39] : memref<2x18x256xf32, #tpu.memory_space<vmem>>, vector<1x16x256xf32>
    %35 = vector.shape_cast %34 : vector<1x16x256xf32> to vector<16x256xf32>
    %36 = vector.shape_cast %33 : vector<16x256xf32> to vector<1x16x256xf32>
    tpu.vector_store %arg12[%c0_37, %c1_38, %c0_39], %36 {strides = array<i32>} : memref<2x18x256xf32, #tpu.memory_space<vmem>>, vector<1x16x256xf32>,
    %cst_40 = arith.constant 0.000000e+00 : f32
    %37 = vector.broadcast %cst_40 : f32 to vector<16x512xf32>
    %c0_41 = arith.constant 0 : index
    %c0_42 = arith.constant 0 : index
    %c0_43 = arith.constant 0 : index
    %38 = vector.load %arg12[%c0_41, %c0_42, %c0_43] : memref<2x18x256xf32, #tpu.memory_space<vmem>>, vector<1x16x256xf32>
    %39 = vector.shape_cast %38 : vector<1x16x256xf32> to vector<16x256xf32>
    %40 = arith.truncf %39 : vector<16x256xf32> to vector<16x256xbf16>
    %c0_44 = arith.constant 0 : index
    %c0_45 = arith.constant 0 : index
    %c0_46 = arith.constant 0 : index
    %41 = vector.load %arg3[%c0_44, %c0_45, %c0_46] : memref<3x256x512xbf16, #tpu.memory_space<vmem>>, vector<1x256x512xbf16>
    %42 = vector.shape_cast %41 : vector<1x256x512xbf16> to vector<256x512xbf16>
    %cst_47 = arith.constant dense<0.000000e+00> : vector<16x512xf32>
    %43 = tpu.matmul %40, %42, %cst_47 {dimension_numbers = #tpu.dot_dimension_numbers<[1], [0], [0], [1], [0, 0, 1, 1], [], []>} : vector<16x256xbf16>, vector<256x512xbf16>, vector<16x512xf32> -> vector<16x512xf32>
    %44 = arith.addf %37, %43 : vector<16x512xf32>
    %c0_48 = arith.constant 0 : index
    %c1_49 = arith.constant 1 : index
    %c0_50 = arith.constant 0 : index
    %45 = vector.load %arg12[%c0_48, %c1_49, %c0_50] : memref<2x18x256xf32, #tpu.memory_space<vmem>>, vector<1x16x256xf32>
    %46 = vector.shape_cast %45 : vector<1x16x256xf32> to vector<16x256xf32>
    %47 = arith.truncf %46 : vector<16x256xf32> to vector<16x256xbf16>
    %c1_51 = arith.constant 1 : index
    %c0_52 = arith.constant 0 : index
    %c0_53 = arith.constant 0 : index
    %48 = vector.load %arg3[%c1_51, %c0_52, %c0_53] : memref<3x256x512xbf16, #tpu.memory_space<vmem>>, vector<1x256x512xbf16>
    %49 = vector.shape_cast %48 : vector<1x256x512xbf16> to vector<256x512xbf16>
    %cst_54 = arith.constant dense<0.000000e+00> : vector<16x512xf32>
    %50 = tpu.matmul %47, %49, %cst_54 {dimension_numbers = #tpu.dot_dimension_numbers<[1], [0], [0], [1], [0, 0, 1, 1], [], []>} : vector<16x256xbf16>, vector<256x512xbf16>, vector<16x512xf32> -> vector<16x512xf32>
    %51 = arith.addf %44, %50 : vector<16x512xf32>
    %c0_55 = arith.constant 0 : index
    %c2_56 = arith.constant 2 : index
    %c0_57 = arith.constant 0 : index
    %52 = vector.load %arg12[%c0_55, %c2_56, %c0_57] : memref<2x18x256xf32, #tpu.memory_space<vmem>>, vector<1x16x256xf32>
    %53 = vector.shape_cast %52 : vector<1x16x256xf32> to vector<16x256xf32>
    %54 = arith.truncf %53 : vector<16x256xf32> to vector<16x256xbf16>
    %c2_58 = arith.constant 2 : index
    %c0_59 = arith.constant 0 : index
    %c0_60 = arith.constant 0 : index
    %55 = vector.load %arg3[%c2_58, %c0_59, %c0_60] : memref<3x256x512xbf16, #tpu.memory_space<vmem>>, vector<1x256x512xbf16>
    %56 = vector.shape_cast %55 : vector<1x256x512xbf16> to vector<256x512xbf16>
    %cst_61 = arith.constant dense<0.000000e+00> : vector<16x512xf32>
    %57 = tpu.matmul %54, %56, %cst_61 {dimension_numbers = #tpu.dot_dimension_numbers<[1], [0], [0], [1], [0, 0, 1, 1], [], []>} : vector<16x256xbf16>, vector<256x512xbf16>, vector<16x512xf32> -> vector<16x512xf32>
    %58 = arith.addf %51, %57 : vector<16x512xf32>
    %59 = vector.broadcast %7 : vector<1x512xf32> to vector<16x512xf32>
    %60 = arith.addf %58, %59 : vector<16x512xf32>
    %cst_62 = arith.constant 0.000000e+00 : f32
    %61 = vector.broadcast %cst_62 : f32 to vector<16x512xf32>
    %62 = arith.maximumf %60, %61 : vector<16x512xf32>
    %c0_63 = arith.constant 0 : index
    %c0_64 = arith.constant 0 : index
    %c0_65 = arith.constant 0 : index
    %63 = vector.load %arg13[%c0_63, %c0_64, %c0_65] : memref<2x16x512xf32, #tpu.memory_space<vmem>>, vector<1x16x512xf32>
    %64 = vector.shape_cast %63 : vector<1x16x512xf32> to vector<16x512xf32>
    %65 = vector.shape_cast %62 : vector<16x512xf32> to vector<1x16x512xf32>
    tpu.vector_store %arg13[%c0_63, %c0_64, %c0_65], %65 {strides = array<i32>} : memref<2x16x512xf32, #tpu.memory_space<vmem>>, vector<1x16x512xf32>,
    %cst_66 = arith.constant 0.000000e+00 : f32
    %66 = vector.broadcast %cst_66 : f32 to vector<16x256xf32>
    %c1_67 = arith.constant 1 : index
    %c0_68 = arith.constant 0 : index
    %c0_69 = arith.constant 0 : index
    %67 = vector.load %arg11[%c1_67, %c0_68, %c0_69] : memref<2x18x64xf32, #tpu.memory_space<vmem>>, vector<1x16x64xf32>
    %68 = vector.shape_cast %67 : vector<1x16x64xf32> to vector<16x64xf32>
    %69 = arith.truncf %68 : vector<16x64xf32> to vector<16x64xbf16>
    %c0_70 = arith.constant 0 : index
    %c0_71 = arith.constant 0 : index
    %c0_72 = arith.constant 0 : index
    %70 = vector.load %arg1[%c0_70, %c0_71, %c0_72] : memref<3x64x256xbf16, #tpu.memory_space<vmem>>, vector<1x64x256xbf16>
    %71 = vector.shape_cast %70 : vector<1x64x256xbf16> to vector<64x256xbf16>
    %cst_73 = arith.constant dense<0.000000e+00> : vector<16x256xf32>
    %72 = tpu.matmul %69, %71, %cst_73 {dimension_numbers = #tpu.dot_dimension_numbers<[1], [0], [0], [1], [0, 0, 1, 1], [], []>} : vector<16x64xbf16>, vector<64x256xbf16>, vector<16x256xf32> -> vector<16x256xf32>
    %73 = arith.addf %66, %72 : vector<16x256xf32>
    %c1_74 = arith.constant 1 : index
    %c1_75 = arith.constant 1 : index
    %c0_76 = arith.constant 0 : index
    %74 = vector.load %arg11[%c1_74, %c1_75, %c0_76] : memref<2x18x64xf32, #tpu.memory_space<vmem>>, vector<1x16x64xf32>
    %75 = vector.shape_cast %74 : vector<1x16x64xf32> to vector<16x64xf32>
    %76 = arith.truncf %75 : vector<16x64xf32> to vector<16x64xbf16>
    %c1_77 = arith.constant 1 : index
    %c0_78 = arith.constant 0 : index
    %c0_79 = arith.constant 0 : index
    %77 = vector.load %arg1[%c1_77, %c0_78, %c0_79] : memref<3x64x256xbf16, #tpu.memory_space<vmem>>, vector<1x64x256xbf16>
    %78 = vector.shape_cast %77 : vector<1x64x256xbf16> to vector<64x256xbf16>
    %cst_80 = arith.constant dense<0.000000e+00> : vector<16x256xf32>
    %79 = tpu.matmul %76, %78, %cst_80 {dimension_numbers = #tpu.dot_dimension_numbers<[1], [0], [0], [1], [0, 0, 1, 1], [], []>} : vector<16x64xbf16>, vector<64x256xbf16>, vector<16x256xf32> -> vector<16x256xf32>
    %80 = arith.addf %73, %79 : vector<16x256xf32>
    %c1_81 = arith.constant 1 : index
    %c2_82 = arith.constant 2 : index
    %c0_83 = arith.constant 0 : index
    %81 = vector.load %arg11[%c1_81, %c2_82, %c0_83] : memref<2x18x64xf32, #tpu.memory_space<vmem>>, vector<1x16x64xf32>
    %82 = vector.shape_cast %81 : vector<1x16x64xf32> to vector<16x64xf32>
    %83 = arith.truncf %82 : vector<16x64xf32> to vector<16x64xbf16>
    %c2_84 = arith.constant 2 : index
    %c0_85 = arith.constant 0 : index
    %c0_86 = arith.constant 0 : index
    %84 = vector.load %arg1[%c2_84, %c0_85, %c0_86] : memref<3x64x256xbf16, #tpu.memory_space<vmem>>, vector<1x64x256xbf16>
    %85 = vector.shape_cast %84 : vector<1x64x256xbf16> to vector<64x256xbf16>
    %cst_87 = arith.constant dense<0.000000e+00> : vector<16x256xf32>
    %86 = tpu.matmul %83, %85, %cst_87 {dimension_numbers = #tpu.dot_dimension_numbers<[1], [0], [0], [1], [0, 0, 1, 1], [], []>} : vector<16x64xbf16>, vector<64x256xbf16>, vector<16x256xf32> -> vector<16x256xf32>
    %87 = arith.addf %80, %86 : vector<16x256xf32>
    %88 = vector.broadcast %6 : vector<1x256xf32> to vector<16x256xf32>
    %89 = arith.addf %87, %88 : vector<16x256xf32>
    %cst_88 = arith.constant 0.000000e+00 : f32
    %90 = vector.broadcast %cst_88 : f32 to vector<16x256xf32>
    %91 = arith.maximumf %89, %90 : vector<16x256xf32>
    %c1_89 = arith.constant 1 : index
    %c1_90 = arith.constant 1 : index
    %c0_91 = arith.constant 0 : index
    %92 = vector.load %arg12[%c1_89, %c1_90, %c0_91] : memref<2x18x256xf32, #tpu.memory_space<vmem>>, vector<1x16x256xf32>
    %93 = vector.shape_cast %92 : vector<1x16x256xf32> to vector<16x256xf32>
    %94 = vector.shape_cast %91 : vector<16x256xf32> to vector<1x16x256xf32>
    tpu.vector_store %arg12[%c1_89, %c1_90, %c0_91], %94 {strides = array<i32>} : memref<2x18x256xf32, #tpu.memory_space<vmem>>, vector<1x16x256xf32>,
    %cst_92 = arith.constant 0.000000e+00 : f32
    %95 = vector.broadcast %cst_92 : f32 to vector<16x512xf32>
    %c1_93 = arith.constant 1 : index
    %c0_94 = arith.constant 0 : index
    %c0_95 = arith.constant 0 : index
    %96 = vector.load %arg12[%c1_93, %c0_94, %c0_95] : memref<2x18x256xf32, #tpu.memory_space<vmem>>, vector<1x16x256xf32>
    %97 = vector.shape_cast %96 : vector<1x16x256xf32> to vector<16x256xf32>
    %98 = arith.truncf %97 : vector<16x256xf32> to vector<16x256xbf16>
    %c0_96 = arith.constant 0 : index
    %c0_97 = arith.constant 0 : index
    %c0_98 = arith.constant 0 : index
    %99 = vector.load %arg3[%c0_96, %c0_97, %c0_98] : memref<3x256x512xbf16, #tpu.memory_space<vmem>>, vector<1x256x512xbf16>
    %100 = vector.shape_cast %99 : vector<1x256x512xbf16> to vector<256x512xbf16>
    %cst_99 = arith.constant dense<0.000000e+00> : vector<16x512xf32>
    %101 = tpu.matmul %98, %100, %cst_99 {dimension_numbers = #tpu.dot_dimension_numbers<[1], [0], [0], [1], [0, 0, 1, 1], [], []>} : vector<16x256xbf16>, vector<256x512xbf16>, vector<16x512xf32> -> vector<16x512xf32>
    %102 = arith.addf %95, %101 : vector<16x512xf32>
    %c1_100 = arith.constant 1 : index
    %c1_101 = arith.constant 1 : index
    %c0_102 = arith.constant 0 : index
    %103 = vector.load %arg12[%c1_100, %c1_101, %c0_102] : memref<2x18x256xf32, #tpu.memory_space<vmem>>, vector<1x16x256xf32>
    %104 = vector.shape_cast %103 : vector<1x16x256xf32> to vector<16x256xf32>
    %105 = arith.truncf %104 : vector<16x256xf32> to vector<16x256xbf16>
    %c1_103 = arith.constant 1 : index
    %c0_104 = arith.constant 0 : index
    %c0_105 = arith.constant 0 : index
    %106 = vector.load %arg3[%c1_103, %c0_104, %c0_105] : memref<3x256x512xbf16, #tpu.memory_space<vmem>>, vector<1x256x512xbf16>
    %107 = vector.shape_cast %106 : vector<1x256x512xbf16> to vector<256x512xbf16>
    %cst_106 = arith.constant dense<0.000000e+00> : vector<16x512xf32>
    %108 = tpu.matmul %105, %107, %cst_106 {dimension_numbers = #tpu.dot_dimension_numbers<[1], [0], [0], [1], [0, 0, 1, 1], [], []>} : vector<16x256xbf16>, vector<256x512xbf16>, vector<16x512xf32> -> vector<16x512xf32>
    %109 = arith.addf %102, %108 : vector<16x512xf32>
    %c1_107 = arith.constant 1 : index
    %c2_108 = arith.constant 2 : index
    %c0_109 = arith.constant 0 : index
    %110 = vector.load %arg12[%c1_107, %c2_108, %c0_109] : memref<2x18x256xf32, #tpu.memory_space<vmem>>, vector<1x16x256xf32>
    %111 = vector.shape_cast %110 : vector<1x16x256xf32> to vector<16x256xf32>
    %112 = arith.truncf %111 : vector<16x256xf32> to vector<16x256xbf16>
    %c2_110 = arith.constant 2 : index
    %c0_111 = arith.constant 0 : index
    %c0_112 = arith.constant 0 : index
    %113 = vector.load %arg3[%c2_110, %c0_111, %c0_112] : memref<3x256x512xbf16, #tpu.memory_space<vmem>>, vector<1x256x512xbf16>
    %114 = vector.shape_cast %113 : vector<1x256x512xbf16> to vector<256x512xbf16>
    %cst_113 = arith.constant dense<0.000000e+00> : vector<16x512xf32>
    %115 = tpu.matmul %112, %114, %cst_113 {dimension_numbers = #tpu.dot_dimension_numbers<[1], [0], [0], [1], [0, 0, 1, 1], [], []>} : vector<16x256xbf16>, vector<256x512xbf16>, vector<16x512xf32> -> vector<16x512xf32>
    %116 = arith.addf %109, %115 : vector<16x512xf32>
    %117 = vector.broadcast %7 : vector<1x512xf32> to vector<16x512xf32>
    %118 = arith.addf %116, %117 : vector<16x512xf32>
    %cst_114 = arith.constant 0.000000e+00 : f32
    %119 = vector.broadcast %cst_114 : f32 to vector<16x512xf32>
    %120 = arith.maximumf %118, %119 : vector<16x512xf32>
    %c1_115 = arith.constant 1 : index
    %c0_116 = arith.constant 0 : index
    %c0_117 = arith.constant 0 : index
    %121 = vector.load %arg13[%c1_115, %c0_116, %c0_117] : memref<2x16x512xf32, #tpu.memory_space<vmem>>, vector<1x16x512xf32>
    %122 = vector.shape_cast %121 : vector<1x16x512xf32> to vector<16x512xf32>
    %123 = vector.shape_cast %120 : vector<16x512xf32> to vector<1x16x512xf32>
    tpu.vector_store %arg13[%c1_115, %c0_116, %c0_117], %123 {strides = array<i32>} : memref<2x16x512xf32, #tpu.memory_space<vmem>>, vector<1x16x512xf32>,
    %c0_118 = arith.constant 0 : index
    %c0_119 = arith.constant 0 : index
    %c0_120 = arith.constant 0 : index
    %124 = vector.load %arg13[%c0_118, %c0_119, %c0_120] : memref<2x16x512xf32, #tpu.memory_space<vmem>>, vector<1x1x512xf32>
    %125 = vector.shape_cast %124 : vector<1x1x512xf32> to vector<1x512xf32>
    %c0_121 = arith.constant 0 : index
    %c0_122 = arith.constant 0 : index
    %126 = vector.load %arg14[%c0_121, %c0_122] : memref<2x8192xf32, #tpu.memory_space<vmem>>, vector<1x512xf32>
    tpu.vector_store %arg14[%c0_121, %c0_122], %125 {strides = array<i32>} : memref<2x8192xf32, #tpu.memory_space<vmem>>, vector<1x512xf32>,
    %c0_123 = arith.constant 0 : index
    %c1_124 = arith.constant 1 : index
    %c0_125 = arith.constant 0 : index
    %127 = vector.load %arg13[%c0_123, %c1_124, %c0_125] : memref<2x16x512xf32, #tpu.memory_space<vmem>>, vector<1x1x512xf32>
    %128 = vector.shape_cast %127 : vector<1x1x512xf32> to vector<1x512xf32>
    %c0_126 = arith.constant 0 : index
    %c512 = arith.constant 512 : index
    %129 = vector.load %arg14[%c0_126, %c512] : memref<2x8192xf32, #tpu.memory_space<vmem>>, vector<1x512xf32>
    tpu.vector_store %arg14[%c0_126, %c512], %128 {strides = array<i32>} : memref<2x8192xf32, #tpu.memory_space<vmem>>, vector<1x512xf32>,
    %c0_127 = arith.constant 0 : index
    %c2_128 = arith.constant 2 : index
    %c0_129 = arith.constant 0 : index
    %130 = vector.load %arg13[%c0_127, %c2_128, %c0_129] : memref<2x16x512xf32, #tpu.memory_space<vmem>>, vector<1x1x512xf32>
    %131 = vector.shape_cast %130 : vector<1x1x512xf32> to vector<1x512xf32>
    %c0_130 = arith.constant 0 : index
    %c1024 = arith.constant 1024 : index
    %132 = vector.load %arg14[%c0_130, %c1024] : memref<2x8192xf32, #tpu.memory_space<vmem>>, vector<1x512xf32>
    tpu.vector_store %arg14[%c0_130, %c1024], %131 {strides = array<i32>} : memref<2x8192xf32, #tpu.memory_space<vmem>>, vector<1x512xf32>,
    %c0_131 = arith.constant 0 : index
    %c3 = arith.constant 3 : index
    %c0_132 = arith.constant 0 : index
    %133 = vector.load %arg13[%c0_131, %c3, %c0_132] : memref<2x16x512xf32, #tpu.memory_space<vmem>>, vector<1x1x512xf32>
    %134 = vector.shape_cast %133 : vector<1x1x512xf32> to vector<1x512xf32>
    %c0_133 = arith.constant 0 : index
    %c1536 = arith.constant 1536 : index
    %135 = vector.load %arg14[%c0_133, %c1536] : memref<2x8192xf32, #tpu.memory_space<vmem>>, vector<1x512xf32>
    tpu.vector_store %arg14[%c0_133, %c1536], %134 {strides = array<i32>} : memref<2x8192xf32, #tpu.memory_space<vmem>>, vector<1x512xf32>,
    %c0_134 = arith.constant 0 : index
    %c4 = arith.constant 4 : index
    %c0_135 = arith.constant 0 : index
    %136 = vector.load %arg13[%c0_134, %c4, %c0_135] : memref<2x16x512xf32, #tpu.memory_space<vmem>>, vector<1x1x512xf32>
    %137 = vector.shape_cast %136 : vector<1x1x512xf32> to vector<1x512xf32>
    %c0_136 = arith.constant 0 : index
    %c2048 = arith.constant 2048 : index
    %138 = vector.load %arg14[%c0_136, %c2048] : memref<2x8192xf32, #tpu.memory_space<vmem>>, vector<1x512xf32>
    tpu.vector_store %arg14[%c0_136, %c2048], %137 {strides = array<i32>} : memref<2x8192xf32, #tpu.memory_space<vmem>>, vector<1x512xf32>,
    %c0_137 = arith.constant 0 : index
    %c5 = arith.constant 5 : index
    %c0_138 = arith.constant 0 : index
    %139 = vector.load %arg13[%c0_137, %c5, %c0_138] : memref<2x16x512xf32, #tpu.memory_space<vmem>>, vector<1x1x512xf32>
    %140 = vector.shape_cast %139 : vector<1x1x512xf32> to vector<1x512xf32>
    %c0_139 = arith.constant 0 : index
    %c2560 = arith.constant 2560 : index
    %141 = vector.load %arg14[%c0_139, %c2560] : memref<2x8192xf32, #tpu.memory_space<vmem>>, vector<1x512xf32>
    tpu.vector_store %arg14[%c0_139, %c2560], %140 {strides = array<i32>} : memref<2x8192xf32, #tpu.memory_space<vmem>>, vector<1x512xf32>,
    %c0_140 = arith.constant 0 : index
    %c6 = arith.constant 6 : index
    %c0_141 = arith.constant 0 : index
    %142 = vector.load %arg13[%c0_140, %c6, %c0_141] : memref<2x16x512xf32, #tpu.memory_space<vmem>>, vector<1x1x512xf32>
    %143 = vector.shape_cast %142 : vector<1x1x512xf32> to vector<1x512xf32>
    %c0_142 = arith.constant 0 : index
    %c3072 = arith.constant 3072 : index
    %144 = vector.load %arg14[%c0_142, %c3072] : memref<2x8192xf32, #tpu.memory_space<vmem>>, vector<1x512xf32>
    tpu.vector_store %arg14[%c0_142, %c3072], %143 {strides = array<i32>} : memref<2x8192xf32, #tpu.memory_space<vmem>>, vector<1x512xf32>,
    %c0_143 = arith.constant 0 : index
    %c7 = arith.constant 7 : index
    %c0_144 = arith.constant 0 : index
    %145 = vector.load %arg13[%c0_143, %c7, %c0_144] : memref<2x16x512xf32, #tpu.memory_space<vmem>>, vector<1x1x512xf32>
    %146 = vector.shape_cast %145 : vector<1x1x512xf32> to vector<1x512xf32>
    %c0_145 = arith.constant 0 : index
    %c3584 = arith.constant 3584 : index
    %147 = vector.load %arg14[%c0_145, %c3584] : memref<2x8192xf32, #tpu.memory_space<vmem>>, vector<1x512xf32>
    tpu.vector_store %arg14[%c0_145, %c3584], %146 {strides = array<i32>} : memref<2x8192xf32, #tpu.memory_space<vmem>>, vector<1x512xf32>,
    %c0_146 = arith.constant 0 : index
    %c8 = arith.constant 8 : index
    %c0_147 = arith.constant 0 : index
    %148 = vector.load %arg13[%c0_146, %c8, %c0_147] : memref<2x16x512xf32, #tpu.memory_space<vmem>>, vector<1x1x512xf32>
    %149 = vector.shape_cast %148 : vector<1x1x512xf32> to vector<1x512xf32>
    %c0_148 = arith.constant 0 : index
    %c4096 = arith.constant 4096 : index
    %150 = vector.load %arg14[%c0_148, %c4096] : memref<2x8192xf32, #tpu.memory_space<vmem>>, vector<1x512xf32>
    tpu.vector_store %arg14[%c0_148, %c4096], %149 {strides = array<i32>} : memref<2x8192xf32, #tpu.memory_space<vmem>>, vector<1x512xf32>,
    %c0_149 = arith.constant 0 : index
    %c9 = arith.constant 9 : index
    %c0_150 = arith.constant 0 : index
    %151 = vector.load %arg13[%c0_149, %c9, %c0_150] : memref<2x16x512xf32, #tpu.memory_space<vmem>>, vector<1x1x512xf32>
    %152 = vector.shape_cast %151 : vector<1x1x512xf32> to vector<1x512xf32>
    %c0_151 = arith.constant 0 : index
    %c4608 = arith.constant 4608 : index
    %153 = vector.load %arg14[%c0_151, %c4608] : memref<2x8192xf32, #tpu.memory_space<vmem>>, vector<1x512xf32>
    tpu.vector_store %arg14[%c0_151, %c4608], %152 {strides = array<i32>} : memref<2x8192xf32, #tpu.memory_space<vmem>>, vector<1x512xf32>,
    %c0_152 = arith.constant 0 : index
    %c10 = arith.constant 10 : index
    %c0_153 = arith.constant 0 : index
    %154 = vector.load %arg13[%c0_152, %c10, %c0_153] : memref<2x16x512xf32, #tpu.memory_space<vmem>>, vector<1x1x512xf32>
    %155 = vector.shape_cast %154 : vector<1x1x512xf32> to vector<1x512xf32>
    %c0_154 = arith.constant 0 : index
    %c5120 = arith.constant 5120 : index
    %156 = vector.load %arg14[%c0_154, %c5120] : memref<2x8192xf32, #tpu.memory_space<vmem>>, vector<1x512xf32>
    tpu.vector_store %arg14[%c0_154, %c5120], %155 {strides = array<i32>} : memref<2x8192xf32, #tpu.memory_space<vmem>>, vector<1x512xf32>,
    %c0_155 = arith.constant 0 : index
    %c11 = arith.constant 11 : index
    %c0_156 = arith.constant 0 : index
    %157 = vector.load %arg13[%c0_155, %c11, %c0_156] : memref<2x16x512xf32, #tpu.memory_space<vmem>>, vector<1x1x512xf32>
    %158 = vector.shape_cast %157 : vector<1x1x512xf32> to vector<1x512xf32>
    %c0_157 = arith.constant 0 : index
    %c5632 = arith.constant 5632 : index
    %159 = vector.load %arg14[%c0_157, %c5632] : memref<2x8192xf32, #tpu.memory_space<vmem>>, vector<1x512xf32>
    tpu.vector_store %arg14[%c0_157, %c5632], %158 {strides = array<i32>} : memref<2x8192xf32, #tpu.memory_space<vmem>>, vector<1x512xf32>,
    %c0_158 = arith.constant 0 : index
    %c12 = arith.constant 12 : index
    %c0_159 = arith.constant 0 : index
    %160 = vector.load %arg13[%c0_158, %c12, %c0_159] : memref<2x16x512xf32, #tpu.memory_space<vmem>>, vector<1x1x512xf32>
    %161 = vector.shape_cast %160 : vector<1x1x512xf32> to vector<1x512xf32>
    %c0_160 = arith.constant 0 : index
    %c6144 = arith.constant 6144 : index
    %162 = vector.load %arg14[%c0_160, %c6144] : memref<2x8192xf32, #tpu.memory_space<vmem>>, vector<1x512xf32>
    tpu.vector_store %arg14[%c0_160, %c6144], %161 {strides = array<i32>} : memref<2x8192xf32, #tpu.memory_space<vmem>>, vector<1x512xf32>,
    %c0_161 = arith.constant 0 : index
    %c13 = arith.constant 13 : index
    %c0_162 = arith.constant 0 : index
    %163 = vector.load %arg13[%c0_161, %c13, %c0_162] : memref<2x16x512xf32, #tpu.memory_space<vmem>>, vector<1x1x512xf32>
    %164 = vector.shape_cast %163 : vector<1x1x512xf32> to vector<1x512xf32>
    %c0_163 = arith.constant 0 : index
    %c6656 = arith.constant 6656 : index
    %165 = vector.load %arg14[%c0_163, %c6656] : memref<2x8192xf32, #tpu.memory_space<vmem>>, vector<1x512xf32>
    tpu.vector_store %arg14[%c0_163, %c6656], %164 {strides = array<i32>} : memref<2x8192xf32, #tpu.memory_space<vmem>>, vector<1x512xf32>,
    %c0_164 = arith.constant 0 : index
    %c14 = arith.constant 14 : index
    %c0_165 = arith.constant 0 : index
    %166 = vector.load %arg13[%c0_164, %c14, %c0_165] : memref<2x16x512xf32, #tpu.memory_space<vmem>>, vector<1x1x512xf32>
    %167 = vector.shape_cast %166 : vector<1x1x512xf32> to vector<1x512xf32>
    %c0_166 = arith.constant 0 : index
    %c7168 = arith.constant 7168 : index
    %168 = vector.load %arg14[%c0_166, %c7168] : memref<2x8192xf32, #tpu.memory_space<vmem>>, vector<1x512xf32>
    tpu.vector_store %arg14[%c0_166, %c7168], %167 {strides = array<i32>} : memref<2x8192xf32, #tpu.memory_space<vmem>>, vector<1x512xf32>,
    %c0_167 = arith.constant 0 : index
    %c15 = arith.constant 15 : index
    %c0_168 = arith.constant 0 : index
    %169 = vector.load %arg13[%c0_167, %c15, %c0_168] : memref<2x16x512xf32, #tpu.memory_space<vmem>>, vector<1x1x512xf32>
    %170 = vector.shape_cast %169 : vector<1x1x512xf32> to vector<1x512xf32>
    %c0_169 = arith.constant 0 : index
    %c7680 = arith.constant 7680 : index
    %171 = vector.load %arg14[%c0_169, %c7680] : memref<2x8192xf32, #tpu.memory_space<vmem>>, vector<1x512xf32>
    tpu.vector_store %arg14[%c0_169, %c7680], %170 {strides = array<i32>} : memref<2x8192xf32, #tpu.memory_space<vmem>>, vector<1x512xf32>,
    %c1_170 = arith.constant 1 : index
    %c0_171 = arith.constant 0 : index
    %c0_172 = arith.constant 0 : index
    %172 = vector.load %arg13[%c1_170, %c0_171, %c0_172] : memref<2x16x512xf32, #tpu.memory_space<vmem>>, vector<1x1x512xf32>
    %173 = vector.shape_cast %172 : vector<1x1x512xf32> to vector<1x512xf32>
    %c1_173 = arith.constant 1 : index
    %c0_174 = arith.constant 0 : index
    %174 = vector.load %arg14[%c1_173, %c0_174] : memref<2x8192xf32, #tpu.memory_space<vmem>>, vector<1x512xf32>
    tpu.vector_store %arg14[%c1_173, %c0_174], %173 {strides = array<i32>} : memref<2x8192xf32, #tpu.memory_space<vmem>>, vector<1x512xf32>,
    %c1_175 = arith.constant 1 : index
    %c1_176 = arith.constant 1 : index
    %c0_177 = arith.constant 0 : index
    %175 = vector.load %arg13[%c1_175, %c1_176, %c0_177] : memref<2x16x512xf32, #tpu.memory_space<vmem>>, vector<1x1x512xf32>
    %176 = vector.shape_cast %175 : vector<1x1x512xf32> to vector<1x512xf32>
    %c1_178 = arith.constant 1 : index
    %c512_179 = arith.constant 512 : index
    %177 = vector.load %arg14[%c1_178, %c512_179] : memref<2x8192xf32, #tpu.memory_space<vmem>>, vector<1x512xf32>
    tpu.vector_store %arg14[%c1_178, %c512_179], %176 {strides = array<i32>} : memref<2x8192xf32, #tpu.memory_space<vmem>>, vector<1x512xf32>,
    %c1_180 = arith.constant 1 : index
    %c2_181 = arith.constant 2 : index
    %c0_182 = arith.constant 0 : index
    %178 = vector.load %arg13[%c1_180, %c2_181, %c0_182] : memref<2x16x512xf32, #tpu.memory_space<vmem>>, vector<1x1x512xf32>
    %179 = vector.shape_cast %178 : vector<1x1x512xf32> to vector<1x512xf32>
    %c1_183 = arith.constant 1 : index
    %c1024_184 = arith.constant 1024 : index
    %180 = vector.load %arg14[%c1_183, %c1024_184] : memref<2x8192xf32, #tpu.memory_space<vmem>>, vector<1x512xf32>
    tpu.vector_store %arg14[%c1_183, %c1024_184], %179 {strides = array<i32>} : memref<2x8192xf32, #tpu.memory_space<vmem>>, vector<1x512xf32>,
    %c1_185 = arith.constant 1 : index
    %c3_186 = arith.constant 3 : index
    %c0_187 = arith.constant 0 : index
    %181 = vector.load %arg13[%c1_185, %c3_186, %c0_187] : memref<2x16x512xf32, #tpu.memory_space<vmem>>, vector<1x1x512xf32>
    %182 = vector.shape_cast %181 : vector<1x1x512xf32> to vector<1x512xf32>
    %c1_188 = arith.constant 1 : index
    %c1536_189 = arith.constant 1536 : index
    %183 = vector.load %arg14[%c1_188, %c1536_189] : memref<2x8192xf32, #tpu.memory_space<vmem>>, vector<1x512xf32>
    tpu.vector_store %arg14[%c1_188, %c1536_189], %182 {strides = array<i32>} : memref<2x8192xf32, #tpu.memory_space<vmem>>, vector<1x512xf32>,
    %c1_190 = arith.constant 1 : index
    %c4_191 = arith.constant 4 : index
    %c0_192 = arith.constant 0 : index
    %184 = vector.load %arg13[%c1_190, %c4_191, %c0_192] : memref<2x16x512xf32, #tpu.memory_space<vmem>>, vector<1x1x512xf32>
    %185 = vector.shape_cast %184 : vector<1x1x512xf32> to vector<1x512xf32>
    %c1_193 = arith.constant 1 : index
    %c2048_194 = arith.constant 2048 : index
    %186 = vector.load %arg14[%c1_193, %c2048_194] : memref<2x8192xf32, #tpu.memory_space<vmem>>, vector<1x512xf32>
    tpu.vector_store %arg14[%c1_193, %c2048_194], %185 {strides = array<i32>} : memref<2x8192xf32, #tpu.memory_space<vmem>>, vector<1x512xf32>,
    %c1_195 = arith.constant 1 : index
    %c5_196 = arith.constant 5 : index
    %c0_197 = arith.constant 0 : index
    %187 = vector.load %arg13[%c1_195, %c5_196, %c0_197] : memref<2x16x512xf32, #tpu.memory_space<vmem>>, vector<1x1x512xf32>
    %188 = vector.shape_cast %187 : vector<1x1x512xf32> to vector<1x512xf32>
    %c1_198 = arith.constant 1 : index
    %c2560_199 = arith.constant 2560 : index
    %189 = vector.load %arg14[%c1_198, %c2560_199] : memref<2x8192xf32, #tpu.memory_space<vmem>>, vector<1x512xf32>
    tpu.vector_store %arg14[%c1_198, %c2560_199], %188 {strides = array<i32>} : memref<2x8192xf32, #tpu.memory_space<vmem>>, vector<1x512xf32>,
    %c1_200 = arith.constant 1 : index
    %c6_201 = arith.constant 6 : index
    %c0_202 = arith.constant 0 : index
    %190 = vector.load %arg13[%c1_200, %c6_201, %c0_202] : memref<2x16x512xf32, #tpu.memory_space<vmem>>, vector<1x1x512xf32>
    %191 = vector.shape_cast %190 : vector<1x1x512xf32> to vector<1x512xf32>
    %c1_203 = arith.constant 1 : index
    %c3072_204 = arith.constant 3072 : index
    %192 = vector.load %arg14[%c1_203, %c3072_204] : memref<2x8192xf32, #tpu.memory_space<vmem>>, vector<1x512xf32>
    tpu.vector_store %arg14[%c1_203, %c3072_204], %191 {strides = array<i32>} : memref<2x8192xf32, #tpu.memory_space<vmem>>, vector<1x512xf32>,
    %c1_205 = arith.constant 1 : index
    %c7_206 = arith.constant 7 : index
    %c0_207 = arith.constant 0 : index
    %193 = vector.load %arg13[%c1_205, %c7_206, %c0_207] : memref<2x16x512xf32, #tpu.memory_space<vmem>>, vector<1x1x512xf32>
    %194 = vector.shape_cast %193 : vector<1x1x512xf32> to vector<1x512xf32>
    %c1_208 = arith.constant 1 : index
    %c3584_209 = arith.constant 3584 : index
    %195 = vector.load %arg14[%c1_208, %c3584_209] : memref<2x8192xf32, #tpu.memory_space<vmem>>, vector<1x512xf32>
    tpu.vector_store %arg14[%c1_208, %c3584_209], %194 {strides = array<i32>} : memref<2x8192xf32, #tpu.memory_space<vmem>>, vector<1x512xf32>,
    %c1_210 = arith.constant 1 : index
    %c8_211 = arith.constant 8 : index
    %c0_212 = arith.constant 0 : index
    %196 = vector.load %arg13[%c1_210, %c8_211, %c0_212] : memref<2x16x512xf32, #tpu.memory_space<vmem>>, vector<1x1x512xf32>
    %197 = vector.shape_cast %196 : vector<1x1x512xf32> to vector<1x512xf32>
    %c1_213 = arith.constant 1 : index
    %c4096_214 = arith.constant 4096 : index
    %198 = vector.load %arg14[%c1_213, %c4096_214] : memref<2x8192xf32, #tpu.memory_space<vmem>>, vector<1x512xf32>
    tpu.vector_store %arg14[%c1_213, %c4096_214], %197 {strides = array<i32>} : memref<2x8192xf32, #tpu.memory_space<vmem>>, vector<1x512xf32>,
    %c1_215 = arith.constant 1 : index
    %c9_216 = arith.constant 9 : index
    %c0_217 = arith.constant 0 : index
    %199 = vector.load %arg13[%c1_215, %c9_216, %c0_217] : memref<2x16x512xf32, #tpu.memory_space<vmem>>, vector<1x1x512xf32>
    %200 = vector.shape_cast %199 : vector<1x1x512xf32> to vector<1x512xf32>
    %c1_218 = arith.constant 1 : index
    %c4608_219 = arith.constant 4608 : index
    %201 = vector.load %arg14[%c1_218, %c4608_219] : memref<2x8192xf32, #tpu.memory_space<vmem>>, vector<1x512xf32>
    tpu.vector_store %arg14[%c1_218, %c4608_219], %200 {strides = array<i32>} : memref<2x8192xf32, #tpu.memory_space<vmem>>, vector<1x512xf32>,
    %c1_220 = arith.constant 1 : index
    %c10_221 = arith.constant 10 : index
    %c0_222 = arith.constant 0 : index
    %202 = vector.load %arg13[%c1_220, %c10_221, %c0_222] : memref<2x16x512xf32, #tpu.memory_space<vmem>>, vector<1x1x512xf32>
    %203 = vector.shape_cast %202 : vector<1x1x512xf32> to vector<1x512xf32>
    %c1_223 = arith.constant 1 : index
    %c5120_224 = arith.constant 5120 : index
    %204 = vector.load %arg14[%c1_223, %c5120_224] : memref<2x8192xf32, #tpu.memory_space<vmem>>, vector<1x512xf32>
    tpu.vector_store %arg14[%c1_223, %c5120_224], %203 {strides = array<i32>} : memref<2x8192xf32, #tpu.memory_space<vmem>>, vector<1x512xf32>,
    %c1_225 = arith.constant 1 : index
    %c11_226 = arith.constant 11 : index
    %c0_227 = arith.constant 0 : index
    %205 = vector.load %arg13[%c1_225, %c11_226, %c0_227] : memref<2x16x512xf32, #tpu.memory_space<vmem>>, vector<1x1x512xf32>
    %206 = vector.shape_cast %205 : vector<1x1x512xf32> to vector<1x512xf32>
    %c1_228 = arith.constant 1 : index
    %c5632_229 = arith.constant 5632 : index
    %207 = vector.load %arg14[%c1_228, %c5632_229] : memref<2x8192xf32, #tpu.memory_space<vmem>>, vector<1x512xf32>
    tpu.vector_store %arg14[%c1_228, %c5632_229], %206 {strides = array<i32>} : memref<2x8192xf32, #tpu.memory_space<vmem>>, vector<1x512xf32>,
    %c1_230 = arith.constant 1 : index
    %c12_231 = arith.constant 12 : index
    %c0_232 = arith.constant 0 : index
    %208 = vector.load %arg13[%c1_230, %c12_231, %c0_232] : memref<2x16x512xf32, #tpu.memory_space<vmem>>, vector<1x1x512xf32>
    %209 = vector.shape_cast %208 : vector<1x1x512xf32> to vector<1x512xf32>
    %c1_233 = arith.constant 1 : index
    %c6144_234 = arith.constant 6144 : index
    %210 = vector.load %arg14[%c1_233, %c6144_234] : memref<2x8192xf32, #tpu.memory_space<vmem>>, vector<1x512xf32>
    tpu.vector_store %arg14[%c1_233, %c6144_234], %209 {strides = array<i32>} : memref<2x8192xf32, #tpu.memory_space<vmem>>, vector<1x512xf32>,
    %c1_235 = arith.constant 1 : index
    %c13_236 = arith.constant 13 : index
    %c0_237 = arith.constant 0 : index
    %211 = vector.load %arg13[%c1_235, %c13_236, %c0_237] : memref<2x16x512xf32, #tpu.memory_space<vmem>>, vector<1x1x512xf32>
    %212 = vector.shape_cast %211 : vector<1x1x512xf32> to vector<1x512xf32>
    %c1_238 = arith.constant 1 : index
    %c6656_239 = arith.constant 6656 : index
    %213 = vector.load %arg14[%c1_238, %c6656_239] : memref<2x8192xf32, #tpu.memory_space<vmem>>, vector<1x512xf32>
    tpu.vector_store %arg14[%c1_238, %c6656_239], %212 {strides = array<i32>} : memref<2x8192xf32, #tpu.memory_space<vmem>>, vector<1x512xf32>,
    %c1_240 = arith.constant 1 : index
    %c14_241 = arith.constant 14 : index
    %c0_242 = arith.constant 0 : index
    %214 = vector.load %arg13[%c1_240, %c14_241, %c0_242] : memref<2x16x512xf32, #tpu.memory_space<vmem>>, vector<1x1x512xf32>
    %215 = vector.shape_cast %214 : vector<1x1x512xf32> to vector<1x512xf32>
    %c1_243 = arith.constant 1 : index
    %c7168_244 = arith.constant 7168 : index
    %216 = vector.load %arg14[%c1_243, %c7168_244] : memref<2x8192xf32, #tpu.memory_space<vmem>>, vector<1x512xf32>
    tpu.vector_store %arg14[%c1_243, %c7168_244], %215 {strides = array<i32>} : memref<2x8192xf32, #tpu.memory_space<vmem>>, vector<1x512xf32>,
    %c1_245 = arith.constant 1 : index
    %c15_246 = arith.constant 15 : index
    %c0_247 = arith.constant 0 : index
    %217 = vector.load %arg13[%c1_245, %c15_246, %c0_247] : memref<2x16x512xf32, #tpu.memory_space<vmem>>, vector<1x1x512xf32>
    %218 = vector.shape_cast %217 : vector<1x1x512xf32> to vector<1x512xf32>
    %c1_248 = arith.constant 1 : index
    %c7680_249 = arith.constant 7680 : index
    %219 = vector.load %arg14[%c1_248, %c7680_249] : memref<2x8192xf32, #tpu.memory_space<vmem>>, vector<1x512xf32>
    tpu.vector_store %arg14[%c1_248, %c7680_249], %218 {strides = array<i32>} : memref<2x8192xf32, #tpu.memory_space<vmem>>, vector<1x512xf32>,
    %c0_250 = arith.constant 0 : index
    %c0_251 = arith.constant 0 : index
    %220 = vector.load %arg14[%c0_250, %c0_251] : memref<2x8192xf32, #tpu.memory_space<vmem>>, vector<2x8192xf32>
    %221 = arith.truncf %220 : vector<2x8192xf32> to vector<2x8192xbf16>
    %c0_252 = arith.constant 0 : index
    %c0_253 = arith.constant 0 : index
    %222 = vector.load %arg5[%c0_252, %c0_253] : memref<8192x128xbf16, #tpu.memory_space<vmem>>, vector<8192x128xbf16>
    %cst_254 = arith.constant dense<0.000000e+00> : vector<2x128xf32>
    %223 = tpu.matmul %221, %222, %cst_254 {dimension_numbers = #tpu.dot_dimension_numbers<[1], [0], [0], [1], [0, 0, 1, 1], [], []>} : vector<2x8192xbf16>, vector<8192x128xbf16>, vector<2x128xf32> -> vector<2x128xf32>
    %c0_255 = arith.constant 0 : index
    %c0_256 = arith.constant 0 : index
    %224 = vector.load %arg6[%c0_255, %c0_256] : memref<1x128xf32, #tpu.memory_space<vmem>>, vector<1x128xf32>
    %225 = vector.broadcast %224 : vector<1x128xf32> to vector<2x128xf32>
    %226 = arith.addf %223, %225 : vector<2x128xf32>
    %cst_257 = arith.constant 0.000000e+00 : f32
    %227 = vector.broadcast %cst_257 : f32 to vector<2x128xf32>
    %228 = arith.maximumf %226, %227 : vector<2x128xf32>
    %c0_258 = arith.constant 0 : index
    %c0_259 = arith.constant 0 : index
    %229 = vector.load %arg7[%c0_258, %c0_259] : memref<128x16xf32, #tpu.memory_space<vmem>>, vector<128x16xf32>
    %cst_260 = arith.constant dense<0.000000e+00> : vector<2x16xf32>
    %230 = tpu.matmul %228, %229, %cst_260 {dimension_numbers = #tpu.dot_dimension_numbers<[1], [0], [0], [1], [0, 0, 1, 1], [], []>} : vector<2x128xf32>, vector<128x16xf32>, vector<2x16xf32> -> vector<2x16xf32>
    %c0_261 = arith.constant 0 : index
    %c0_262 = arith.constant 0 : index
    %231 = vector.load %arg8[%c0_261, %c0_262] : memref<1x16xf32, #tpu.memory_space<vmem>>, vector<1x16xf32>
    %232 = vector.broadcast %231 : vector<1x16xf32> to vector<2x16xf32>
    %233 = arith.addf %230, %232 : vector<2x16xf32>
    %234 = vector.extract_strided_slice %233 {offsets = [0, 0], sizes = [2, 8], strides = [1, 1]} : vector<2x16xf32> to vector<2x8xf32>
    %c0_263 = arith.constant 0 : index
    %c0_264 = arith.constant 0 : index
    %235 = vector.load %arg9[%c0_263, %c0_264] : memref<2x8xf32, #tpu.memory_space<vmem>>, vector<2x8xf32>
    tpu.vector_store %arg9[%c0_263, %c0_264], %234 {strides = array<i32>} : memref<2x8xf32, #tpu.memory_space<vmem>>, vector<2x8xf32>,
    %236 = vector.extract_strided_slice %233 {offsets = [0, 8], sizes = [2, 8], strides = [1, 1]} : vector<2x16xf32> to vector<2x8xf32>
    %c0_265 = arith.constant 0 : index
    %c0_266 = arith.constant 0 : index
    %237 = vector.load %arg10[%c0_265, %c0_266] : memref<2x8xf32, #tpu.memory_space<vmem>>, vector<2x8xf32>
    tpu.vector_store %arg10[%c0_265, %c0_266], %236 {strides = array<i32>} : memref<2x8xf32, #tpu.memory_space<vmem>>, vector<2x8xf32>,
    return
  }
}

</mosaic_0001>

<bundles_post_ra>
// kernel: cnn_stochastic_policy_forward.1
= control target key start
LH: loop header
LB: loop body
LE: loop exit
PB: predicated region body
PF: predicated region fallthrough
CT: control target
= control target key end

     0   :  { %16 = vsyncpa [#allocation7], 0  ;;  %s13656_s0 = inlined_call_operand.vmem [shape: f32[2,16,64], index: 0, kind: input, shape index: {}]   ;;  %s13657_s1 = inlined_call_operand.hbm [shape: bf16[3,64,256], index: 1, kind: input, shape index: {}]   ;;  %s13658_s2 = inlined_call_operand.hbm [shape: f32[1,256], index: 2, kind: input, shape index: {}]   ;;  %s13659_s3 = inlined_call_operand.hbm [shape: bf16[3,256,512], index: 3, kind: input, shape index: {}]   ;;  %s13660_s4 = inlined_call_operand.hbm [shape: f32[1,512], index: 4, kind: input, shape index: {}]   ;;  %s13661_s5 = inlined_call_operand.hbm [shape: bf16[8192,128], index: 5, kind: input, shape index: {}]   ;;  %s13662_s6 = inlined_call_operand.hbm [shape: f32[1,128], index: 6, kind: input, shape index: {}]   ;;  %s13663_s7 = inlined_call_operand.vmem [shape: f32[128,16], index: 7, kind: input, shape index: {}]   ;;  %s13664_s8 = inlined_call_operand.hbm [shape: f32[1,16], index: 8, kind: input, shape index: {}]   ;;  %s13665_s9 = inlined_call_operand.hbm [shape: f32[2,8], index: 9, kind: output, shape index: {0}]   ;;  %s13666_s10 = inlined_call_operand.hbm [shape: f32[2,8], index: 10, kind: output, shape index: {1}]  }
   0x1   :  { %17 = vsyncpa [#allocation10], 0 }
   0x2   :  { %18 = vsyncpa [#allocation13], 0 }
   0x3   :  { %19 = vsyncpa [#allocation16], 0 }
   0x4   :  { %20 = vsyncpa [#allocation8], 0 }
   0x5   :  { %21 = vsyncpa [#allocation20], 0  ;;  %s13038_s13 = smov [#allocation9]   ;;  %s13039_s15 = smov [#allocation12]  }
   0x6   :  { %s42_s14 = sshll.u32 %s13038_s13, 4  ;;  %s64_s16 = sshll.u32 %s13039_s15, 4  ;;  %s43_s14 = int_to_ptr.vmem [resolvable:$true] %s42_s14  ;;  %s65_s16 = int_to_ptr.vmem [resolvable:$true] %s64_s16 }
   0x7   :  { %s12854_s17 = scalar_lea.vmem %s43_s14, 32  ;;  %p12859_p1 = scmp.lt.s32.totalorder %s43_s14, %s43_s14 }
   0x8   :  { %p12855_p0 = scmp.ne.s32.totalorder %s43_s14, %s12854_s17  ;;  %p12860_p2 = scmp.lt.s32.totalorder %s12854_s17, %s12854_s17 }
   0xa   :  { %p12861_p3 = por %p12860_p2, %p12859_p1 }
   0xc   :  { %p12862_p4 = pnand %p12861_p3, %p12855_p0 }
   0xe   :  { %12865 = shalt.err (!%p12862_p4)
}
   0xf   :  { %45 = dma.hbm_to_vmem [thread:$0]  %s13658_s2, 32, %s43_s14, [#allocation10]  }
  0x10   :  { %s12874_s20 = scalar_lea.vmem %s65_s16, 64  ;;  %p12879_p6 = scmp.lt.s32.totalorder %s65_s16, %s65_s16 }
  0x11   :  { %p12875_p5 = scmp.ne.s32.totalorder %s65_s16, %s12874_s20  ;;  %p12880_p7 = scmp.lt.s32.totalorder %s12874_s20, %s12874_s20 }
  0x13   :  { %p12881_p8 = por %p12880_p7, %p12879_p6 }
  0x15   :  { %p12882_p9 = pnand %p12881_p8, %p12875_p5 }
  0x17   :  { %12885 = shalt.err (!%p12882_p9)
}
  0x18   :  { %67 = dma.hbm_to_vmem [thread:$0]  %s13660_s4, 64, %s65_s16, [#allocation13]  }
  0x19   :  { %s13040_s23 = smov [#allocation15]   ;;  %s13041_s25 = smov [#allocation6]  }
  0x1a   :  { %s86_s24 = sshll.u32 %s13040_s23, 4  ;;  %s29_s26 = sshll.u32 %s13041_s25, 4  ;;  %s87_s24 = int_to_ptr.vmem [resolvable:$true] %s86_s24  ;;  %s30_s26 = int_to_ptr.vmem [resolvable:$true] %s29_s26 }
  0x1b   :  { %s12894_s27 = scalar_lea.vmem %s87_s24, 16  ;;  %s12898_s2 = scalar_lea.vmem %s87_s24, 32 }
  0x1c   :  { %p12895_p10 = scmp.ne.s32.totalorder %s87_s24, %s12894_s27  ;;  %p12899_p11 = scmp.lt.s32.totalorder %s87_s24, %s87_s24 }
  0x1d   :  { %p12900_p12 = scmp.lt.s32.totalorder %s12898_s2, %s12894_s27 }
  0x1f   :  { %p12901_p13 = por %p12900_p12, %p12899_p11 }
  0x21   :  { %p12902_p0 = pnand %p12901_p13, %p12895_p10 }
  0x23   :  { %12905 = shalt.err (!%p12902_p0)
}
  0x24   :  { %89 = dma.hbm_to_vmem [thread:$0]  %s13662_s6, 16, %s87_s24, [#allocation16]  }
  0x25   :  { %s12914_s30 = scalar_lea.vmem %s30_s26, 3072  ;;  %p12919_p2 = scmp.lt.s32.totalorder %s30_s26, %s30_s26 }
  0x26   :  { %p12915_p1 = scmp.ne.s32.totalorder %s30_s26, %s12914_s30  ;;  %p12920_p3 = scmp.lt.s32.totalorder %s12914_s30, %s12914_s30 }
  0x28   :  { %p12921_p4 = por %p12920_p3, %p12919_p2 }
  0x2a   :  { %p12922_p5 = pnand %p12921_p4, %p12915_p1 }
  0x2c   :  { %12925 = shalt.err (!%p12922_p5)
}
  0x2d   :  { %s13042_s4 = smov 128   ;;  %s13043_s11 = smov 8  }
  0x2e   :  { %35 = dma.hbm_to_vmem [thread:$0]  %s13657_s1, 3072, %s30_s26, [#allocation7], %s13042_s4, %s13042_s4, %s13043_s11  }
  0x2f   :  { %s13044_s14 = smov [#allocation11]  }
  0x30   :  { %s51_s15 = sshll.u32 %s13044_s14, 4  ;;  %s52_s15 = int_to_ptr.vmem [resolvable:$true] %s51_s15 }
  0x31   :  { %s12934_s16 = scalar_lea.vmem %s52_s15, 24576  ;;  %p12939_p7 = scmp.lt.s32.totalorder %s52_s15, %s52_s15 }
  0x32   :  { %p12935_p6 = scmp.ne.s32.totalorder %s52_s15, %s12934_s16  ;;  %p12940_p8 = scmp.lt.s32.totalorder %s12934_s16, %s12934_s16 }
  0x34   :  { %p12941_p9 = por %p12940_p8, %p12939_p7 }
  0x36   :  { %p12942_p10 = pnand %p12941_p9, %p12935_p6 }
  0x38   :  { %12945 = shalt.err (!%p12942_p10)
}
  0x39   :  { %s13045_s6 = smov 256   ;;  %s13046_s17 = smov 16  }
  0x3a   :  { %57 = dma.hbm_to_vmem [thread:$0]  %s13659_s3, 24576, %s52_s15, [#allocation10], %s13045_s6, %s13045_s6, %s13046_s17  }
  0x3b   :  { %s13047_s20 = smov [#allocation14]  }
  0x3c   :  { %s73_s21 = sshll.u32 %s13047_s20, 4  ;;  %s74_s21 = int_to_ptr.vmem [resolvable:$true] %s73_s21 }
  0x3d   :  { %s12954_s1 = scalar_lea.vmem %s74_s21, 65536  ;;  %p12959_p12 = scmp.lt.s32.totalorder %s74_s21, %s74_s21 }
  0x3e   :  { %p12955_p11 = scmp.ne.s32.totalorder %s74_s21, %s12954_s1  ;;  %p12960_p13 = scmp.lt.s32.totalorder %s12954_s1, %s12954_s1 }
  0x40   :  { %p12961_p0 = por %p12960_p13, %p12959_p12 }
  0x42   :  { %p12962_p1 = pnand %p12961_p0, %p12955_p11 }
  0x44   :  { %12965 = shalt.err (!%p12962_p1)
}
  0x45   :  { %s13048_s22 = smov 64   ;;  %s13049_s23 = smov 4  }
  0x46   :  { %79 = dma.hbm_to_vmem [thread:$0]  %s13661_s5, 65536, %s74_s21, [#allocation13], %s13048_s22, %s13048_s22, %s13049_s23  }
  0x47   :  { %s13050_s26 = smov [#allocation17]  }
  0x48   :  { %s98_s27 = sshll.u32 %s13050_s26, 4  ;;  %s99_s27 = int_to_ptr.vmem [resolvable:$true] %s98_s27 }
  0x49   :  { %s12974_s3 = scalar_lea.vmem %s99_s27, 16  ;;  %s12978_s2 = scalar_lea.vmem %s99_s27, 32 }
  0x4a   :  { %p12975_p2 = scmp.ne.s32.totalorder %s99_s27, %s12974_s3  ;;  %p12979_p3 = scmp.lt.s32.totalorder %s99_s27, %s99_s27 }
  0x4b   :  { %p12980_p4 = scmp.lt.s32.totalorder %s12978_s2, %s12974_s3 }
  0x4d   :  { %p12981_p5 = por %p12980_p4, %p12979_p3 }
  0x4f   :  { %p12982_p6 = pnand %p12981_p5, %p12975_p2 }
  0x51   :  { %12985 = shalt.err (!%p12982_p6)
}
  0x52   :  { %101 = dma.hbm_to_vmem [thread:$0]  %s13664_s8, 16, %s99_s27, [#allocation16]  }
  0x53   :  { %13026 = dma.done.wait [#allocation7], 3072  }
  0x54   :  { %13027 = vsyncadd [#allocation7], 4294964224 }
  0x55   :  { %13028 = dma.done.wait [#allocation10], 24608  }
  0x56   :  { %13029 = vsyncadd [#allocation10], 4294942688 }
  0x57   :  { %13030 = dma.done.wait [#allocation13], 65600  }
  0x58   :  { %13031 = vsyncadd [#allocation13], 4294901696 }
  0x59   :  { %13032 = dma.done.wait [#allocation16], 32  }
  0x5a   :  { %13033 = vsyncadd [#allocation16], 4294967264  ;;  %vm124_vm0 = vcmask 523264   ;;  %vm127_vm1 = vcmask 517120   ;;  %v13051_v0 = vmov 0   ;;  %v13052_v1 = vmov 0.0  }
  0x5b   :  { %252 = vmatprep.mubr.bf16.mxu1 %v13051_v0  ;;  %125 = vst.msk [vmem:[#allocation2] sm:$0xff] %vm124_vm0, %v13052_v1  ;;  %126 = vst.msk [vmem:[#allocation2 + $0x8] sm:$0xff] %vm124_vm0, %v13052_v1  ;;  %436 = vmatprep.mubr.bf16.mxu0 %v13051_v0  ;;  %v11670_v2 = vld [vmem:[#allocation6 + $0x74] ss:$8 sps:$4 sm:$0xff]   ;;  %v11672_v3 = vld [vmem:[#allocation6 + $0x70] ss:$8 sps:$4 sm:$0xff]  }
  0x5c   :  { %128 = vst.msk [vmem:[#allocation2 + $0x10] sm:$0x3] %vm127_vm1, %v13052_v1  ;;  %131 = vst.msk [vmem:[#allocation2 + $0x28] sm:$0x3] %vm127_vm1, %v13052_v1  ;;  %228 = vmatprep.subr.bf16.mxu1 %v11670_v2  ;;  %v11673_v4 = vld [vmem:[#allocation6 + $0x64] ss:$8 sps:$4 sm:$0xff]  }
  0x5d   :  { %129 = vst.msk [vmem:[#allocation2 + $0x18] sm:$0xff] %vm124_vm0, %v13052_v1  ;;  %130 = vst.msk [vmem:[#allocation2 + $0x20] sm:$0xff] %vm124_vm0, %v13052_v1  ;;  %229 = vmatpush1.bf16.msra.mxu1 %v11672_v3  ;;  %v11675_v5 = vld [vmem:[#allocation6 + $0x60] ss:$8 sps:$4 sm:$0xff]   ;;  %v11676_v6 = vld [vmem:[#allocation6 + $0x54] ss:$8 sps:$4 sm:$0xff]  }
  0x5e   :  { %132 = vst [vmem:[#allocation3 + $0x30] sm:$0xff] %v13052_v1  ;;  %133 = vst [vmem:[#allocation3] sm:$0xff] %v13052_v1  ;;  %230 = vmatprep.subr.bf16.mxu1 %v11673_v4  ;;  %v11681_v7 = vld [vmem:[#allocation6 + $0xb4] ss:$8 sps:$4 sm:$0xff]   ;;  %v11678_v8 = vld [vmem:[#allocation6 + $0x50] ss:$8 sps:$4 sm:$0xff]  }
  0x5f   :  { %136 = vst [vmem:[#allocation3 + $0x50] sm:$0x3] %v13052_v1  ;;  %137 = vst [vmem:[#allocation3 + $0x20] sm:$0x3] %v13052_v1  ;;  %v11684_v9 = vld [vmem:[#allocation6 + $0xb0] ss:$8 sps:$4 sm:$0xff]   ;;  %412 = vmatprep.subr.bf16.mxu0 %v11681_v7 }
  0x60   :  { %138 = vst [vmem:[#allocation3 + $0x8] sm:$0xff] %v13052_v1  ;;  %139 = vst [vmem:[#allocation3 + $0x38] sm:$0xff] %v13052_v1  ;;  %v144_v10 = vld [vmem:[%s13656_s0] sm:$0xff]  ;;  %v145_v11 = vld [vmem:[%s13656_s0 + $0x8] sm:$0xff]  ;;  %413 = vmatpush1.bf16.msra.mxu0 %v11684_v9  ;;  %vm474_vm2 = vcmask 1040384   ;;  %vm1552_vm4 = vcmask 1046528  }
  0x61   :  { %142 = vst [vmem:[#allocation3 + $0x10] sm:$0x3] %v13052_v1  ;;  %143 = vst [vmem:[#allocation3 + $0x40] sm:$0x3] %v13052_v1  ;;  %231 = vmatpush1.bf16.msra.mxu1 %v11675_v5  ;;  %v11679_v12 = vld [vmem:[#allocation6 + $0x44] ss:$8 sps:$4 sm:$0xff]  }
  0x62   :  { %148 = vst.msk [vmem:[#allocation2 + $0x1] sm:$0xff] %vm124_vm0, %v144_v10  ;;  %232 = vmatprep.subr.bf16.mxu1 %v11676_v6  ;;  %149 = vst.msk [vmem:[#allocation2 + $0x9] sm:$0xff] %vm124_vm0, %v145_v11  ;;  %v11688_v13 = vld [vmem:[#allocation6 + $0xa4] ss:$8 sps:$4 sm:$0xff]   ;;  %v11690_v14 = vld [vmem:[#allocation6 + $0xa0] ss:$8 sps:$4 sm:$0xff]  }
  0x63   :  { %v11683_v15 = vld [vmem:[#allocation6 + $0x40] ss:$8 sps:$4 sm:$0xff]   ;;  %v11687_v16 = vld [vmem:[#allocation6 + $0x34] ss:$8 sps:$4 sm:$0xff]   ;;  %414 = vmatprep.subr.bf16.mxu0 %v11688_v13  ;;  %v11696_v18 = vld [vmem:[#allocation6 + $0x90] ss:$8 sps:$4 sm:$0xff]  }
  0x64   :  { %415 = vmatpush1.bf16.msra.mxu0 %v11690_v14  ;;  %v11694_v17 = vld [vmem:[#allocation6 + $0x94] ss:$8 sps:$4 sm:$0xff]   ;;  %v11685_v19 = vld [vmem:[#allocation6 + $0x30] ss:$8 sps:$4 sm:$0xff]   ;;  %v11693_v22 = vld [vmem:[#allocation6 + $0x24] ss:$8 sps:$4 sm:$0xff]  }
  0x65   :  { %233 = vmatpush1.bf16.msra.mxu1 %v11678_v8  ;;  %416 = vmatprep.subr.bf16.mxu0 %v11694_v17  ;;  %v11700_v23 = vld [vmem:[#allocation6 + $0x84] ss:$8 sps:$4 sm:$0xff]   ;;  %v11702_v25 = vld [vmem:[#allocation6 + $0x80] ss:$8 sps:$4 sm:$0xff]   ;;  %v11699_v29 = vld [vmem:[#allocation6 + $0x14] ss:$8 sps:$4 sm:$0xff]  }
  0x66   :  { %234 = vmatprep.subr.bf16.mxu1 %v11679_v12  ;;  %v11691_v28 = vld [vmem:[#allocation6 + $0x20] ss:$8 sps:$4 sm:$0xff]   ;;  %v11697_v33 = vld [vmem:[#allocation6 + $0x10] ss:$8 sps:$4 sm:$0xff]   ;;  %v11705_v35 = vld [vmem:[#allocation6 + $0x4] ss:$8 sps:$4 sm:$0xff]  }
  0x67   :  { %v11709_v31 = vld [vmem:[#allocation11 + $0x2e8] ss:$16 sps:$4 sm:$0xff]   ;;  %v11711_v32 = vld [vmem:[#allocation11 + $0x2ec] ss:$16 sps:$4 sm:$0xff]   ;;  %v11708_v41 = vld [vmem:[#allocation11 + $0x2e4] ss:$16 sps:$4 sm:$0xff]  }
  0x68   :  { %417 = vmatpush1.bf16.msra.mxu0 %v11696_v18  ;;  %v11717_v34 = vld [vmem:[#allocation11 + $0x2cc] ss:$16 sps:$4 sm:$0xff]   ;;  %v11715_v37 = vld [vmem:[#allocation11 + $0x2c8] ss:$16 sps:$4 sm:$0xff]   ;;  %v11706_v43 = vld [vmem:[#allocation11 + $0x2e0] ss:$16 sps:$4 sm:$0xff]  }
  0x69   :  { %v165_v20 = vld [vmem:[#allocation2 + $0x1] sm:$0xff]  ;;  %235 = vmatpush1.bf16.msra.mxu1 %v11683_v15  ;;  %v166_v21 = vld [vmem:[#allocation2 + $0x9] sm:$0xff]  ;;  %418 = vmatprep.subr.bf16.mxu0 %v11700_v23  ;;  %vm636_vm3 = vsmask.f32 7424  ;;  %vm13054_vm6 = vmmov 0   ;;  %vm9888_vm7 = vcmask 58368  }
  0x6a   :  { %v167_v24 = vpack.c.bf16 %v166_v21, %v165_v20  ;;  %314 = vmatprep.subr.bf16.mxu1 %v11687_v16  ;;  %v349_v26 = vld [vmem:[#allocation2 + $0x2] sm:$0xff]  ;;  %v350_v27 = vld [vmem:[#allocation2 + $0xa] sm:$0xff]  ;;  %s13056_s18 = smov 120  }
  0x6b   :  { %v351_v30 = vpack.c.bf16 %v350_v27, %v349_v26  ;;  %v11703_v36 = vld [vmem:[#allocation6] ss:$8 sps:$4 sm:$0xff]   ;;  %v154_v38 = vld [vmem:[#allocation2] sm:$0xff]  ;;  %v155_v40 = vld [vmem:[#allocation2 + $0x8] sm:$0xff] }
  0x6c   :  { %9950 = vmatmul.mubr.msk.bf16.vlgmr.msra.gmra.mxu1 %vm124_vm0, %v167_v24  ;;  %419 = vmatpush1.bf16.msra.mxu0 %v11702_v25  ;;  %v11723_v39 = vld [vmem:[#allocation11 + $0x2ac] ss:$16 sps:$4 sm:$0xff]   ;;  %v11721_v42 = vld [vmem:[#allocation11 + $0x2a8] ss:$16 sps:$4 sm:$0xff]   ;;  %v156_v45 = vpack.c.bf16 %v155_v40, %v154_v38  ;;  %v11714_v46 = vld [vmem:[#allocation11 + $0x2c4] ss:$16 sps:$4 sm:$0xff]  }
  0x6d   :  { %315 = vmatpush1.bf16.msra.mxu1 %v11685_v19  ;;  %338 = vmatprep.mubr.bf16.mxu1 %v13051_v0  ;;  %v11729_v44 = vld [vmem:[#allocation11 + $0x28c] ss:$16 sps:$4 sm:$0xff]   ;;  %v11727_v47 = vld [vmem:[#allocation11 + $0x288] ss:$16 sps:$4 sm:$0xff]   ;;  %v11712_v48 = vld [vmem:[#allocation11 + $0x2c0] ss:$16 sps:$4 sm:$0xff]  }
  0x6e   :  { %316 = vmatprep.subr.bf16.mxu1 %v11693_v22  ;;  %1026 = vmatprep.subr.bf16.mxu0 %v11711_v32  ;;  %v11720_v49 = vld [vmem:[#allocation11 + $0x2a4] ss:$16 sps:$4 sm:$0xff]   ;;  %v11718_v50 = vld [vmem:[#allocation11 + $0x2a0] ss:$16 sps:$4 sm:$0xff]   ;;  %v11735_v54 = vld [vmem:[#allocation11 + $0x26c] ss:$16 sps:$4 sm:$0xff]  }
  0x6f   :  { %9968 = vmatmul.mubr.msk.bf16.vlgmr.msra.gmra.mxu0 %vm124_vm0, %v351_v30  ;;  %v11726_v51 = vld [vmem:[#allocation11 + $0x284] ss:$16 sps:$4 sm:$0xff]   ;;  %v11724_v52 = vld [vmem:[#allocation11 + $0x280] ss:$16 sps:$4 sm:$0xff]   ;;  %v11733_v56 = vld [vmem:[#allocation11 + $0x268] ss:$16 sps:$4 sm:$0xff]  }
  0x70   :  { %1027 = vmatpush1.bf16.msra.mxu0 %v11709_v31  ;;  %v11732_v53 = vld [vmem:[#allocation11 + $0x264] ss:$16 sps:$4 sm:$0xff]   ;;  %v11730_v55 = vld [vmem:[#allocation11 + $0x260] ss:$16 sps:$4 sm:$0xff]   ;;  %v11741_v58 = vld [vmem:[#allocation11 + $0x24c] ss:$16 sps:$4 sm:$0xff]  }
  0x71   :  { %317 = vmatpush1.bf16.msra.mxu1 %v11691_v28  ;;  %1028 = vmatprep.subr.bf16.mxu0 %v11717_v34  ;;  %v11738_v57 = vld [vmem:[#allocation11 + $0x244] ss:$16 sps:$4 sm:$0xff]   ;;  %v11736_v59 = vld [vmem:[#allocation11 + $0x240] ss:$16 sps:$4 sm:$0xff]   ;;  %v11739_v60 = vld [vmem:[#allocation11 + $0x248] ss:$16 sps:$4 sm:$0xff]  }
  0x72   :  { %318 = vmatprep.subr.bf16.mxu1 %v11699_v29  ;;  %v11742_v61 = vld [vmem:[#allocation11 + $0x220] ss:$16 sps:$4 sm:$0xff]   ;;  %v11744_v62 = vld [vmem:[#allocation11 + $0x224] ss:$16 sps:$4 sm:$0xff]   ;;  %v11745_v63 = vld [vmem:[#allocation11 + $0x228] ss:$16 sps:$4 sm:$0xff]  }
  0x73   :  { %v11747_v2 = vld [vmem:[#allocation11 + $0x22c] ss:$16 sps:$4 sm:$0xff]   ;;  %v11750_v3 = vld [vmem:[#allocation11 + $0x204] ss:$16 sps:$4 sm:$0xff]   ;;  %v11748_v4 = vld [vmem:[#allocation11 + $0x200] ss:$16 sps:$4 sm:$0xff]  }
  0x74   :  { %1029 = vmatpush1.bf16.msra.mxu0 %v11715_v37  ;;  %v11751_v5 = vld [vmem:[#allocation11 + $0x208] ss:$16 sps:$4 sm:$0xff]   ;;  %v11753_v6 = vld [vmem:[#allocation11 + $0x20c] ss:$16 sps:$4 sm:$0xff]   ;;  %v11756_v7 = vld [vmem:[#allocation11 + $0x3e4] ss:$16 sps:$4 sm:$0xff]  }
  0x75   :  { %319 = vmatpush1.bf16.msra.mxu1 %v11697_v33  ;;  %1030 = vmatprep.subr.bf16.mxu0 %v11723_v39  ;;  %v11759_v8 = vld [vmem:[#allocation11 + $0x3ec] ss:$16 sps:$4 sm:$0xff]   ;;  %v11754_v9 = vld [vmem:[#allocation11 + $0x3e0] ss:$16 sps:$4 sm:$0xff]   ;;  %v11757_v10 = vld [vmem:[#allocation11 + $0x3e8] ss:$16 sps:$4 sm:$0xff]  }
  0x76   :  { %320 = vmatprep.subr.bf16.mxu1 %v11705_v35  ;;  %v11762_v11 = vld [vmem:[#allocation11 + $0x3c4] ss:$16 sps:$4 sm:$0xff]   ;;  %v11765_v12 = vld [vmem:[#allocation11 + $0x3cc] ss:$16 sps:$4 sm:$0xff]   ;;  %v11760_v13 = vld [vmem:[#allocation11 + $0x3c0] ss:$16 sps:$4 sm:$0xff]  }
  0x77   :  { %v11763_v14 = vld [vmem:[#allocation11 + $0x3c8] ss:$16 sps:$4 sm:$0xff]   ;;  %v11768_v15 = vld [vmem:[#allocation11 + $0x3a4] ss:$16 sps:$4 sm:$0xff]   ;;  %v11771_v16 = vld [vmem:[#allocation11 + $0x3ac] ss:$16 sps:$4 sm:$0xff]  }
  0x78   :  { %1031 = vmatpush1.bf16.msra.mxu0 %v11721_v42  ;;  %v11766_v17 = vld [vmem:[#allocation11 + $0x3a0] ss:$16 sps:$4 sm:$0xff]   ;;  %v11769_v18 = vld [vmem:[#allocation11 + $0x3a8] ss:$16 sps:$4 sm:$0xff]   ;;  %v11774_v19 = vld [vmem:[#allocation11 + $0x384] ss:$16 sps:$4 sm:$0xff]   ;;  %v452_v42 = vlaneseq }
  0x79   :  { %321 = vmatpush1.bf16.msra.mxu1 %v11703_v36  ;;  %1032 = vmatprep.subr.bf16.mxu0 %v11729_v44  ;;  %v11777_v20 = vld [vmem:[#allocation11 + $0x38c] ss:$16 sps:$4 sm:$0xff]   ;;  %v11772_v21 = vld [vmem:[#allocation11 + $0x380] ss:$16 sps:$4 sm:$0xff]   ;;  %v11775_v22 = vld [vmem:[#allocation11 + $0x388] ss:$16 sps:$4 sm:$0xff]  }
  0x7a   :  { %983 = vmatprep.subr.bf16.mxu1 %v11708_v41  ;;  %v11780_v23 = vld [vmem:[#allocation11 + $0x364] ss:$16 sps:$4 sm:$0xff]   ;;  %v11783_v24 = vld [vmem:[#allocation11 + $0x36c] ss:$16 sps:$4 sm:$0xff]   ;;  %v11778_v25 = vld [vmem:[#allocation11 + $0x360] ss:$16 sps:$4 sm:$0xff]  }
  0x7b   :  { %v11781_v26 = vld [vmem:[#allocation11 + $0x368] ss:$16 sps:$4 sm:$0xff]   ;;  %v11784_v27 = vld [vmem:[#allocation11 + $0x340] ss:$16 sps:$4 sm:$0xff]   ;;  %v11786_v28 = vld [vmem:[#allocation11 + $0x344] ss:$16 sps:$4 sm:$0xff]  }
  0x7c   :  { %9959 = vmatmul.mubr.msk.bf16.vlgmr.msra.gmra.mxu1 %vm124_vm0, %v156_v45  ;;  %1033 = vmatpush1.bf16.msra.mxu0 %v11727_v47  ;;  %v11787_v29 = vld [vmem:[#allocation11 + $0x348] ss:$16 sps:$4 sm:$0xff]   ;;  %v11789_v30 = vld [vmem:[#allocation11 + $0x34c] ss:$16 sps:$4 sm:$0xff]   ;;  %v11792_v31 = vld [vmem:[#allocation11 + $0x324] ss:$16 sps:$4 sm:$0xff]  }
  0x7d   :  { %984 = vmatpush1.bf16.msra.mxu1 %v11706_v43  ;;  %1034 = vmatprep.subr.bf16.mxu0 %v11735_v54  ;;  %v11790_v32 = vld [vmem:[#allocation11 + $0x320] ss:$16 sps:$4 sm:$0xff]   ;;  %v11795_v33 = vld [vmem:[#allocation11 + $0x32c] ss:$16 sps:$4 sm:$0xff]   ;;  %v11793_v34 = vld [vmem:[#allocation11 + $0x328] ss:$16 sps:$4 sm:$0xff]  }
  0x7e   :  { %985 = vmatprep.subr.bf16.mxu1 %v11714_v46  ;;  %v11798_v35 = vld [vmem:[#allocation11 + $0x304] ss:$16 sps:$4 sm:$0xff]   ;;  %v11801_v36 = vld [vmem:[#allocation11 + $0x30c] ss:$16 sps:$4 sm:$0xff]   ;;  %v11796_v37 = vld [vmem:[#allocation11 + $0x300] ss:$16 sps:$4 sm:$0xff]  }
  0x7f   :  { %v11799_v38 = vld [vmem:[#allocation11 + $0x308] ss:$16 sps:$4 sm:$0xff]   ;;  %v11804_v39 = vld [vmem:[#allocation11 + $0xe4] ss:$16 sps:$4 sm:$0xff]   ;;  %v11807_v40 = vld [vmem:[#allocation11 + $0xec] ss:$16 sps:$4 sm:$0xff]  }
  0x80   :  { %1035 = vmatpush1.bf16.msra.mxu0 %v11733_v56  ;;  %v13167_v44 = vshrl.u32 %v452_v42, 7  ;;  %v152_v47 = vld [vmem:[#allocation9] sm:$0x3]  ;;  %vm13248_vm5 = vcmp.lt.s32.totalorder %v452_v42, 512 }
  0x81   :  { %986 = vmatpush1.bf16.msra.mxu1 %v11712_v48  ;;  %1036 = vmatprep.subr.bf16.mxu0 %v11741_v58 }
  0x82   :  { %987 = vmatprep.subr.bf16.mxu1 %v11720_v49  ;;  %v454_v48 = vsub.s32 0, %v13167_v44 }
  0x84   :  { %1037 = vmatpush1.bf16.msra.mxu0 %v11739_v60  ;;  %v13173_v54 = vrot.slane %v152_v47, %v454_v48 }
  0x85   :  { %988 = vmatpush1.bf16.msra.mxu1 %v11718_v50  ;;  %1038 = vmatprep.subr.bf16.mxu0 %v11747_v2  ;;  %v458_v50 = vsub.s32 1, %v13167_v44 }
  0x86   :  { %989 = vmatprep.subr.bf16.mxu1 %v11726_v51 }
  0x87   :  { %v13177_v58 = vrot.slane %v152_v47, %v458_v50  ;;  %v11810_v47 = vld [vmem:[#allocation11 + $0xc4] ss:$16 sps:$4 sm:$0xff]  }
  0x88   :  { %1039 = vmatpush1.bf16.msra.mxu0 %v11745_v63 }
  0x89   :  { %990 = vmatpush1.bf16.msra.mxu1 %v11724_v52  ;;  %1040 = vmatprep.subr.bf16.mxu0 %v11753_v6 }
  0x8a   :  { %991 = vmatprep.subr.bf16.mxu1 %v11732_v53 }
  0x8c   :  { %1041 = vmatpush1.bf16.msra.mxu0 %v11751_v5 }
  0x8d   :  { %992 = vmatpush1.bf16.msra.mxu1 %v11730_v55  ;;  %1042 = vmatprep.subr.bf16.mxu0 %v11759_v8 }
  0x8e   :  { %993 = vmatprep.subr.bf16.mxu1 %v11738_v57 }
  0x90   :  { %1043 = vmatpush2.bf16.msra.mxu0 %v11757_v10 }
  0x91   :  { %994 = vmatpush1.bf16.msra.mxu1 %v11736_v59  ;;  %1044 = vmatprep.subr.bf16.mxu0 %v11765_v12 }
  0x92   :  { %995 = vmatprep.subr.bf16.mxu1 %v11744_v62 }
  0x94   :  { %1045 = vmatpush2.bf16.msra.mxu0 %v11763_v14 }
  0x95   :  { %996 = vmatpush1.bf16.msra.mxu1 %v11742_v61  ;;  %1046 = vmatprep.subr.bf16.mxu0 %v11771_v16 }
  0x96   :  { %997 = vmatprep.subr.bf16.mxu1 %v11750_v3 }
  0x98   :  { %1047 = vmatpush2.bf16.msra.mxu0 %v11769_v18 }
  0x99   :  { %998 = vmatpush1.bf16.msra.mxu1 %v11748_v4  ;;  %1048 = vmatprep.subr.bf16.mxu0 %v11777_v20 }
  0x9a   :  { %999 = vmatprep.subr.bf16.mxu1 %v11756_v7 }
  0x9c   :  { %1049 = vmatpush2.bf16.msra.mxu0 %v11775_v22 }
  0x9d   :  { %1000 = vmatpush2.bf16.msra.mxu1 %v11754_v9  ;;  %1050 = vmatprep.subr.bf16.mxu0 %v11783_v24 }
  0x9e   :  { %1001 = vmatprep.subr.bf16.mxu1 %v11762_v11 }
  0xa0   :  { %1051 = vmatpush2.bf16.msra.mxu0 %v11781_v26 }
  0xa1   :  { %1002 = vmatpush2.bf16.msra.mxu1 %v11760_v13  ;;  %1052 = vmatprep.subr.bf16.mxu0 %v11789_v30 }
  0xa2   :  { %1003 = vmatprep.subr.bf16.mxu1 %v11768_v15 }
  0xa4   :  { %1053 = vmatpush2.bf16.msra.mxu0 %v11787_v29 }
  0xa5   :  { %1004 = vmatpush2.bf16.msra.mxu1 %v11766_v17  ;;  %1054 = vmatprep.subr.bf16.mxu0 %v11795_v33 }
  0xa6   :  { %1005 = vmatprep.subr.bf16.mxu1 %v11774_v19 }
  0xa8   :  { %1055 = vmatpush2.bf16.msra.mxu0 %v11793_v34 }
  0xa9   :  { %1006 = vmatpush2.bf16.msra.mxu1 %v11772_v21  ;;  %1056 = vmatprep.subr.bf16.mxu0 %v11801_v36  ;;  %v11805_v36 = vld [vmem:[#allocation11 + $0xe8] ss:$16 sps:$4 sm:$0xff]  }
  0xaa   :  { %1007 = vmatprep.subr.bf16.mxu1 %v11780_v23 }
  0xac   :  { %1057 = vmatpush2.bf16.msra.mxu0 %v11799_v38 }
  0xad   :  { %1008 = vmatpush2.bf16.msra.mxu1 %v11778_v25  ;;  %1432 = vmatprep.subr.bf16.mxu0 %v11807_v40 }
  0xae   :  { %1009 = vmatprep.subr.bf16.mxu1 %v11786_v28 }
  0xb1   :  { %1010 = vmatpush2.bf16.msra.mxu1 %v11784_v27 }
  0xb2   :  { %1011 = vmatprep.subr.bf16.mxu1 %v11792_v31 }
  0xb5   :  { %1012 = vmatpush2.bf16.msra.mxu1 %v11790_v32 }
  0xb6   :  { %1013 = vmatprep.subr.bf16.mxu1 %v11798_v35  ;;  %v11802_v35 = vld [vmem:[#allocation11 + $0xe0] ss:$16 sps:$4 sm:$0xff]  }
  0xb9   :  { %1014 = vmatpush2.bf16.msra.mxu1 %v11796_v37 }
  0xba   :  { %1389 = vmatprep.subr.bf16.mxu1 %v11804_v39 }
 0x12c   :  { %v254_v41 = vpop.f32.mrf.mxu1 }
 0x12e   :  { %v256_v43 = vpop.f32.mrf.mxu1 }
 0x12f   :  { %v438_v46 = vpop.f32.mrf.mxu0 }
 0x130   :  { %v258_v45 = vpop.f32.mrf.mxu1 }
 0x131   :  { %v440_v51 = vpop.f32.mrf.mxu0 }
 0x132   :  { %v260_v49 = vpop.f32.mrf.mxu1 }
 0x133   :  { %v442_v59 = vpop.f32.mrf.mxu0 }
 0x135   :  { %v444_v7 = vpop.f32.mrf.mxu0 }
 0x13c   :  { %v340_v52 = vpop.f32.mrf.mxu1 }
 0x13d   :  { %v341_v53 = vadd.f32 %v340_v52, %v254_v41  ;;  %v11808_v52 = vld [vmem:[#allocation11 + $0xc0] ss:$16 sps:$4 sm:$0xff]  }
 0x13e   :  { %v342_v55 = vpop.f32.mrf.mxu1 }
 0x13f   :  { %v447_v56 = vadd.f32 %v438_v46, %v341_v53  ;;  %v343_v57 = vadd.f32 %v342_v55, %v256_v43  ;;  %v11811_v53 = vld [vmem:[#allocation11 + $0xc8] ss:$16 sps:$4 sm:$0xff]   ;;  %v11816_v55 = vld [vmem:[#allocation11 + $0xa4] ss:$16 sps:$4 sm:$0xff]  }
 0x140   :  { %v344_v60 = vpop.f32.mrf.mxu1 }
 0x141   :  { %v462_v61 = vadd.f32 %v13173_v54, %v447_v56  ;;  %v448_v62 = vadd.f32 %v440_v51, %v343_v57  ;;  %v345_v63 = vadd.f32 %v344_v60, %v258_v45  ;;  %v11819_v56 = vld [vmem:[#allocation11 + $0xac] ss:$16 sps:$4 sm:$0xff]   ;;  %v11814_v57 = vld [vmem:[#allocation11 + $0xa0] ss:$16 sps:$4 sm:$0xff]   ;;  %v11822_v60 = vld [vmem:[#allocation11 + $0x84] ss:$16 sps:$4 sm:$0xff]  }
 0x142   :  { %v346_v2 = vpop.f32.mrf.mxu1 }
 0x143   :  { %v466_v3 = vmax.f32 %v462_v61, 0.0  ;;  %v463_v4 = vadd.f32 %v13177_v58, %v448_v62  ;;  %v449_v5 = vadd.f32 %v442_v59, %v345_v63  ;;  %v347_v6 = vadd.f32 %v346_v2, %v260_v49  ;;  %v11813_v49 = vld [vmem:[#allocation11 + $0xcc] ss:$16 sps:$4 sm:$0xff]   ;;  %v11817_v59 = vld [vmem:[#allocation11 + $0xa8] ss:$16 sps:$4 sm:$0xff]  }
 0x144   :  { %v11825_v61 = vld [vmem:[#allocation11 + $0x8c] ss:$16 sps:$4 sm:$0xff]   ;;  %v11820_v62 = vld [vmem:[#allocation11 + $0x80] ss:$16 sps:$4 sm:$0xff]   ;;  %v11823_v63 = vld [vmem:[#allocation11 + $0x88] ss:$16 sps:$4 sm:$0xff]  }
 0x145   :  { %v475_v8 = vrot.slane %v466_v3, 7  ;;  %v467_v9 = vmax.f32 %v463_v4, 0.0  ;;  %v464_v10 = vadd.f32 %v13173_v54, %v449_v5  ;;  %v450_v11 = vadd.f32 %v444_v7, %v347_v6  ;;  %v146_v2 = vld [vmem:[%s13656_s0 + $0x10] sm:$0xff]  ;;  %v147_v3 = vld [vmem:[%s13656_s0 + $0x18] sm:$0xff] }
 0x146   :  { %150 = vst.msk [vmem:[#allocation2 + $0x19] sm:$0xff] %vm124_vm0, %v146_v2  ;;  %151 = vst.msk [vmem:[#allocation2 + $0x21] sm:$0xff] %vm124_vm0, %v147_v3  ;;  %v11828_v4 = vld [vmem:[#allocation11 + $0x64] ss:$16 sps:$4 sm:$0xff]   ;;  %v11831_v5 = vld [vmem:[#allocation11 + $0x6c] ss:$16 sps:$4 sm:$0xff]  }
 0x147   :  { %487 = vst [vmem:[#allocation3 + $0x30] sm:$0xfe] %v475_v8  ;;  %v476_v12 = vrot.slane %v467_v9, 7  ;;  %v468_v13 = vmax.f32 %v464_v10, 0.0  ;;  %v465_v14 = vadd.f32 %v13177_v58, %v450_v11  ;;  %v11826_v6 = vld [vmem:[#allocation11 + $0x60] ss:$16 sps:$4 sm:$0xff]  }
 0x148   :  { %v11829_v7 = vld [vmem:[#allocation11 + $0x68] ss:$16 sps:$4 sm:$0xff]   ;;  %v11837_v9 = vld [vmem:[#allocation11 + $0x4c] ss:$16 sps:$4 sm:$0xff]   ;;  %v11832_v10 = vld [vmem:[#allocation11 + $0x40] ss:$16 sps:$4 sm:$0xff]  }
 0x149   :  { %488 = vst [vmem:[#allocation3] sm:$0xfe] %v476_v12  ;;  %v477_v15 = vrot.slane %v468_v13, 7  ;;  %v469_v16 = vmax.f32 %v465_v14, 0.0  ;;  %v11835_v11 = vld [vmem:[#allocation11 + $0x48] ss:$16 sps:$4 sm:$0xff]  }
 0x14a   :  { %v11843_v13 = vld [vmem:[#allocation11 + $0x2c] ss:$16 sps:$4 sm:$0xff]   ;;  %v11838_v14 = vld [vmem:[#allocation11 + $0x20] ss:$16 sps:$4 sm:$0xff]  }
 0x14b   :  { %v13184_v17 = vsel %vm474_vm2, %v475_v8, %v477_v15  ;;  %491 = vst [vmem:[#allocation3 + $0x50] sm:$0x1] %v477_v15  ;;  %v479_v18 = vrot.slane %v469_v16, 7  ;;  %v11834_v8 = vld [vmem:[#allocation11 + $0x44] ss:$16 sps:$4 sm:$0xff]  }
 0x14c   :  { %v11841_v15 = vld [vmem:[#allocation11 + $0x28] ss:$16 sps:$4 sm:$0xff]   ;;  %v11891_v2 = vld [vmem:[#allocation11 + $0x12c] ss:$16 sps:$4 sm:$0xff]   ;;  %v11886_v3 = vld [vmem:[#allocation11 + $0x120] ss:$16 sps:$4 sm:$0xff]  }
 0x14d   :  { %v13187_v19 = vsel %vm474_vm2, %v476_v12, %v479_v18  ;;  %492 = vst [vmem:[#allocation3 + $0x20] sm:$0x1] %v479_v18  ;;  %v11840_v12 = vld [vmem:[#allocation11 + $0x24] ss:$16 sps:$4 sm:$0xff]  }
 0x14e   :  { %v563_v20 = vld [vmem:[#allocation3 + $0x30] sm:$0xfe] }
 0x14f   :  { %v567_v21 = vpack.c.bf16 %v13184_v17, %v563_v20  ;;  %v1475_v16 = vld [vmem:[#allocation3 + $0x30] sm:$0xfc]  ;;  %v11849_v20 = vld [vmem:[#allocation11 + $0xc] ss:$16 sps:$4 sm:$0xff]  }
 0x150   :  { %v564_v22 = vld [vmem:[#allocation3] sm:$0xfe] }
 0x151   :  { %v568_v23 = vpack.c.bf16 %v13187_v19, %v564_v22  ;;  %v640_v25 = vshll.u32 %v567_v21, 16  ;;  %v638_v37 = vshrl.u32 %v567_v21, 16  ;;  %v494_v41 = vld [vmem:[#allocation3] sm:$0xff] }
 0x152   :  { %v565_v24 = vld [vmem:[#allocation3 + $0x50] sm:$0x1]  ;;  %v498_v51 = vpack.c.bf16 %v13187_v19, %v494_v41  ;;  %v11846_v18 = vld [vmem:[#allocation11 + $0x4] ss:$16 sps:$4 sm:$0xff]  }
 0x153   :  { %v652_v26 = vshll.u32 %v568_v23, 16  ;;  %v569_v27 = vpack.c.bf16 %v565_v24, %v565_v24  ;;  %v642_v32 = vrot.slane %v640_v25, 1  ;;  %v650_v33 = vshrl.u32 %v568_v23, 16  ;;  %v1476_v21 = vld [vmem:[#allocation3] sm:$0xfc] }
 0x154   :  { %v566_v28 = vld [vmem:[#allocation3 + $0x20] sm:$0x1]  ;;  %v1477_v23 = vld [vmem:[#allocation3 + $0x50] sm:$0x3]  ;;  %v11844_v24 = vld [vmem:[#allocation11] ss:$16 sps:$4 sm:$0xff]  }
 0x155   :  { %v570_v29 = vpack.c.bf16 %v566_v28, %v566_v28  ;;  %v654_v30 = vrot.slane %v652_v26, 1  ;;  %v645_v31 = vshll.u32 %v569_v27, 16  ;;  %v643_v43 = vor.u32 %v642_v32, %v638_v37  ;;  %v1478_v22 = vld [vmem:[#allocation3 + $0x20] sm:$0x3]  ;;  %v11847_v25 = vld [vmem:[#allocation11 + $0x8] ss:$16 sps:$4 sm:$0xff]  }
 0x156   :  { %v1479_v26 = vpack.c.bf16 %v13184_v17, %v1475_v16  ;;  %v11852_v27 = vld [vmem:[#allocation11 + $0x1e4] ss:$16 sps:$4 sm:$0xff]   ;;  %v11855_v28 = vld [vmem:[#allocation11 + $0x1ec] ss:$16 sps:$4 sm:$0xff]   ;;  %v11850_v32 = vld [vmem:[#allocation11 + $0x1e0] ss:$16 sps:$4 sm:$0xff]  }
 0x157   :  { %v657_v34 = vshll.u32 %v570_v29, 16  ;;  %v647_v38 = vrot.slane %v645_v31, 1  ;;  %v655_v39 = vor.u32 %v654_v30, %v650_v33  ;;  %v1480_v29 = vpack.c.bf16 %v13187_v19, %v1476_v21  ;;  %v11853_v33 = vld [vmem:[#allocation11 + $0x1e8] ss:$16 sps:$4 sm:$0xff]   ;;  %v11856_v19 = vld [vmem:[#allocation11 + $0x1c0] ss:$16 sps:$4 sm:$0xff]  }
 0x158   :  { %v1482_v30 = vpack.c.bf16 %v1478_v22, %v1478_v22  ;;  %v1481_v31 = vpack.c.bf16 %v1477_v23, %v1477_v23  ;;  %v11864_v41 = vld [vmem:[#allocation11 + $0x1a4] ss:$16 sps:$4 sm:$0xff]   ;;  %v11907_v21 = vld [vmem:[#allocation11 + $0x4c8] ss:$16 sps:$4 sm:$0xff]   ;;  %v11915_v23 = vld [vmem:[#allocation11 + $0x4ac] ss:$16 sps:$4 sm:$0xff]  }
 0x159   :  { %v659_v40 = vrot.slane %v657_v34, 1  ;;  %v648_v46 = vsel %vm636_vm3, %v643_v43, %v647_v38  ;;  %v11858_v34 = vld [vmem:[#allocation11 + $0x1c4] ss:$16 sps:$4 sm:$0xff]   ;;  %v13208_v38 = vrot.slane %v1479_v26, 1  ;;  %v11867_v43 = vld [vmem:[#allocation11 + $0x1ac] ss:$16 sps:$4 sm:$0xff]  }
 0x15a   :  { %v13206_v37 = vrot.slane %v1482_v30, 1  ;;  %v11912_v22 = vld [vmem:[#allocation11 + $0x4a4] ss:$16 sps:$4 sm:$0xff]   ;;  %v11921_v26 = vld [vmem:[#allocation11 + $0x48c] ss:$16 sps:$4 sm:$0xff]  }
 0x15b   :  { %v660_v45 = vsel %vm636_vm3, %v655_v39, %v659_v40  ;;  %v13210_v39 = vrot.slane %v1481_v31, 1  ;;  %v11859_v40 = vld [vmem:[#allocation11 + $0x1c8] ss:$16 sps:$4 sm:$0xff]   ;;  %v11927_v30 = vld [vmem:[#allocation11 + $0x46c] ss:$16 sps:$4 sm:$0xff]  }
 0x15c   :  { %1015 = vmatprep.mubr.bf16.mxu1 %v660_v45  ;;  %1058 = vmatprep.mubr.bf16.mxu0 %v660_v45  ;;  %v11862_v45 = vld [vmem:[#allocation11 + $0x1a0] ss:$16 sps:$4 sm:$0xff]  }
 0x15d   :  { %1016 = vmatmul.mubr.bf16.vlgmr.msra.gmra.mxu1 %v648_v46  ;;  %1059 = vmatmul.mubr.bf16.vlgmr.msra.gmra.mxu0 %v648_v46  ;;  %v11865_v46 = vld [vmem:[#allocation11 + $0x1a8] ss:$16 sps:$4 sm:$0xff]   ;;  %v11922_v31 = vld [vmem:[#allocation11 + $0x460] ss:$16 sps:$4 sm:$0xff]  }
 0x15e   :  { %1390 = vmatpush1.bf16.msra.mxu1 %v11802_v35  ;;  %1433 = vmatpush1.bf16.msra.mxu0 %v11805_v36  ;;  %v11861_v35 = vld [vmem:[#allocation11 + $0x1cc] ss:$16 sps:$4 sm:$0xff]   ;;  %v13204_v36 = vrot.slane %v1480_v29, 1  ;;  %v11924_v29 = vld [vmem:[#allocation11 + $0x464] ss:$16 sps:$4 sm:$0xff]  }
 0x15f   :  { %1421 = vmatprep.mubr.bf16.mxu1 %v498_v51  ;;  %1464 = vmatprep.mubr.bf16.mxu0 %v498_v51  ;;  %v11868_v51 = vld [vmem:[#allocation11 + $0x180] ss:$16 sps:$4 sm:$0xff]  }
 0x160   :  { %1391 = vmatprep.subr.bf16.mxu1 %v11810_v47  ;;  %1434 = vmatprep.subr.bf16.mxu0 %v11813_v49  ;;  %v11870_v47 = vld [vmem:[#allocation11 + $0x184] ss:$16 sps:$4 sm:$0xff]   ;;  %v11873_v49 = vld [vmem:[#allocation11 + $0x18c] ss:$16 sps:$4 sm:$0xff]  }
 0x162   :  { %1392 = vmatpush1.bf16.msra.mxu1 %v11808_v52  ;;  %1435 = vmatpush1.bf16.msra.mxu0 %v11811_v53  ;;  %v11871_v52 = vld [vmem:[#allocation11 + $0x188] ss:$16 sps:$4 sm:$0xff]   ;;  %v11876_v53 = vld [vmem:[#allocation11 + $0x164] ss:$16 sps:$4 sm:$0xff]  }
 0x163   :  { %1393 = vmatprep.subr.bf16.mxu1 %v11816_v55  ;;  %1436 = vmatprep.subr.bf16.mxu0 %v11819_v56  ;;  %v11879_v55 = vld [vmem:[#allocation11 + $0x16c] ss:$16 sps:$4 sm:$0xff]   ;;  %v11874_v56 = vld [vmem:[#allocation11 + $0x160] ss:$16 sps:$4 sm:$0xff]  }
 0x166   :  { %1394 = vmatpush1.bf16.msra.mxu1 %v11814_v57  ;;  %1437 = vmatpush1.bf16.msra.mxu0 %v11817_v59  ;;  %v11877_v57 = vld [vmem:[#allocation11 + $0x168] ss:$16 sps:$4 sm:$0xff]   ;;  %v11882_v59 = vld [vmem:[#allocation11 + $0x144] ss:$16 sps:$4 sm:$0xff]  }
 0x167   :  { %1395 = vmatprep.subr.bf16.mxu1 %v11822_v60  ;;  %1438 = vmatprep.subr.bf16.mxu0 %v11825_v61  ;;  %v11885_v60 = vld [vmem:[#allocation11 + $0x14c] ss:$16 sps:$4 sm:$0xff]   ;;  %v11880_v61 = vld [vmem:[#allocation11 + $0x140] ss:$16 sps:$4 sm:$0xff]  }
 0x16a   :  { %1396 = vmatpush1.bf16.msra.mxu1 %v11820_v62  ;;  %1439 = vmatpush1.bf16.msra.mxu0 %v11823_v63  ;;  %v11883_v62 = vld [vmem:[#allocation11 + $0x148] ss:$16 sps:$4 sm:$0xff]   ;;  %v11888_v63 = vld [vmem:[#allocation11 + $0x124] ss:$16 sps:$4 sm:$0xff]  }
 0x16b   :  { %1397 = vmatprep.subr.bf16.mxu1 %v11828_v4  ;;  %1440 = vmatprep.subr.bf16.mxu0 %v11831_v5  ;;  %v11889_v4 = vld [vmem:[#allocation11 + $0x128] ss:$16 sps:$4 sm:$0xff]   ;;  %v11894_v5 = vld [vmem:[#allocation11 + $0x104] ss:$16 sps:$4 sm:$0xff]  }
 0x16e   :  { %1398 = vmatpush1.bf16.msra.mxu1 %v11826_v6  ;;  %1441 = vmatpush1.bf16.msra.mxu0 %v11829_v7  ;;  %v11897_v6 = vld [vmem:[#allocation11 + $0x10c] ss:$16 sps:$4 sm:$0xff]   ;;  %v11892_v7 = vld [vmem:[#allocation11 + $0x100] ss:$16 sps:$4 sm:$0xff]  }
 0x16f   :  { %1399 = vmatprep.subr.bf16.mxu1 %v11834_v8  ;;  %1442 = vmatprep.subr.bf16.mxu0 %v11837_v9  ;;  %v11895_v8 = vld [vmem:[#allocation11 + $0x108] ss:$16 sps:$4 sm:$0xff]   ;;  %v11900_v9 = vld [vmem:[#allocation11 + $0x4e4] ss:$16 sps:$4 sm:$0xff]  }
 0x172   :  { %1400 = vmatpush1.bf16.msra.mxu1 %v11832_v10  ;;  %1443 = vmatpush1.bf16.msra.mxu0 %v11835_v11  ;;  %v11903_v10 = vld [vmem:[#allocation11 + $0x4ec] ss:$16 sps:$4 sm:$0xff]  }
 0x173   :  { %1401 = vmatprep.subr.bf16.mxu1 %v11840_v12  ;;  %1444 = vmatprep.subr.bf16.mxu0 %v11843_v13  ;;  %v493_v11 = vld [vmem:[#allocation3 + $0x30] sm:$0xff]  ;;  %v11901_v13 = vld [vmem:[#allocation11 + $0x4e8] ss:$16 sps:$4 sm:$0xff]  }
 0x174   :  { %v11898_v12 = vld [vmem:[#allocation11 + $0x4e0] ss:$16 sps:$4 sm:$0xff]   ;;  %v497_v16 = vpack.c.bf16 %v13184_v17, %v493_v11  ;;  %v11913_v17 = vld [vmem:[#allocation11 + $0x4a8] ss:$16 sps:$4 sm:$0xff]   ;;  %v11981_v11 = vld [vmem:[#allocation11 + $0x54c] ss:$16 sps:$4 sm:$0xff]  }
 0x176   :  { %1402 = vmatpush1.bf16.msra.mxu1 %v11838_v14  ;;  %1445 = vmatpush1.bf16.msra.mxu0 %v11841_v15  ;;  %v11906_v14 = vld [vmem:[#allocation11 + $0x4c4] ss:$16 sps:$4 sm:$0xff]   ;;  %v11909_v15 = vld [vmem:[#allocation11 + $0x4cc] ss:$16 sps:$4 sm:$0xff]  }
 0x177   :  { %1403 = vmatprep.subr.bf16.mxu1 %v11846_v18  ;;  %1446 = vmatprep.subr.bf16.mxu0 %v11849_v20  ;;  %v11904_v18 = vld [vmem:[#allocation11 + $0x4c0] ss:$16 sps:$4 sm:$0xff]   ;;  %v1558_v20 = vsel %vm1552_vm4, %v13204_v36, %v13206_v37  ;;  %v11931_v36 = vld [vmem:[#allocation11 + $0x448] ss:$16 sps:$4 sm:$0xff]   ;;  %v11936_v37 = vld [vmem:[#allocation11 + $0x424] ss:$16 sps:$4 sm:$0xff]  }
 0x17a   :  { %1404 = vmatpush1.bf16.msra.mxu1 %v11844_v24  ;;  %1447 = vmatpush1.bf16.msra.mxu0 %v11847_v25  ;;  %v11910_v24 = vld [vmem:[#allocation11 + $0x4a0] ss:$16 sps:$4 sm:$0xff]   ;;  %v11918_v25 = vld [vmem:[#allocation11 + $0x484] ss:$16 sps:$4 sm:$0xff]  }
 0x17b   :  { %1405 = vmatprep.subr.bf16.mxu1 %v11852_v27  ;;  %1448 = vmatprep.subr.bf16.mxu0 %v11855_v28  ;;  %v11916_v27 = vld [vmem:[#allocation11 + $0x480] ss:$16 sps:$4 sm:$0xff]   ;;  %v11919_v28 = vld [vmem:[#allocation11 + $0x488] ss:$16 sps:$4 sm:$0xff]  }
 0x17e   :  { %1406 = vmatpush2.bf16.msra.mxu1 %v11850_v32  ;;  %1449 = vmatpush2.bf16.msra.mxu0 %v11853_v33  ;;  %v11925_v32 = vld [vmem:[#allocation11 + $0x468] ss:$16 sps:$4 sm:$0xff]   ;;  %v11930_v33 = vld [vmem:[#allocation11 + $0x444] ss:$16 sps:$4 sm:$0xff]  }
 0x17f   :  { %1407 = vmatprep.subr.bf16.mxu1 %v11858_v34  ;;  %1450 = vmatprep.subr.bf16.mxu0 %v11861_v35  ;;  %v11933_v34 = vld [vmem:[#allocation11 + $0x44c] ss:$16 sps:$4 sm:$0xff]   ;;  %v11928_v35 = vld [vmem:[#allocation11 + $0x440] ss:$16 sps:$4 sm:$0xff]  }
 0x182   :  { %1408 = vmatpush2.bf16.msra.mxu1 %v11856_v19  ;;  %1451 = vmatpush2.bf16.msra.mxu0 %v11859_v40  ;;  %v11939_v19 = vld [vmem:[#allocation11 + $0x42c] ss:$16 sps:$4 sm:$0xff]   ;;  %v11934_v40 = vld [vmem:[#allocation11 + $0x420] ss:$16 sps:$4 sm:$0xff]  }
 0x183   :  { %1409 = vmatprep.subr.bf16.mxu1 %v11864_v41  ;;  %1452 = vmatprep.subr.bf16.mxu0 %v11867_v43  ;;  %v11937_v41 = vld [vmem:[#allocation11 + $0x428] ss:$16 sps:$4 sm:$0xff]   ;;  %v11942_v43 = vld [vmem:[#allocation11 + $0x404] ss:$16 sps:$4 sm:$0xff]  }
 0x186   :  { %1410 = vmatpush2.bf16.msra.mxu1 %v11862_v45  ;;  %1453 = vmatpush2.bf16.msra.mxu0 %v11865_v46  ;;  %v11945_v45 = vld [vmem:[#allocation11 + $0x40c] ss:$16 sps:$4 sm:$0xff]   ;;  %v11940_v46 = vld [vmem:[#allocation11 + $0x400] ss:$16 sps:$4 sm:$0xff]  }
 0x187   :  { %1411 = vmatprep.subr.bf16.mxu1 %v11870_v47  ;;  %1454 = vmatprep.subr.bf16.mxu0 %v11873_v49  ;;  %v11943_v47 = vld [vmem:[#allocation11 + $0x408] ss:$16 sps:$4 sm:$0xff]   ;;  %v11948_v49 = vld [vmem:[#allocation11 + $0x5e4] ss:$16 sps:$4 sm:$0xff]  }
 0x18a   :  { %1412 = vmatpush2.bf16.msra.mxu1 %v11868_v51  ;;  %1455 = vmatpush2.bf16.msra.mxu0 %v11871_v52  ;;  %v11951_v51 = vld [vmem:[#allocation11 + $0x5ec] ss:$16 sps:$4 sm:$0xff]   ;;  %v11946_v52 = vld [vmem:[#allocation11 + $0x5e0] ss:$16 sps:$4 sm:$0xff]  }
 0x18b   :  { %1413 = vmatprep.subr.bf16.mxu1 %v11876_v53  ;;  %1456 = vmatprep.subr.bf16.mxu0 %v11879_v55  ;;  %v11949_v53 = vld [vmem:[#allocation11 + $0x5e8] ss:$16 sps:$4 sm:$0xff]   ;;  %v11954_v55 = vld [vmem:[#allocation11 + $0x5c4] ss:$16 sps:$4 sm:$0xff]  }
 0x18e   :  { %1414 = vmatpush2.bf16.msra.mxu1 %v11874_v56  ;;  %1457 = vmatpush2.bf16.msra.mxu0 %v11877_v57  ;;  %v11957_v56 = vld [vmem:[#allocation11 + $0x5cc] ss:$16 sps:$4 sm:$0xff]   ;;  %v11952_v57 = vld [vmem:[#allocation11 + $0x5c0] ss:$16 sps:$4 sm:$0xff]  }
 0x18f   :  { %1415 = vmatprep.subr.bf16.mxu1 %v11882_v59  ;;  %1458 = vmatprep.subr.bf16.mxu0 %v11885_v60  ;;  %v11955_v59 = vld [vmem:[#allocation11 + $0x5c8] ss:$16 sps:$4 sm:$0xff]   ;;  %v11960_v60 = vld [vmem:[#allocation11 + $0x5a4] ss:$16 sps:$4 sm:$0xff]  }
 0x192   :  { %1416 = vmatpush2.bf16.msra.mxu1 %v11880_v61  ;;  %1459 = vmatpush2.bf16.msra.mxu0 %v11883_v62  ;;  %v11963_v61 = vld [vmem:[#allocation11 + $0x5ac] ss:$16 sps:$4 sm:$0xff]   ;;  %v11958_v62 = vld [vmem:[#allocation11 + $0x5a0] ss:$16 sps:$4 sm:$0xff]  }
 0x193   :  { %1417 = vmatprep.subr.bf16.mxu1 %v11888_v63  ;;  %1460 = vmatprep.subr.bf16.mxu0 %v11891_v2  ;;  %v11961_v63 = vld [vmem:[#allocation11 + $0x5a8] ss:$16 sps:$4 sm:$0xff]   ;;  %v11966_v2 = vld [vmem:[#allocation11 + $0x584] ss:$16 sps:$4 sm:$0xff]  }
 0x196   :  { %1418 = vmatpush2.bf16.msra.mxu1 %v11886_v3  ;;  %1461 = vmatpush2.bf16.msra.mxu0 %v11889_v4  ;;  %v11969_v3 = vld [vmem:[#allocation11 + $0x58c] ss:$16 sps:$4 sm:$0xff]   ;;  %v11964_v4 = vld [vmem:[#allocation11 + $0x580] ss:$16 sps:$4 sm:$0xff]  }
 0x197   :  { %1419 = vmatprep.subr.bf16.mxu1 %v11894_v5  ;;  %1462 = vmatprep.subr.bf16.mxu0 %v11897_v6  ;;  %v11967_v5 = vld [vmem:[#allocation11 + $0x588] ss:$16 sps:$4 sm:$0xff]   ;;  %v11972_v6 = vld [vmem:[#allocation11 + $0x564] ss:$16 sps:$4 sm:$0xff]  }
 0x19a   :  { %1420 = vmatpush2.bf16.msra.mxu1 %v11892_v7  ;;  %1463 = vmatpush2.bf16.msra.mxu0 %v11895_v8  ;;  %v11975_v7 = vld [vmem:[#allocation11 + $0x56c] ss:$16 sps:$4 sm:$0xff]   ;;  %v11970_v8 = vld [vmem:[#allocation11 + $0x560] ss:$16 sps:$4 sm:$0xff]  }
 0x19b   :  { %1881 = vmatprep.subr.bf16.mxu1 %v11900_v9  ;;  %1924 = vmatprep.subr.bf16.mxu0 %v11903_v10  ;;  %v11973_v9 = vld [vmem:[#allocation11 + $0x568] ss:$16 sps:$4 sm:$0xff]   ;;  %v11978_v10 = vld [vmem:[#allocation11 + $0x544] ss:$16 sps:$4 sm:$0xff]  }
 0x19d   :  { %1422 = vmatmul.mubr.bf16.vlgmr.msra.gmra.mxu1 %v497_v16  ;;  %1465 = vmatmul.mubr.bf16.vlgmr.msra.gmra.mxu0 %v497_v16  ;;  %v11982_v16 = vld [vmem:[#allocation11 + $0x520] ss:$16 sps:$4 sm:$0xff]  }
 0x19e   :  { %1882 = vmatpush1.bf16.msra.mxu1 %v11898_v12  ;;  %1913 = vmatprep.mubr.bf16.mxu1 %v1558_v20  ;;  %v11976_v12 = vld [vmem:[#allocation11 + $0x540] ss:$16 sps:$4 sm:$0xff]  }
 0x19f   :  { %1925 = vmatpush1.bf16.msra.mxu0 %v11901_v13  ;;  %1956 = vmatprep.mubr.bf16.mxu0 %v1558_v20  ;;  %v11979_v13 = vld [vmem:[#allocation11 + $0x548] ss:$16 sps:$4 sm:$0xff]   ;;  %v11990_v20 = vld [vmem:[#allocation11 + $0x504] ss:$16 sps:$4 sm:$0xff]  }
 0x1a0   :  { %1883 = vmatprep.subr.bf16.mxu1 %v11906_v14  ;;  %1926 = vmatprep.subr.bf16.mxu0 %v11909_v15  ;;  %v11984_v14 = vld [vmem:[#allocation11 + $0x524] ss:$16 sps:$4 sm:$0xff]   ;;  %v11987_v15 = vld [vmem:[#allocation11 + $0x52c] ss:$16 sps:$4 sm:$0xff]  }
 0x1a2   :  { %1884 = vmatpush1.bf16.msra.mxu1 %v11904_v18  ;;  %v11985_v18 = vld [vmem:[#allocation11 + $0x528] ss:$16 sps:$4 sm:$0xff]  }
 0x1a3   :  { %1927 = vmatpush1.bf16.msra.mxu0 %v11907_v21  ;;  %1885 = vmatprep.subr.bf16.mxu1 %v11912_v22  ;;  %v11993_v21 = vld [vmem:[#allocation11 + $0x50c] ss:$16 sps:$4 sm:$0xff]   ;;  %v11988_v22 = vld [vmem:[#allocation11 + $0x500] ss:$16 sps:$4 sm:$0xff]  }
 0x1a4   :  { %1928 = vmatprep.subr.bf16.mxu0 %v11915_v23  ;;  %v11991_v23 = vld [vmem:[#allocation11 + $0x508] ss:$16 sps:$4 sm:$0xff]  }
 0x1a6   :  { %1886 = vmatpush1.bf16.msra.mxu1 %v11910_v24  ;;  %v11996_v24 = vld [vmem:[#allocation6 + $0x74] ss:$8 sps:$4 sm:$0xff]  }
 0x1a7   :  { %1929 = vmatpush1.bf16.msra.mxu0 %v11913_v17  ;;  %1887 = vmatprep.subr.bf16.mxu1 %v11918_v25  ;;  %v11999_v17 = vld [vmem:[#allocation6 + $0x34] ss:$8 sps:$4 sm:$0xff]   ;;  %v11994_v25 = vld [vmem:[#allocation6 + $0x70] ss:$8 sps:$4 sm:$0xff]  }
 0x1a8   :  { %1930 = vmatprep.subr.bf16.mxu0 %v11921_v26  ;;  %v11997_v26 = vld [vmem:[#allocation6 + $0x30] ss:$8 sps:$4 sm:$0xff]  }
 0x1aa   :  { %1888 = vmatpush1.bf16.msra.mxu1 %v11916_v27  ;;  %v12002_v27 = vld [vmem:[#allocation6 + $0x64] ss:$8 sps:$4 sm:$0xff]  }
 0x1ab   :  { %1931 = vmatpush1.bf16.msra.mxu0 %v11919_v28  ;;  %1889 = vmatprep.subr.bf16.mxu1 %v11924_v29  ;;  %v12005_v28 = vld [vmem:[#allocation6 + $0x24] ss:$8 sps:$4 sm:$0xff]   ;;  %v1555_v29 = vsel %vm1552_vm4, %v13208_v38, %v13210_v39  ;;  %v12012_v39 = vld [vmem:[#allocation6 + $0x40] ss:$8 sps:$4 sm:$0xff]  }
 0x1ac   :  { %1932 = vmatprep.subr.bf16.mxu0 %v11927_v30  ;;  %v12000_v30 = vld [vmem:[#allocation6 + $0x60] ss:$8 sps:$4 sm:$0xff]   ;;  %v12017_v38 = vld [vmem:[#allocation6 + $0x4] ss:$8 sps:$4 sm:$0xff]  }
 0x1ae   :  { %1890 = vmatpush1.bf16.msra.mxu1 %v11922_v31  ;;  %v12003_v31 = vld [vmem:[#allocation6 + $0x20] ss:$8 sps:$4 sm:$0xff]  }
 0x1af   :  { %1933 = vmatpush1.bf16.msra.mxu0 %v11925_v32  ;;  %1891 = vmatprep.subr.bf16.mxu1 %v11930_v33  ;;  %v12008_v32 = vld [vmem:[#allocation6 + $0x54] ss:$8 sps:$4 sm:$0xff]  }
 0x1b0   :  { %1934 = vmatprep.subr.bf16.mxu0 %v11933_v34  ;;  %v12011_v33 = vld [vmem:[#allocation6 + $0x14] ss:$8 sps:$4 sm:$0xff]   ;;  %v12006_v34 = vld [vmem:[#allocation6 + $0x50] ss:$8 sps:$4 sm:$0xff]  }
 0x1b2   :  { %1892 = vmatpush1.bf16.msra.mxu1 %v11928_v35  ;;  %v12009_v35 = vld [vmem:[#allocation6 + $0x10] ss:$8 sps:$4 sm:$0xff]  }
 0x1b3   :  { %1935 = vmatpush1.bf16.msra.mxu0 %v11931_v36  ;;  %1893 = vmatprep.subr.bf16.mxu1 %v11936_v37  ;;  %v12014_v36 = vld [vmem:[#allocation6 + $0x44] ss:$8 sps:$4 sm:$0xff]  }
 0x1b4   :  { %1936 = vmatprep.subr.bf16.mxu0 %v11939_v19  ;;  %v2032_v37 = vld [vmem:[#allocation2 + $0x19] sm:$0xff]  ;;  %v2033_v19 = vld [vmem:[#allocation2 + $0x21] sm:$0xff] }
 0x1b6   :  { %1894 = vmatpush1.bf16.msra.mxu1 %v11934_v40  ;;  %v12015_v40 = vld [vmem:[#allocation6] ss:$8 sps:$4 sm:$0xff]  }
 0x1b7   :  { %1937 = vmatpush1.bf16.msra.mxu0 %v11937_v41  ;;  %1895 = vmatprep.subr.bf16.mxu1 %v11942_v43  ;;  %v2021_v41 = vld [vmem:[#allocation2 + $0x18] sm:$0xff]  ;;  %v2022_v43 = vld [vmem:[#allocation2 + $0x20] sm:$0xff] }
 0x1b8   :  { %1938 = vmatprep.subr.bf16.mxu0 %v11945_v45  ;;  %v12020_v45 = vld [vmem:[#allocation6 + $0xb4] ss:$8 sps:$4 sm:$0xff]  }
 0x1ba   :  { %1896 = vmatpush1.bf16.msra.mxu1 %v11940_v46  ;;  %v12018_v46 = vld [vmem:[#allocation6 + $0xb0] ss:$8 sps:$4 sm:$0xff]  }
 0x1bb   :  { %1939 = vmatpush1.bf16.msra.mxu0 %v11943_v47  ;;  %1897 = vmatprep.subr.bf16.mxu1 %v11948_v49  ;;  %v2034_v47 = vpack.c.bf16 %v2033_v19, %v2032_v37  ;;  %v12023_v49 = vld [vmem:[#allocation6 + $0xa4] ss:$8 sps:$4 sm:$0xff]  }
 0x1bc   :  { %1940 = vmatprep.subr.bf16.mxu0 %v11951_v51  ;;  %v2023_v51 = vpack.c.bf16 %v2022_v43, %v2021_v41  ;;  %v12087_v37 = vld [vmem:[#allocation11 + $0x3c8] ss:$16 sps:$4 sm:$0xff]   ;;  %v12092_v19 = vld [vmem:[#allocation11 + $0x3a4] ss:$16 sps:$4 sm:$0xff]   ;;  %v12090_v41 = vld [vmem:[#allocation11 + $0x3a0] ss:$16 sps:$4 sm:$0xff]  }
 0x1bd   :  { %v12093_v43 = vld [vmem:[#allocation11 + $0x3a8] ss:$16 sps:$4 sm:$0xff]  }
 0x1be   :  { %1898 = vmatpush2.bf16.msra.mxu1 %v11946_v52  ;;  %v12021_v52 = vld [vmem:[#allocation6 + $0xa0] ss:$8 sps:$4 sm:$0xff]  }
 0x1bf   :  { %1941 = vmatpush2.bf16.msra.mxu0 %v11949_v53  ;;  %1899 = vmatprep.subr.bf16.mxu1 %v11954_v55  ;;  %v12026_v53 = vld [vmem:[#allocation6 + $0x94] ss:$8 sps:$4 sm:$0xff]   ;;  %v12024_v55 = vld [vmem:[#allocation6 + $0x90] ss:$8 sps:$4 sm:$0xff]  }
 0x1c0   :  { %1942 = vmatprep.subr.bf16.mxu0 %v11957_v56  ;;  %v12029_v56 = vld [vmem:[#allocation6 + $0x84] ss:$8 sps:$4 sm:$0xff]  }
 0x1c2   :  { %1900 = vmatpush2.bf16.msra.mxu1 %v11952_v57  ;;  %v12027_v57 = vld [vmem:[#allocation6 + $0x80] ss:$8 sps:$4 sm:$0xff]  }
 0x1c3   :  { %1943 = vmatpush2.bf16.msra.mxu0 %v11955_v59  ;;  %1901 = vmatprep.subr.bf16.mxu1 %v11960_v60  ;;  %v2215_v59 = vld [vmem:[#allocation2 + $0x1a] sm:$0xff]  ;;  %v2216_v60 = vld [vmem:[#allocation2 + $0x22] sm:$0xff] }
 0x1c4   :  { %1944 = vmatprep.subr.bf16.mxu0 %v11963_v61  ;;  %v2217_v61 = vpack.c.bf16 %v2216_v60, %v2215_v59  ;;  %v12108_v59 = vld [vmem:[#allocation11 + $0x340] ss:$16 sps:$4 sm:$0xff]   ;;  %v12111_v60 = vld [vmem:[#allocation11 + $0x348] ss:$16 sps:$4 sm:$0xff]  }
 0x1c6   :  { %1902 = vmatpush2.bf16.msra.mxu1 %v11958_v62  ;;  %v12032_v62 = vld [vmem:[#allocation11 + $0x2e4] ss:$16 sps:$4 sm:$0xff]  }
 0x1c7   :  { %1945 = vmatpush2.bf16.msra.mxu0 %v11961_v63  ;;  %1903 = vmatprep.subr.bf16.mxu1 %v11966_v2  ;;  %v12035_v63 = vld [vmem:[#allocation11 + $0x2ec] ss:$16 sps:$4 sm:$0xff]   ;;  %v12030_v2 = vld [vmem:[#allocation11 + $0x2e0] ss:$16 sps:$4 sm:$0xff]  }
 0x1c8   :  { %1946 = vmatprep.subr.bf16.mxu0 %v11969_v3  ;;  %v12033_v3 = vld [vmem:[#allocation11 + $0x2e8] ss:$16 sps:$4 sm:$0xff]  }
 0x1ca   :  { %1904 = vmatpush2.bf16.msra.mxu1 %v11964_v4  ;;  %v12041_v4 = vld [vmem:[#allocation11 + $0x2cc] ss:$16 sps:$4 sm:$0xff]  }
 0x1cb   :  { %1947 = vmatpush2.bf16.msra.mxu0 %v11967_v5  ;;  %1905 = vmatprep.subr.bf16.mxu1 %v11972_v6  ;;  %v12036_v5 = vld [vmem:[#allocation11 + $0x2c0] ss:$16 sps:$4 sm:$0xff]   ;;  %v12039_v6 = vld [vmem:[#allocation11 + $0x2c8] ss:$16 sps:$4 sm:$0xff]  }
 0x1cc   :  { %1948 = vmatprep.subr.bf16.mxu0 %v11975_v7  ;;  %v12044_v7 = vld [vmem:[#allocation11 + $0x2a4] ss:$16 sps:$4 sm:$0xff]  }
 0x1ce   :  { %1906 = vmatpush2.bf16.msra.mxu1 %v11970_v8  ;;  %v12047_v8 = vld [vmem:[#allocation11 + $0x2ac] ss:$16 sps:$4 sm:$0xff]  }
 0x1cf   :  { %1949 = vmatpush2.bf16.msra.mxu0 %v11973_v9  ;;  %1907 = vmatprep.subr.bf16.mxu1 %v11978_v10  ;;  %v12042_v9 = vld [vmem:[#allocation11 + $0x2a0] ss:$16 sps:$4 sm:$0xff]   ;;  %v12045_v10 = vld [vmem:[#allocation11 + $0x2a8] ss:$16 sps:$4 sm:$0xff]  }
 0x1d0   :  { %1950 = vmatprep.subr.bf16.mxu0 %v11981_v11  ;;  %v12050_v11 = vld [vmem:[#allocation11 + $0x284] ss:$16 sps:$4 sm:$0xff]  }
 0x1d2   :  { %1908 = vmatpush2.bf16.msra.mxu1 %v11976_v12  ;;  %v12053_v12 = vld [vmem:[#allocation11 + $0x28c] ss:$16 sps:$4 sm:$0xff]  }
 0x1d3   :  { %1951 = vmatpush2.bf16.msra.mxu0 %v11979_v13  ;;  %1909 = vmatprep.subr.bf16.mxu1 %v11984_v14  ;;  %v12048_v13 = vld [vmem:[#allocation11 + $0x280] ss:$16 sps:$4 sm:$0xff]   ;;  %v12051_v14 = vld [vmem:[#allocation11 + $0x288] ss:$16 sps:$4 sm:$0xff]  }
 0x1d4   :  { %1952 = vmatprep.subr.bf16.mxu0 %v11987_v15  ;;  %v12056_v15 = vld [vmem:[#allocation11 + $0x264] ss:$16 sps:$4 sm:$0xff]  }
 0x1d6   :  { %1910 = vmatpush2.bf16.msra.mxu1 %v11982_v16  ;;  %v12059_v16 = vld [vmem:[#allocation11 + $0x26c] ss:$16 sps:$4 sm:$0xff]  }
 0x1d7   :  { %1953 = vmatpush2.bf16.msra.mxu0 %v11985_v18  ;;  %1911 = vmatprep.subr.bf16.mxu1 %v11990_v20  ;;  %v12054_v18 = vld [vmem:[#allocation11 + $0x260] ss:$16 sps:$4 sm:$0xff]   ;;  %v12057_v20 = vld [vmem:[#allocation11 + $0x268] ss:$16 sps:$4 sm:$0xff]  }
 0x1d8   :  { %1954 = vmatprep.subr.bf16.mxu0 %v11993_v21  ;;  %v12062_v21 = vld [vmem:[#allocation11 + $0x244] ss:$16 sps:$4 sm:$0xff]  }
 0x1da   :  { %1912 = vmatpush2.bf16.msra.mxu1 %v11988_v22  ;;  %v12065_v22 = vld [vmem:[#allocation11 + $0x24c] ss:$16 sps:$4 sm:$0xff]  }
 0x1db   :  { %1955 = vmatpush2.bf16.msra.mxu0 %v11991_v23  ;;  %2094 = vmatprep.subr.bf16.mxu1 %v11996_v24  ;;  %v12060_v23 = vld [vmem:[#allocation11 + $0x240] ss:$16 sps:$4 sm:$0xff]   ;;  %v12063_v24 = vld [vmem:[#allocation11 + $0x248] ss:$16 sps:$4 sm:$0xff]  }
 0x1dc   :  { %2180 = vmatprep.subr.bf16.mxu0 %v11999_v17  ;;  %v12068_v17 = vld [vmem:[#allocation11 + $0x224] ss:$16 sps:$4 sm:$0xff]  }
 0x1dd   :  { %1914 = vmatmul.mubr.bf16.vlgmr.msra.gmra.mxu1 %v1555_v29 }
 0x1de   :  { %1957 = vmatmul.mubr.bf16.vlgmr.msra.gmra.mxu0 %v1555_v29  ;;  %2095 = vmatpush1.bf16.msra.mxu1 %v11994_v25  ;;  %v12071_v25 = vld [vmem:[#allocation11 + $0x22c] ss:$16 sps:$4 sm:$0xff]   ;;  %v12074_v29 = vld [vmem:[#allocation11 + $0x204] ss:$16 sps:$4 sm:$0xff]  }
 0x1df   :  { %2181 = vmatpush1.bf16.msra.mxu0 %v11997_v26  ;;  %2096 = vmatprep.subr.bf16.mxu1 %v12002_v27  ;;  %v12066_v26 = vld [vmem:[#allocation11 + $0x220] ss:$16 sps:$4 sm:$0xff]   ;;  %v12069_v27 = vld [vmem:[#allocation11 + $0x228] ss:$16 sps:$4 sm:$0xff]  }
 0x1e0   :  { %2182 = vmatprep.subr.bf16.mxu0 %v12005_v28  ;;  %2118 = vmatprep.mubr.bf16.mxu1 %v13051_v0  ;;  %v12072_v28 = vld [vmem:[#allocation11 + $0x200] ss:$16 sps:$4 sm:$0xff]  }
 0x1e1   :  { %2204 = vmatprep.mubr.bf16.mxu0 %v13051_v0 }
 0x1e2   :  { %2097 = vmatpush1.bf16.msra.mxu1 %v12000_v30  ;;  %v12075_v30 = vld [vmem:[#allocation11 + $0x208] ss:$16 sps:$4 sm:$0xff]  }
 0x1e3   :  { %2183 = vmatpush1.bf16.msra.mxu0 %v12003_v31  ;;  %2098 = vmatprep.subr.bf16.mxu1 %v12008_v32  ;;  %v12077_v31 = vld [vmem:[#allocation11 + $0x20c] ss:$16 sps:$4 sm:$0xff]   ;;  %v12080_v32 = vld [vmem:[#allocation11 + $0x3e4] ss:$16 sps:$4 sm:$0xff]  }
 0x1e4   :  { %2184 = vmatprep.subr.bf16.mxu0 %v12011_v33  ;;  %v12083_v33 = vld [vmem:[#allocation11 + $0x3ec] ss:$16 sps:$4 sm:$0xff]  }
 0x1e6   :  { %2099 = vmatpush1.bf16.msra.mxu1 %v12006_v34  ;;  %v12078_v34 = vld [vmem:[#allocation11 + $0x3e0] ss:$16 sps:$4 sm:$0xff]  }
 0x1e7   :  { %2185 = vmatpush1.bf16.msra.mxu0 %v12009_v35  ;;  %2100 = vmatprep.subr.bf16.mxu1 %v12014_v36  ;;  %v12081_v35 = vld [vmem:[#allocation11 + $0x3e8] ss:$16 sps:$4 sm:$0xff]   ;;  %v12086_v36 = vld [vmem:[#allocation11 + $0x3c4] ss:$16 sps:$4 sm:$0xff]  }
 0x1e8   :  { %2186 = vmatprep.subr.bf16.mxu0 %v12017_v38  ;;  %v12089_v38 = vld [vmem:[#allocation11 + $0x3cc] ss:$16 sps:$4 sm:$0xff]  }
 0x1ea   :  { %2101 = vmatpush1.bf16.msra.mxu1 %v12012_v39  ;;  %v12084_v39 = vld [vmem:[#allocation11 + $0x3c0] ss:$16 sps:$4 sm:$0xff]  }
 0x1eb   :  { %2187 = vmatpush1.bf16.msra.mxu0 %v12015_v40  ;;  %2277 = vmatprep.subr.bf16.mxu1 %v12020_v45  ;;  %v12095_v40 = vld [vmem:[#allocation11 + $0x3ac] ss:$16 sps:$4 sm:$0xff]   ;;  %v12098_v45 = vld [vmem:[#allocation11 + $0x384] ss:$16 sps:$4 sm:$0xff]  }
 0x1ec   :  { %2835 = vmatprep.subr.bf16.mxu0 %v12032_v62  ;;  %v12114_v62 = vld [vmem:[#allocation11 + $0x320] ss:$16 sps:$4 sm:$0xff]  }
 0x1ed   :  { %10169 = vmatmul.mubr.msk.bf16.vlgmr.msra.gmra.mxu1 %vm124_vm0, %v2034_v47  ;;  %v12096_v47 = vld [vmem:[#allocation11 + $0x380] ss:$16 sps:$4 sm:$0xff]  }
 0x1ee   :  { %10178 = vmatmul.mubr.msk.bf16.vlgmr.msra.gmra.mxu0 %vm124_vm0, %v2023_v51  ;;  %2278 = vmatpush1.bf16.msra.mxu1 %v12018_v46  ;;  %v12101_v46 = vld [vmem:[#allocation11 + $0x38c] ss:$16 sps:$4 sm:$0xff]   ;;  %v12102_v51 = vld [vmem:[#allocation11 + $0x360] ss:$16 sps:$4 sm:$0xff]  }
 0x1ef   :  { %2279 = vmatprep.subr.bf16.mxu1 %v12023_v49  ;;  %2301 = vmatprep.mubr.bf16.mxu1 %v13051_v0  ;;  %v12038_v0 = vld [vmem:[#allocation11 + $0x2c4] ss:$16 sps:$4 sm:$0xff]   ;;  %v12099_v49 = vld [vmem:[#allocation11 + $0x388] ss:$16 sps:$4 sm:$0xff]  }
 0x1f0   :  { %2836 = vmatpush1.bf16.msra.mxu0 %v12030_v2  ;;  %v12117_v2 = vld [vmem:[#allocation11 + $0x328] ss:$16 sps:$4 sm:$0xff]  }
 0x1f1   :  { %2837 = vmatprep.subr.bf16.mxu0 %v12038_v0  ;;  %v12125_v0 = vld [vmem:[#allocation11 + $0x30c] ss:$16 sps:$4 sm:$0xff]  }
 0x1f2   :  { %2280 = vmatpush1.bf16.msra.mxu1 %v12021_v52  ;;  %v12104_v52 = vld [vmem:[#allocation11 + $0x364] ss:$16 sps:$4 sm:$0xff]  }
 0x1f3   :  { %2281 = vmatprep.subr.bf16.mxu1 %v12026_v53  ;;  %v12105_v53 = vld [vmem:[#allocation11 + $0x368] ss:$16 sps:$4 sm:$0xff]  }
 0x1f4   :  { %2838 = vmatpush1.bf16.msra.mxu0 %v12036_v5  ;;  %v12123_v5 = vld [vmem:[#allocation11 + $0x308] ss:$16 sps:$4 sm:$0xff]  }
 0x1f5   :  { %2839 = vmatprep.subr.bf16.mxu0 %v12044_v7  ;;  %v12131_v7 = vld [vmem:[#allocation11 + $0xec] ss:$16 sps:$4 sm:$0xff]  }
 0x1f6   :  { %2282 = vmatpush1.bf16.msra.mxu1 %v12024_v55  ;;  %v12107_v55 = vld [vmem:[#allocation11 + $0x36c] ss:$16 sps:$4 sm:$0xff]  }
 0x1f7   :  { %2283 = vmatprep.subr.bf16.mxu1 %v12029_v56  ;;  %v12110_v56 = vld [vmem:[#allocation11 + $0x344] ss:$16 sps:$4 sm:$0xff]  }
 0x1f8   :  { %2840 = vmatpush1.bf16.msra.mxu0 %v12042_v9 }
 0x1f9   :  { %2841 = vmatprep.subr.bf16.mxu0 %v12050_v11 }
 0x1fa   :  { %2284 = vmatpush1.bf16.msra.mxu1 %v12027_v57  ;;  %v12113_v57 = vld [vmem:[#allocation11 + $0x34c] ss:$16 sps:$4 sm:$0xff]  }
 0x1fb   :  { %2878 = vmatprep.subr.bf16.mxu1 %v12035_v63  ;;  %v12119_v63 = vld [vmem:[#allocation11 + $0x32c] ss:$16 sps:$4 sm:$0xff]  }
 0x1fc   :  { %2842 = vmatpush1.bf16.msra.mxu0 %v12048_v13 }
 0x1fd   :  { %10187 = vmatmul.mubr.msk.bf16.vlgmr.msra.gmra.mxu1 %vm124_vm0, %v2217_v61  ;;  %2843 = vmatprep.subr.bf16.mxu0 %v12056_v15  ;;  %v12116_v61 = vld [vmem:[#allocation11 + $0x324] ss:$16 sps:$4 sm:$0xff]  }
 0x1fe   :  { %2879 = vmatpush1.bf16.msra.mxu1 %v12033_v3  ;;  %v12122_v3 = vld [vmem:[#allocation11 + $0x304] ss:$16 sps:$4 sm:$0xff]  }
 0x1ff   :  { %2880 = vmatprep.subr.bf16.mxu1 %v12041_v4  ;;  %v12120_v4 = vld [vmem:[#allocation11 + $0x300] ss:$16 sps:$4 sm:$0xff]  }
 0x200   :  { %2844 = vmatpush1.bf16.msra.mxu0 %v12054_v18 }
 0x201   :  { %2845 = vmatprep.subr.bf16.mxu0 %v12062_v21 }
 0x202   :  { %2881 = vmatpush1.bf16.msra.mxu1 %v12039_v6  ;;  %v12128_v6 = vld [vmem:[#allocation11 + $0xe4] ss:$16 sps:$4 sm:$0xff]  }
 0x203   :  { %2882 = vmatprep.subr.bf16.mxu1 %v12047_v8 }
 0x204   :  { %2846 = vmatpush1.bf16.msra.mxu0 %v12060_v23  ;;  %v1990_v23 = vsub.s32 3, %v13167_v44 }
 0x205   :  { %2847 = vmatprep.subr.bf16.mxu0 %v12068_v17  ;;  %v153_v17 = vld [vmem:[#allocation12] sm:$0xf] }
 0x206   :  { %2883 = vmatpush1.bf16.msra.mxu1 %v12045_v10 }
 0x207   :  { %2884 = vmatprep.subr.bf16.mxu1 %v12053_v12 }
 0x208   :  { %2848 = vmatpush1.bf16.msra.mxu0 %v12066_v26 }
 0x209   :  { %2849 = vmatprep.subr.bf16.mxu0 %v12074_v29  ;;  %v13229_v29 = vrot.slane %v153_v17, %v454_v48 }
 0x20a   :  { %2885 = vmatpush1.bf16.msra.mxu1 %v12051_v14 }
 0x20b   :  { %2886 = vmatprep.subr.bf16.mxu1 %v12059_v16 }
 0x20c   :  { %2850 = vmatpush1.bf16.msra.mxu0 %v12072_v28 }
 0x20d   :  { %2851 = vmatprep.subr.bf16.mxu0 %v12080_v32 }
 0x20e   :  { %2887 = vmatpush1.bf16.msra.mxu1 %v12057_v20 }
 0x20f   :  { %2888 = vmatprep.subr.bf16.mxu1 %v12065_v22  ;;  %v1986_v22 = vsub.s32 2, %v13167_v44 }
 0x210   :  { %2852 = vmatpush2.bf16.msra.mxu0 %v12078_v34 }
 0x211   :  { %2853 = vmatprep.subr.bf16.mxu0 %v12086_v36  ;;  %v13231_v32 = vrot.slane %v153_v17, %v1986_v22  ;;  %v13235_v36 = vrot.slane %v153_v17, %v458_v50 }
 0x212   :  { %2889 = vmatpush1.bf16.msra.mxu1 %v12063_v24 }
 0x213   :  { %2890 = vmatprep.subr.bf16.mxu1 %v12071_v25 }
 0x214   :  { %2854 = vmatpush2.bf16.msra.mxu0 %v12084_v39 }
 0x215   :  { %2855 = vmatprep.subr.bf16.mxu0 %v12092_v19  ;;  %v13237_v19 = vrot.slane %v153_v17, %v1990_v23 }
 0x216   :  { %2891 = vmatpush1.bf16.msra.mxu1 %v12069_v27 }
 0x217   :  { %2892 = vmatprep.subr.bf16.mxu1 %v12077_v31 }
 0x218   :  { %2856 = vmatpush2.bf16.msra.mxu0 %v12090_v41 }
 0x219   :  { %2857 = vmatprep.subr.bf16.mxu0 %v12098_v45 }
 0x21a   :  { %2893 = vmatpush1.bf16.msra.mxu1 %v12075_v30 }
 0x21b   :  { %2894 = vmatprep.subr.bf16.mxu1 %v12083_v33 }
 0x21c   :  { %2858 = vmatpush2.bf16.msra.mxu0 %v12096_v47 }
 0x21d   :  { %2859 = vmatprep.subr.bf16.mxu0 %v12104_v52  ;;  %v1017_v8 = vpop.f32.mrf.mxu1  ;;  %v1060_v9 = vpop.f32.mrf.mxu0 }
 0x21e   :  { %2895 = vmatpush2.bf16.msra.mxu1 %v12081_v35 }
 0x21f   :  { %2896 = vmatprep.subr.bf16.mxu1 %v12089_v38  ;;  %v1019_v10 = vpop.f32.mrf.mxu1  ;;  %v1062_v11 = vpop.f32.mrf.mxu0 }
 0x220   :  { %2860 = vmatpush2.bf16.msra.mxu0 %v12102_v51 }
 0x221   :  { %2861 = vmatprep.subr.bf16.mxu0 %v12110_v56  ;;  %v1021_v12 = vpop.f32.mrf.mxu1  ;;  %v1064_v13 = vpop.f32.mrf.mxu0 }
 0x222   :  { %2897 = vmatpush2.bf16.msra.mxu1 %v12087_v37 }
 0x223   :  { %2898 = vmatprep.subr.bf16.mxu1 %v12095_v40  ;;  %v1023_v14 = vpop.f32.mrf.mxu1  ;;  %v1066_v15 = vpop.f32.mrf.mxu0 }
 0x224   :  { %2862 = vmatpush2.bf16.msra.mxu0 %v12108_v59 }
 0x225   :  { %2863 = vmatprep.subr.bf16.mxu0 %v12116_v61 }
 0x226   :  { %2899 = vmatpush2.bf16.msra.mxu1 %v12093_v43 }
 0x227   :  { %2900 = vmatprep.subr.bf16.mxu1 %v12101_v46 }
 0x228   :  { %2864 = vmatpush2.bf16.msra.mxu0 %v12114_v62 }
 0x229   :  { %2865 = vmatprep.subr.bf16.mxu0 %v12122_v3 }
 0x22a   :  { %2901 = vmatpush2.bf16.msra.mxu1 %v12099_v49 }
 0x22b   :  { %2902 = vmatprep.subr.bf16.mxu1 %v12107_v55 }
 0x22c   :  { %2866 = vmatpush2.bf16.msra.mxu0 %v12120_v4 }
 0x22d   :  { %3241 = vmatprep.subr.bf16.mxu0 %v12128_v6 }
 0x22e   :  { %2903 = vmatpush2.bf16.msra.mxu1 %v12105_v53 }
 0x22f   :  { %2904 = vmatprep.subr.bf16.mxu1 %v12113_v57 }
 0x232   :  { %2905 = vmatpush2.bf16.msra.mxu1 %v12111_v60 }
 0x233   :  { %2906 = vmatprep.subr.bf16.mxu1 %v12119_v63 }
 0x236   :  { %2907 = vmatpush2.bf16.msra.mxu1 %v12117_v2 }
 0x237   :  { %2908 = vmatprep.subr.bf16.mxu1 %v12125_v0 }
 0x23a   :  { %2909 = vmatpush2.bf16.msra.mxu1 %v12123_v5 }
 0x23b   :  { %3284 = vmatprep.subr.bf16.mxu1 %v12131_v7 }
 0x25d   :  { %v1423_v16 = vpop.f32.mrf.mxu1  ;;  %v1466_v18 = vpop.f32.mrf.mxu0 }
 0x25e   :  { %v1424_v27 = vadd.f32 %v1423_v16, %v1017_v8  ;;  %v1467_v30 = vadd.f32 %v1466_v18, %v1060_v9 }
 0x25f   :  { %v1425_v20 = vpop.f32.mrf.mxu1  ;;  %v1468_v21 = vpop.f32.mrf.mxu0 }
 0x260   :  { %v1426_v33 = vadd.f32 %v1425_v20, %v1019_v10  ;;  %v1469_v38 = vadd.f32 %v1468_v21, %v1062_v11 }
 0x261   :  { %v1427_v24 = vpop.f32.mrf.mxu1  ;;  %v1470_v25 = vpop.f32.mrf.mxu0 }
 0x262   :  { %v1428_v40 = vadd.f32 %v1427_v24, %v1021_v12  ;;  %v1471_v45 = vadd.f32 %v1470_v25, %v1064_v13 }
 0x263   :  { %v1429_v26 = vpop.f32.mrf.mxu1  ;;  %v1472_v28 = vpop.f32.mrf.mxu0 }
 0x264   :  { %v1430_v51 = vadd.f32 %v1429_v26, %v1023_v14  ;;  %v1473_v56 = vadd.f32 %v1472_v28, %v1066_v15 }
 0x29d   :  { %v1915_v31 = vpop.f32.mrf.mxu1 }
 0x29e   :  { %v1967_v34 = vadd.f32 %v1915_v31, %v1424_v27  ;;  %v1958_v35 = vpop.f32.mrf.mxu0 }
 0x29f   :  { %v1969_v39 = vadd.f32 %v1958_v35, %v1467_v30  ;;  %v1917_v37 = vpop.f32.mrf.mxu1 }
 0x2a0   :  { %v1996_v48 = vadd.f32 %v13229_v29, %v1967_v34  ;;  %v1968_v41 = vadd.f32 %v1917_v37, %v1426_v33  ;;  %v1960_v43 = vpop.f32.mrf.mxu0 }
 0x2a1   :  { %v1998_v46 = vadd.f32 %v13231_v32, %v1969_v39  ;;  %v1970_v47 = vadd.f32 %v1960_v43, %v1469_v38  ;;  %v1919_v49 = vpop.f32.mrf.mxu1 }
 0x2a2   :  { %v2004_v52 = vmax.f32 %v1996_v48, 0.0  ;;  %v1997_v50 = vadd.f32 %v13235_v36, %v1968_v41  ;;  %v1971_v53 = vadd.f32 %v1919_v49, %v1428_v40  ;;  %v1962_v55 = vpop.f32.mrf.mxu0 }
 0x2a3   :  { %v2006_v57 = vmax.f32 %v1998_v46, 0.0  ;;  %v1999_v59 = vadd.f32 %v13237_v19, %v1970_v47  ;;  %v1973_v60 = vadd.f32 %v1962_v55, %v1471_v45  ;;  %v1921_v61 = vpop.f32.mrf.mxu1 }
 0x2a4   :  { %2012 = vst [vmem:[#allocation4] sm:$0xff] %v2004_v52  ;;  %v2005_v62 = vmax.f32 %v1997_v50, 0.0  ;;  %v2000_v63 = vadd.f32 %v13229_v29, %v1971_v53  ;;  %v1972_v2 = vadd.f32 %v1921_v61, %v1430_v51  ;;  %v1964_v3 = vpop.f32.mrf.mxu0 }
 0x2a5   :  { %2014 = vst [vmem:[#allocation4 + $0x10] sm:$0xff] %v2006_v57  ;;  %v2007_v0 = vmax.f32 %v1999_v59, 0.0  ;;  %v2002_v4 = vadd.f32 %v13231_v32, %v1973_v60  ;;  %v1974_v5 = vadd.f32 %v1964_v3, %v1473_v56 }
 0x2a6   :  { %2013 = vst [vmem:[#allocation4 + $0x8] sm:$0xff] %v2005_v62  ;;  %v2008_v6 = vmax.f32 %v2000_v63, 0.0  ;;  %v2001_v7 = vadd.f32 %v13235_v36, %v1972_v2 }
 0x2a7   :  { %2015 = vst [vmem:[#allocation4 + $0x18] sm:$0xff] %v2007_v0  ;;  %v2010_v8 = vmax.f32 %v2002_v4, 0.0  ;;  %v2003_v9 = vadd.f32 %v13237_v19, %v1974_v5 }
 0x2a8   :  { %2016 = vst [vmem:[#allocation4 + $0x20] sm:$0xff] %v2008_v6  ;;  %v2009_v10 = vmax.f32 %v2001_v7, 0.0 }
 0x2a9   :  { %2018 = vst [vmem:[#allocation4 + $0x30] sm:$0xff] %v2010_v8  ;;  %v2011_v11 = vmax.f32 %v2003_v9, 0.0 }
 0x2aa   :  { %2017 = vst [vmem:[#allocation4 + $0x28] sm:$0xff] %v2009_v10 }
 0x2ab   :  { %2019 = vst [vmem:[#allocation4 + $0x38] sm:$0xff] %v2011_v11 }
 0x2ad   :  { %v2120_v18 = vpop.f32.mrf.mxu1 }
 0x2ae   :  { %v3850_v13 = vld [vmem:[#allocation4] ss:$8 sm:$0xf]  ;;  %v3857_v14 = vld [vmem:[#allocation4 + $0x1] ss:$8 sm:$0xf]  ;;  %v2206_v26 = vpop.f32.mrf.mxu0 }
 0x2af   :  { %3855 = vst.msk [vmem:[#allocation5] ss:$2 sm:$0xf] %vm13248_vm5, %v3850_v13  ;;  %3859 = vst.msk [vmem:[#allocation5 + $0x8] ss:$2 sm:$0xf] %vm13248_vm5, %v3857_v14  ;;  %v2122_v27 = vpop.f32.mrf.mxu1  ;;  %v2207_v37 = vadd.f32 %v2206_v26, %v2120_v18 }
 0x2b0   :  { %v3861_v15 = vld [vmem:[#allocation4 + $0x2] ss:$8 sm:$0xf]  ;;  %v3865_v16 = vld [vmem:[#allocation4 + $0x3] ss:$8 sm:$0xf]  ;;  %v2208_v34 = vpop.f32.mrf.mxu0 }
 0x2b1   :  { %3863 = vst.msk [vmem:[#allocation5 + $0x10] ss:$2 sm:$0xf] %vm13248_vm5, %v3861_v15  ;;  %3867 = vst.msk [vmem:[#allocation5 + $0x18] ss:$2 sm:$0xf] %vm13248_vm5, %v3865_v16  ;;  %v2124_v35 = vpop.f32.mrf.mxu1  ;;  %v2209_v48 = vadd.f32 %v2208_v34, %v2122_v27 }
 0x2b2   :  { %v3869_v42 = vld [vmem:[#allocation4 + $0x4] ss:$8 sm:$0xf]  ;;  %v3873_v20 = vld [vmem:[#allocation4 + $0x5] ss:$8 sm:$0xf]  ;;  %v2210_v38 = vpop.f32.mrf.mxu0 }
 0x2b3   :  { %3871 = vst.msk [vmem:[#allocation5 + $0x20] ss:$2 sm:$0xf] %vm13248_vm5, %v3869_v42  ;;  %3875 = vst.msk [vmem:[#allocation5 + $0x28] ss:$2 sm:$0xf] %vm13248_vm5, %v3873_v20  ;;  %v2126_v39 = vpop.f32.mrf.mxu1  ;;  %v2211_v46 = vadd.f32 %v2210_v38, %v2124_v35 }
 0x2b4   :  { %v3877_v21 = vld [vmem:[#allocation4 + $0x6] ss:$8 sm:$0xf]  ;;  %v3881_v22 = vld [vmem:[#allocation4 + $0x7] ss:$8 sm:$0xf]  ;;  %v2212_v43 = vpop.f32.mrf.mxu0 }
 0x2b5   :  { %3879 = vst.msk [vmem:[#allocation5 + $0x30] ss:$2 sm:$0xf] %vm13248_vm5, %v3877_v21  ;;  %3883 = vst.msk [vmem:[#allocation5 + $0x38] ss:$2 sm:$0xf] %vm13248_vm5, %v3881_v22  ;;  %v2213_v52 = vadd.f32 %v2212_v43, %v2126_v39 }
 0x2b6   :  { %v3885_v23 = vld [vmem:[#allocation4 + $0x20] ss:$8 sm:$0xf]  ;;  %v3889_v24 = vld [vmem:[#allocation4 + $0x21] ss:$8 sm:$0xf] }
 0x2b7   :  { %3887 = vst.msk [vmem:[#allocation5 + $0x40] ss:$2 sm:$0xf] %vm13248_vm5, %v3885_v23  ;;  %3891 = vst.msk [vmem:[#allocation5 + $0x48] ss:$2 sm:$0xf] %vm13248_vm5, %v3889_v24 }
 0x2b8   :  { %v3893_v17 = vld [vmem:[#allocation4 + $0x22] ss:$8 sm:$0xf]  ;;  %v3897_v25 = vld [vmem:[#allocation4 + $0x23] ss:$8 sm:$0xf] }
 0x2b9   :  { %3895 = vst.msk [vmem:[#allocation5 + $0x50] ss:$2 sm:$0xf] %vm13248_vm5, %v3893_v17  ;;  %3899 = vst.msk [vmem:[#allocation5 + $0x58] ss:$2 sm:$0xf] %vm13248_vm5, %v3897_v25 }
 0x2ba   :  { %v3901_v28 = vld [vmem:[#allocation4 + $0x24] ss:$8 sm:$0xf]  ;;  %v3905_v30 = vld [vmem:[#allocation4 + $0x25] ss:$8 sm:$0xf] }
 0x2bb   :  { %3903 = vst.msk [vmem:[#allocation5 + $0x60] ss:$2 sm:$0xf] %vm13248_vm5, %v3901_v28  ;;  %3907 = vst.msk [vmem:[#allocation5 + $0x68] ss:$2 sm:$0xf] %vm13248_vm5, %v3905_v30 }
 0x2bc   :  { %v3909_v31 = vld [vmem:[#allocation4 + $0x26] ss:$8 sm:$0xf]  ;;  %v3913_v33 = vld [vmem:[#allocation4 + $0x27] ss:$8 sm:$0xf] }
 0x2bd   :  { %3911 = vst.msk [vmem:[#allocation5 + $0x70] ss:$2 sm:$0xf] %vm13248_vm5, %v3909_v31  ;;  %3915 = vst.msk [vmem:[#allocation5 + $0x78] ss:$2 sm:$0xf] %vm13248_vm5, %v3913_v33  ;;  %v2303_v40 = vpop.f32.mrf.mxu1 }
 0x2be   :  { %v2312_v41 = vadd.f32 %v2303_v40, %v2207_v37  ;;  %v12126_v22 = vld [vmem:[#allocation11 + $0xe0] ss:$16 sps:$4 sm:$0xff]   ;;  %v12129_v23 = vld [vmem:[#allocation11 + $0xe8] ss:$16 sps:$4 sm:$0xff]   ;;  %v12134_v30 = vld [vmem:[#allocation11 + $0xc4] ss:$16 sps:$4 sm:$0xff]  }
 0x2bf   :  { %v2305_v45 = vpop.f32.mrf.mxu1  ;;  %v12137_v31 = vld [vmem:[#allocation11 + $0xcc] ss:$16 sps:$4 sm:$0xff]   ;;  %v12132_v35 = vld [vmem:[#allocation11 + $0xc0] ss:$16 sps:$4 sm:$0xff]   ;;  %v12135_v38 = vld [vmem:[#allocation11 + $0xc8] ss:$16 sps:$4 sm:$0xff]  }
 0x2c0   :  { %v2316_v47 = vadd.f32 %v2312_v41, %v13173_v54  ;;  %v2313_v49 = vadd.f32 %v2305_v45, %v2209_v48  ;;  %v12140_v37 = vld [vmem:[#allocation11 + $0xa4] ss:$16 sps:$4 sm:$0xff]   ;;  %v12143_v40 = vld [vmem:[#allocation11 + $0xac] ss:$16 sps:$4 sm:$0xff]   ;;  %v12138_v48 = vld [vmem:[#allocation11 + $0xa0] ss:$16 sps:$4 sm:$0xff]  }
 0x2c1   :  { %v2307_v51 = vpop.f32.mrf.mxu1  ;;  %v12141_v41 = vld [vmem:[#allocation11 + $0xa8] ss:$16 sps:$4 sm:$0xff]   ;;  %v12146_v43 = vld [vmem:[#allocation11 + $0x84] ss:$16 sps:$4 sm:$0xff]   ;;  %v12149_v45 = vld [vmem:[#allocation11 + $0x8c] ss:$16 sps:$4 sm:$0xff]  }
 0x2c2   :  { %v2320_v50 = vmax.f32 %v2316_v47, 0.0  ;;  %v2317_v53 = vadd.f32 %v2313_v49, %v13177_v58  ;;  %v2314_v55 = vadd.f32 %v2307_v51, %v2211_v46  ;;  %v12144_v46 = vld [vmem:[#allocation11 + $0x80] ss:$16 sps:$4 sm:$0xff]   ;;  %v12147_v47 = vld [vmem:[#allocation11 + $0x88] ss:$16 sps:$4 sm:$0xff]  }
 0x2c3   :  { %v2309_v56 = vpop.f32.mrf.mxu1  ;;  %v12152_v49 = vld [vmem:[#allocation11 + $0x64] ss:$16 sps:$4 sm:$0xff]   ;;  %v12155_v51 = vld [vmem:[#allocation11 + $0x6c] ss:$16 sps:$4 sm:$0xff]  }
 0x2c4   :  { %v2328_v57 = vrot.slane %v2320_v50, 7  ;;  %v2321_v59 = vmax.f32 %v2317_v53, 0.0  ;;  %v2318_v60 = vadd.f32 %v2314_v55, %v13173_v54  ;;  %v2315_v61 = vadd.f32 %v2309_v56, %v2213_v52  ;;  %v12150_v52 = vld [vmem:[#allocation11 + $0x60] ss:$16 sps:$4 sm:$0xff]   ;;  %v12153_v50 = vld [vmem:[#allocation11 + $0x68] ss:$16 sps:$4 sm:$0xff]  }
 0x2c5   :  { %v12158_v53 = vld [vmem:[#allocation11 + $0x44] ss:$16 sps:$4 sm:$0xff]   ;;  %v12161_v55 = vld [vmem:[#allocation11 + $0x4c] ss:$16 sps:$4 sm:$0xff]   ;;  %v12156_v56 = vld [vmem:[#allocation11 + $0x40] ss:$16 sps:$4 sm:$0xff]  }
 0x2c6   :  { %2341 = vst [vmem:[#allocation3 + $0x8] sm:$0xfe] %v2328_v57  ;;  %v2329_v62 = vrot.slane %v2321_v59, 7  ;;  %v2322_v63 = vmax.f32 %v2318_v60, 0.0  ;;  %v2319_v2 = vadd.f32 %v2315_v61, %v13177_v58  ;;  %v12164_v59 = vld [vmem:[#allocation11 + $0x24] ss:$16 sps:$4 sm:$0xff]  }
 0x2c7   :  { %v12167_v60 = vld [vmem:[#allocation11 + $0x2c] ss:$16 sps:$4 sm:$0xff]   ;;  %v12162_v61 = vld [vmem:[#allocation11 + $0x20] ss:$16 sps:$4 sm:$0xff]  }
 0x2c8   :  { %2342 = vst [vmem:[#allocation3 + $0x38] sm:$0xfe] %v2329_v62  ;;  %v2330_v3 = vrot.slane %v2322_v63, 7  ;;  %v2323_v0 = vmax.f32 %v2319_v2, 0.0  ;;  %v12170_v63 = vld [vmem:[#allocation11 + $0x4] ss:$16 sps:$4 sm:$0xff]  }
 0x2c9   :  { %v12173_v2 = vld [vmem:[#allocation11 + $0xc] ss:$16 sps:$4 sm:$0xff]  }
 0x2ca   :  { %v13289_v4 = vsel %vm474_vm2, %v2328_v57, %v2330_v3  ;;  %2345 = vst [vmem:[#allocation3 + $0x10] sm:$0x1] %v2330_v3  ;;  %v2332_v5 = vrot.slane %v2323_v0, 7  ;;  %v12159_v57 = vld [vmem:[#allocation11 + $0x48] ss:$16 sps:$4 sm:$0xff]  }
 0x2cb   :  { %v12168_v3 = vld [vmem:[#allocation11] ss:$16 sps:$4 sm:$0xff]   ;;  %v12171_v0 = vld [vmem:[#allocation11 + $0x8] ss:$16 sps:$4 sm:$0xff]  }
 0x2cc   :  { %v13292_v6 = vsel %vm474_vm2, %v2329_v62, %v2332_v5  ;;  %2346 = vst [vmem:[#allocation3 + $0x40] sm:$0x1] %v2332_v5  ;;  %v12165_v62 = vld [vmem:[#allocation11 + $0x28] ss:$16 sps:$4 sm:$0xff]   ;;  %v12176_v5 = vld [vmem:[#allocation11 + $0x1e4] ss:$16 sps:$4 sm:$0xff]  }
 0x2cd   :  { %v2417_v7 = vld [vmem:[#allocation3 + $0x8] sm:$0xfe] }
 0x2ce   :  { %v2421_v54 = vpack.c.bf16 %v13289_v4, %v2417_v7  ;;  %v12179_v7 = vld [vmem:[#allocation11 + $0x1ec] ss:$16 sps:$4 sm:$0xff]  }
 0x2cf   :  { %v2418_v8 = vld [vmem:[#allocation3 + $0x38] sm:$0xfe] }
 0x2d0   :  { %v2422_v9 = vpack.c.bf16 %v13292_v6, %v2418_v8  ;;  %v2492_v58 = vshll.u32 %v2421_v54, 16  ;;  %v2490_v24 = vshrl.u32 %v2421_v54, 16  ;;  %v2348_v27 = vld [vmem:[#allocation3 + $0x38] sm:$0xff]  ;;  %v12174_v54 = vld [vmem:[#allocation11 + $0x1e0] ss:$16 sps:$4 sm:$0xff]  }
 0x2d1   :  { %v2419_v10 = vld [vmem:[#allocation3 + $0x10] sm:$0x1]  ;;  %v2352_v39 = vpack.c.bf16 %v13292_v6, %v2348_v27  ;;  %v12177_v8 = vld [vmem:[#allocation11 + $0x1e8] ss:$16 sps:$4 sm:$0xff]   ;;  %v12204_v27 = vld [vmem:[#allocation11 + $0x140] ss:$16 sps:$4 sm:$0xff]  }
 0x2d2   :  { %v2504_v11 = vshll.u32 %v2422_v9, 16  ;;  %v2423_v13 = vpack.c.bf16 %v2419_v10, %v2419_v10  ;;  %v2494_v42 = vrot.slane %v2492_v58, 1  ;;  %v2502_v20 = vshrl.u32 %v2422_v9, 16  ;;  %v12182_v9 = vld [vmem:[#allocation11 + $0x1c4] ss:$16 sps:$4 sm:$0xff]  }
 0x2d3   :  { %v2420_v14 = vld [vmem:[#allocation3 + $0x40] sm:$0x1]  ;;  %v12180_v58 = vld [vmem:[#allocation11 + $0x1c0] ss:$16 sps:$4 sm:$0xff]  }
 0x2d4   :  { %v2424_v15 = vpack.c.bf16 %v2420_v14, %v2420_v14  ;;  %v2506_v16 = vrot.slane %v2504_v11, 1  ;;  %v2497_v18 = vshll.u32 %v2423_v13, 16  ;;  %v2495_v28 = vor.u32 %v2494_v42, %v2490_v24  ;;  %v12185_v10 = vld [vmem:[#allocation11 + $0x1cc] ss:$16 sps:$4 sm:$0xff]   ;;  %v12183_v11 = vld [vmem:[#allocation11 + $0x1c8] ss:$16 sps:$4 sm:$0xff]  }
 0x2d5   :  { %v12188_v13 = vld [vmem:[#allocation11 + $0x1a4] ss:$16 sps:$4 sm:$0xff]   ;;  %v12191_v14 = vld [vmem:[#allocation11 + $0x1ac] ss:$16 sps:$4 sm:$0xff]   ;;  %v12198_v24 = vld [vmem:[#allocation11 + $0x160] ss:$16 sps:$4 sm:$0xff]  }
 0x2d6   :  { %v2509_v21 = vshll.u32 %v2424_v15, 16  ;;  %v2499_v17 = vrot.slane %v2497_v18, 1  ;;  %v2507_v25 = vor.u32 %v2506_v16, %v2502_v20  ;;  %v12186_v15 = vld [vmem:[#allocation11 + $0x1a0] ss:$16 sps:$4 sm:$0xff]   ;;  %v12189_v16 = vld [vmem:[#allocation11 + $0x1a8] ss:$16 sps:$4 sm:$0xff]  }
 0x2d7   :  { %v12194_v18 = vld [vmem:[#allocation11 + $0x184] ss:$16 sps:$4 sm:$0xff]   ;;  %v12197_v42 = vld [vmem:[#allocation11 + $0x18c] ss:$16 sps:$4 sm:$0xff]   ;;  %v12192_v20 = vld [vmem:[#allocation11 + $0x180] ss:$16 sps:$4 sm:$0xff]  }
 0x2d8   :  { %v2511_v26 = vrot.slane %v2509_v21, 1  ;;  %v2500_v34 = vsel %vm636_vm3, %v2495_v28, %v2499_v17  ;;  %v12195_v21 = vld [vmem:[#allocation11 + $0x188] ss:$16 sps:$4 sm:$0xff]  }
 0x2d9   :  { %v12201_v17 = vld [vmem:[#allocation11 + $0x168] ss:$16 sps:$4 sm:$0xff]  }
 0x2da   :  { %v2512_v33 = vsel %vm636_vm3, %v2507_v25, %v2511_v26  ;;  %v12206_v25 = vld [vmem:[#allocation11 + $0x144] ss:$16 sps:$4 sm:$0xff]   ;;  %v12209_v26 = vld [vmem:[#allocation11 + $0x14c] ss:$16 sps:$4 sm:$0xff]   ;;  %v12207_v28 = vld [vmem:[#allocation11 + $0x148] ss:$16 sps:$4 sm:$0xff]  }
 0x2db   :  { %2867 = vmatprep.mubr.bf16.mxu0 %v2512_v33  ;;  %2910 = vmatprep.mubr.bf16.mxu1 %v2512_v33  ;;  %v12210_v33 = vld [vmem:[#allocation11 + $0x120] ss:$16 sps:$4 sm:$0xff]  }
 0x2dc   :  { %2868 = vmatmul.mubr.bf16.vlgmr.msra.gmra.mxu0 %v2500_v34  ;;  %2911 = vmatmul.mubr.bf16.vlgmr.msra.gmra.mxu1 %v2500_v34  ;;  %v12213_v34 = vld [vmem:[#allocation11 + $0x128] ss:$16 sps:$4 sm:$0xff]  }
 0x2dd   :  { %3242 = vmatpush1.bf16.msra.mxu0 %v12126_v22  ;;  %3285 = vmatpush1.bf16.msra.mxu1 %v12129_v23  ;;  %v12200_v22 = vld [vmem:[#allocation11 + $0x164] ss:$16 sps:$4 sm:$0xff]   ;;  %v12203_v23 = vld [vmem:[#allocation11 + $0x16c] ss:$16 sps:$4 sm:$0xff]  }
 0x2de   :  { %3273 = vmatprep.mubr.bf16.mxu0 %v2352_v39  ;;  %3316 = vmatprep.mubr.bf16.mxu1 %v2352_v39  ;;  %v12221_v39 = vld [vmem:[#allocation11 + $0x10c] ss:$16 sps:$4 sm:$0xff]  }
 0x2df   :  { %3243 = vmatprep.subr.bf16.mxu0 %v12134_v30  ;;  %3286 = vmatprep.subr.bf16.mxu1 %v12137_v31  ;;  %v12212_v30 = vld [vmem:[#allocation11 + $0x124] ss:$16 sps:$4 sm:$0xff]   ;;  %v12215_v31 = vld [vmem:[#allocation11 + $0x12c] ss:$16 sps:$4 sm:$0xff]  }
 0x2e1   :  { %3244 = vmatpush1.bf16.msra.mxu0 %v12132_v35  ;;  %3287 = vmatpush1.bf16.msra.mxu1 %v12135_v38  ;;  %v3330_v35 = vld [vmem:[#allocation3 + $0x40] sm:$0x3]  ;;  %v12218_v38 = vld [vmem:[#allocation11 + $0x104] ss:$16 sps:$4 sm:$0xff]  }
 0x2e2   :  { %3245 = vmatprep.subr.bf16.mxu0 %v12140_v37  ;;  %3288 = vmatprep.subr.bf16.mxu1 %v12143_v40  ;;  %v3328_v37 = vld [vmem:[#allocation3 + $0x38] sm:$0xfc]  ;;  %v3334_v40 = vpack.c.bf16 %v3330_v35, %v3330_v35 }
 0x2e3   :  { %v12285_v35 = vld [vmem:[#allocation11 + $0x5a8] ss:$16 sps:$4 sm:$0xff]  }
 0x2e5   :  { %3246 = vmatpush1.bf16.msra.mxu0 %v12138_v48  ;;  %3289 = vmatpush1.bf16.msra.mxu1 %v12141_v41  ;;  %v12216_v48 = vld [vmem:[#allocation11 + $0x100] ss:$16 sps:$4 sm:$0xff]   ;;  %v12219_v41 = vld [vmem:[#allocation11 + $0x108] ss:$16 sps:$4 sm:$0xff]  }
 0x2e6   :  { %3247 = vmatprep.subr.bf16.mxu0 %v12146_v43  ;;  %3290 = vmatprep.subr.bf16.mxu1 %v12149_v45  ;;  %v12224_v43 = vld [vmem:[#allocation11 + $0x4e4] ss:$16 sps:$4 sm:$0xff]   ;;  %v12227_v45 = vld [vmem:[#allocation11 + $0x4ec] ss:$16 sps:$4 sm:$0xff]  }
 0x2e9   :  { %3248 = vmatpush1.bf16.msra.mxu0 %v12144_v46  ;;  %3291 = vmatpush1.bf16.msra.mxu1 %v12147_v47  ;;  %v3332_v46 = vpack.c.bf16 %v13292_v6, %v3328_v37  ;;  %v2347_v47 = vld [vmem:[#allocation3 + $0x8] sm:$0xff]  ;;  %v12228_v6 = vld [vmem:[#allocation11 + $0x4c0] ss:$16 sps:$4 sm:$0xff]  }
 0x2ea   :  { %3249 = vmatprep.subr.bf16.mxu0 %v12152_v49  ;;  %3292 = vmatprep.subr.bf16.mxu1 %v12155_v51  ;;  %v3407_v49 = vrot.slane %v3334_v40, 1  ;;  %v12222_v51 = vld [vmem:[#allocation11 + $0x4e0] ss:$16 sps:$4 sm:$0xff]   ;;  %v12291_v40 = vld [vmem:[#allocation11 + $0x588] ss:$16 sps:$4 sm:$0xff]  }
 0x2eb   :  { %v12288_v37 = vld [vmem:[#allocation11 + $0x580] ss:$16 sps:$4 sm:$0xff]  }
 0x2ed   :  { %3250 = vmatpush1.bf16.msra.mxu0 %v12150_v52  ;;  %3293 = vmatpush1.bf16.msra.mxu1 %v12153_v50  ;;  %v2351_v52 = vpack.c.bf16 %v13289_v4, %v2347_v47  ;;  %v12225_v50 = vld [vmem:[#allocation11 + $0x4e8] ss:$16 sps:$4 sm:$0xff]   ;;  %v12305_v47 = vld [vmem:[#allocation11 + $0x54c] ss:$16 sps:$4 sm:$0xff]  }
 0x2ee   :  { %3251 = vmatprep.subr.bf16.mxu0 %v12158_v53  ;;  %3294 = vmatprep.subr.bf16.mxu1 %v12161_v55  ;;  %v3406_v53 = vrot.slane %v3332_v46, 1  ;;  %v12230_v55 = vld [vmem:[#allocation11 + $0x4c4] ss:$16 sps:$4 sm:$0xff]  }
 0x2ef   :  { %v12302_v46 = vld [vmem:[#allocation11 + $0x544] ss:$16 sps:$4 sm:$0xff]  }
 0x2f1   :  { %3252 = vmatpush1.bf16.msra.mxu0 %v12156_v56  ;;  %3295 = vmatpush1.bf16.msra.mxu1 %v12159_v57  ;;  %v12233_v56 = vld [vmem:[#allocation11 + $0x4cc] ss:$16 sps:$4 sm:$0xff]   ;;  %v3408_v57 = vsel %vm1552_vm4, %v3406_v53, %v3407_v49  ;;  %v12300_v49 = vld [vmem:[#allocation11 + $0x540] ss:$16 sps:$4 sm:$0xff]  }
 0x2f2   :  { %3253 = vmatprep.subr.bf16.mxu0 %v12164_v59  ;;  %3296 = vmatprep.subr.bf16.mxu1 %v12167_v60  ;;  %v12231_v59 = vld [vmem:[#allocation11 + $0x4c8] ss:$16 sps:$4 sm:$0xff]   ;;  %v12236_v60 = vld [vmem:[#allocation11 + $0x4a4] ss:$16 sps:$4 sm:$0xff]   ;;  %v3329_v53 = vld [vmem:[#allocation3 + $0x10] sm:$0x3] }
 0x2f5   :  { %3254 = vmatpush1.bf16.msra.mxu0 %v12162_v61  ;;  %3297 = vmatpush1.bf16.msra.mxu1 %v12165_v62  ;;  %v12239_v61 = vld [vmem:[#allocation11 + $0x4ac] ss:$16 sps:$4 sm:$0xff]   ;;  %v12234_v62 = vld [vmem:[#allocation11 + $0x4a0] ss:$16 sps:$4 sm:$0xff]  }
 0x2f6   :  { %3255 = vmatprep.subr.bf16.mxu0 %v12170_v63  ;;  %3298 = vmatprep.subr.bf16.mxu1 %v12173_v2  ;;  %v12237_v63 = vld [vmem:[#allocation11 + $0x4a8] ss:$16 sps:$4 sm:$0xff]   ;;  %v12242_v2 = vld [vmem:[#allocation11 + $0x484] ss:$16 sps:$4 sm:$0xff]  }
 0x2f9   :  { %3256 = vmatpush1.bf16.msra.mxu0 %v12168_v3  ;;  %3299 = vmatpush1.bf16.msra.mxu1 %v12171_v0  ;;  %v12245_v3 = vld [vmem:[#allocation11 + $0x48c] ss:$16 sps:$4 sm:$0xff]   ;;  %v12240_v0 = vld [vmem:[#allocation11 + $0x480] ss:$16 sps:$4 sm:$0xff]  }
 0x2fa   :  { %3257 = vmatprep.subr.bf16.mxu0 %v12176_v5  ;;  %3300 = vmatprep.subr.bf16.mxu1 %v12179_v7  ;;  %v12243_v5 = vld [vmem:[#allocation11 + $0x488] ss:$16 sps:$4 sm:$0xff]   ;;  %v12248_v7 = vld [vmem:[#allocation11 + $0x464] ss:$16 sps:$4 sm:$0xff]  }
 0x2fd   :  { %3258 = vmatpush2.bf16.msra.mxu0 %v12174_v54  ;;  %3301 = vmatpush2.bf16.msra.mxu1 %v12177_v8  ;;  %v12251_v54 = vld [vmem:[#allocation11 + $0x46c] ss:$16 sps:$4 sm:$0xff]   ;;  %v12246_v8 = vld [vmem:[#allocation11 + $0x460] ss:$16 sps:$4 sm:$0xff]  }
 0x2fe   :  { %3259 = vmatprep.subr.bf16.mxu0 %v12182_v9  ;;  %3302 = vmatprep.subr.bf16.mxu1 %v12185_v10  ;;  %v12249_v9 = vld [vmem:[#allocation11 + $0x468] ss:$16 sps:$4 sm:$0xff]   ;;  %v12254_v10 = vld [vmem:[#allocation11 + $0x444] ss:$16 sps:$4 sm:$0xff]  }
 0x301   :  { %3260 = vmatpush2.bf16.msra.mxu0 %v12180_v58  ;;  %3303 = vmatpush2.bf16.msra.mxu1 %v12183_v11  ;;  %v12257_v58 = vld [vmem:[#allocation11 + $0x44c] ss:$16 sps:$4 sm:$0xff]   ;;  %v12252_v11 = vld [vmem:[#allocation11 + $0x440] ss:$16 sps:$4 sm:$0xff]  }
 0x302   :  { %3261 = vmatprep.subr.bf16.mxu0 %v12188_v13  ;;  %3304 = vmatprep.subr.bf16.mxu1 %v12191_v14  ;;  %v12255_v13 = vld [vmem:[#allocation11 + $0x448] ss:$16 sps:$4 sm:$0xff]   ;;  %v12260_v14 = vld [vmem:[#allocation11 + $0x424] ss:$16 sps:$4 sm:$0xff]  }
 0x305   :  { %3262 = vmatpush2.bf16.msra.mxu0 %v12186_v15  ;;  %3305 = vmatpush2.bf16.msra.mxu1 %v12189_v16  ;;  %v12263_v15 = vld [vmem:[#allocation11 + $0x42c] ss:$16 sps:$4 sm:$0xff]   ;;  %v12258_v16 = vld [vmem:[#allocation11 + $0x420] ss:$16 sps:$4 sm:$0xff]  }
 0x306   :  { %3263 = vmatprep.subr.bf16.mxu0 %v12194_v18  ;;  %3306 = vmatprep.subr.bf16.mxu1 %v12197_v42  ;;  %v12261_v18 = vld [vmem:[#allocation11 + $0x428] ss:$16 sps:$4 sm:$0xff]   ;;  %v12266_v42 = vld [vmem:[#allocation11 + $0x404] ss:$16 sps:$4 sm:$0xff]  }
 0x309   :  { %3264 = vmatpush2.bf16.msra.mxu0 %v12192_v20  ;;  %3307 = vmatpush2.bf16.msra.mxu1 %v12195_v21  ;;  %v12269_v20 = vld [vmem:[#allocation11 + $0x40c] ss:$16 sps:$4 sm:$0xff]   ;;  %v12264_v21 = vld [vmem:[#allocation11 + $0x400] ss:$16 sps:$4 sm:$0xff]  }
 0x30a   :  { %3265 = vmatprep.subr.bf16.mxu0 %v12200_v22  ;;  %3308 = vmatprep.subr.bf16.mxu1 %v12203_v23  ;;  %v12267_v22 = vld [vmem:[#allocation11 + $0x408] ss:$16 sps:$4 sm:$0xff]   ;;  %v12272_v23 = vld [vmem:[#allocation11 + $0x5e4] ss:$16 sps:$4 sm:$0xff]  }
 0x30d   :  { %3266 = vmatpush2.bf16.msra.mxu0 %v12198_v24  ;;  %3309 = vmatpush2.bf16.msra.mxu1 %v12201_v17  ;;  %v12275_v24 = vld [vmem:[#allocation11 + $0x5ec] ss:$16 sps:$4 sm:$0xff]   ;;  %v12270_v17 = vld [vmem:[#allocation11 + $0x5e0] ss:$16 sps:$4 sm:$0xff]  }
 0x30e   :  { %3267 = vmatprep.subr.bf16.mxu0 %v12206_v25  ;;  %3310 = vmatprep.subr.bf16.mxu1 %v12209_v26  ;;  %v12273_v25 = vld [vmem:[#allocation11 + $0x5e8] ss:$16 sps:$4 sm:$0xff]   ;;  %v12278_v26 = vld [vmem:[#allocation11 + $0x5c4] ss:$16 sps:$4 sm:$0xff]  }
 0x311   :  { %3268 = vmatpush2.bf16.msra.mxu0 %v12204_v27  ;;  %3311 = vmatpush2.bf16.msra.mxu1 %v12207_v28  ;;  %v12281_v27 = vld [vmem:[#allocation11 + $0x5cc] ss:$16 sps:$4 sm:$0xff]   ;;  %v12276_v28 = vld [vmem:[#allocation11 + $0x5c0] ss:$16 sps:$4 sm:$0xff]  }
 0x312   :  { %3269 = vmatprep.subr.bf16.mxu0 %v12212_v30  ;;  %3312 = vmatprep.subr.bf16.mxu1 %v12215_v31  ;;  %v12279_v30 = vld [vmem:[#allocation11 + $0x5c8] ss:$16 sps:$4 sm:$0xff]   ;;  %v12284_v31 = vld [vmem:[#allocation11 + $0x5a4] ss:$16 sps:$4 sm:$0xff]  }
 0x315   :  { %3270 = vmatpush2.bf16.msra.mxu0 %v12210_v33  ;;  %3313 = vmatpush2.bf16.msra.mxu1 %v12213_v34  ;;  %v12287_v33 = vld [vmem:[#allocation11 + $0x5ac] ss:$16 sps:$4 sm:$0xff]   ;;  %v12282_v34 = vld [vmem:[#allocation11 + $0x5a0] ss:$16 sps:$4 sm:$0xff]  }
 0x316   :  { %3271 = vmatprep.subr.bf16.mxu0 %v12218_v38  ;;  %3314 = vmatprep.subr.bf16.mxu1 %v12221_v39  ;;  %v12290_v38 = vld [vmem:[#allocation11 + $0x584] ss:$16 sps:$4 sm:$0xff]   ;;  %v12293_v39 = vld [vmem:[#allocation11 + $0x58c] ss:$16 sps:$4 sm:$0xff]  }
 0x319   :  { %3272 = vmatpush2.bf16.msra.mxu0 %v12216_v48  ;;  %3315 = vmatpush2.bf16.msra.mxu1 %v12219_v41  ;;  %v12296_v48 = vld [vmem:[#allocation11 + $0x564] ss:$16 sps:$4 sm:$0xff]   ;;  %v12299_v41 = vld [vmem:[#allocation11 + $0x56c] ss:$16 sps:$4 sm:$0xff]  }
 0x31a   :  { %3731 = vmatprep.subr.bf16.mxu0 %v12224_v43  ;;  %3774 = vmatprep.subr.bf16.mxu1 %v12227_v45  ;;  %v12294_v43 = vld [vmem:[#allocation11 + $0x560] ss:$16 sps:$4 sm:$0xff]   ;;  %v12297_v45 = vld [vmem:[#allocation11 + $0x568] ss:$16 sps:$4 sm:$0xff]  }
 0x31c   :  { %3274 = vmatmul.mubr.bf16.vlgmr.msra.gmra.mxu0 %v2351_v52  ;;  %3317 = vmatmul.mubr.bf16.vlgmr.msra.gmra.mxu1 %v2351_v52  ;;  %v12308_v52 = vld [vmem:[#allocation11 + $0x524] ss:$16 sps:$4 sm:$0xff]  }
 0x31d   :  { %3732 = vmatpush1.bf16.msra.mxu0 %v12222_v51  ;;  %3763 = vmatprep.mubr.bf16.mxu0 %v3408_v57  ;;  %v12303_v51 = vld [vmem:[#allocation11 + $0x548] ss:$16 sps:$4 sm:$0xff]  }
 0x31e   :  { %3775 = vmatpush1.bf16.msra.mxu1 %v12225_v50  ;;  %3806 = vmatprep.mubr.bf16.mxu1 %v3408_v57  ;;  %v12311_v50 = vld [vmem:[#allocation11 + $0x52c] ss:$16 sps:$4 sm:$0xff]   ;;  %v12314_v57 = vld [vmem:[#allocation11 + $0x504] ss:$16 sps:$4 sm:$0xff]  }
 0x31f   :  { %3733 = vmatprep.subr.bf16.mxu0 %v12230_v55  ;;  %3776 = vmatprep.subr.bf16.mxu1 %v12233_v56  ;;  %v12306_v55 = vld [vmem:[#allocation11 + $0x520] ss:$16 sps:$4 sm:$0xff]   ;;  %v12309_v56 = vld [vmem:[#allocation11 + $0x528] ss:$16 sps:$4 sm:$0xff]  }
 0x321   :  { %3734 = vmatpush1.bf16.msra.mxu0 %v12228_v6  ;;  %v3327_v6 = vld [vmem:[#allocation3 + $0x8] sm:$0xfc] }
 0x322   :  { %3777 = vmatpush1.bf16.msra.mxu1 %v12231_v59  ;;  %3735 = vmatprep.subr.bf16.mxu0 %v12236_v60  ;;  %v12317_v59 = vld [vmem:[#allocation11 + $0x50c] ss:$16 sps:$4 sm:$0xff]   ;;  %v3333_v60 = vpack.c.bf16 %v3329_v53, %v3329_v53 }
 0x323   :  { %3778 = vmatprep.subr.bf16.mxu1 %v12239_v61  ;;  %v12312_v61 = vld [vmem:[#allocation11 + $0x500] ss:$16 sps:$4 sm:$0xff]  }
 0x325   :  { %3736 = vmatpush1.bf16.msra.mxu0 %v12234_v62  ;;  %v3331_v62 = vpack.c.bf16 %v13289_v4, %v3327_v6  ;;  %v12322_v4 = vld [vmem:[#allocation14 + $0x70] sm:$0xff]  }
 0x326   :  { %3779 = vmatpush1.bf16.msra.mxu1 %v12237_v63  ;;  %3737 = vmatprep.subr.bf16.mxu0 %v12242_v2  ;;  %v12315_v63 = vld [vmem:[#allocation11 + $0x508] ss:$16 sps:$4 sm:$0xff]   ;;  %v3404_v2 = vrot.slane %v3333_v60, 1 }
 0x327   :  { %3780 = vmatprep.subr.bf16.mxu1 %v12245_v3  ;;  %v3403_v3 = vrot.slane %v3331_v62, 1 }
 0x329   :  { %3738 = vmatpush1.bf16.msra.mxu0 %v12240_v0  ;;  %v3405_v0 = vsel %vm1552_vm4, %v3403_v3, %v3404_v2 }
 0x32a   :  { %3781 = vmatpush1.bf16.msra.mxu1 %v12243_v5  ;;  %3739 = vmatprep.subr.bf16.mxu0 %v12248_v7  ;;  %v12318_v5 = vld [vmem:[#allocation14 + $0x78] sm:$0xff]  }
 0x32b   :  { %3782 = vmatprep.subr.bf16.mxu1 %v12251_v54  ;;  %v12319_v7 = vld [vmem:[#allocation14 + $0x38] sm:$0xff]  }
 0x32c   :  { %v12320_v54 = vld [vmem:[#allocation14 + $0xf8] sm:$0xff]  }
 0x32d   :  { %3740 = vmatpush1.bf16.msra.mxu0 %v12246_v8  ;;  %v12321_v8 = vld [vmem:[#allocation14 + $0xb8] sm:$0xff]  }
 0x32e   :  { %3783 = vmatpush1.bf16.msra.mxu1 %v12249_v9  ;;  %3741 = vmatprep.subr.bf16.mxu0 %v12254_v10  ;;  %v12323_v9 = vld [vmem:[#allocation14 + $0x30] sm:$0xff]  }
 0x32f   :  { %3784 = vmatprep.subr.bf16.mxu1 %v12257_v58  ;;  %v12324_v10 = vld [vmem:[#allocation14 + $0xf0] sm:$0xff]  }
 0x330   :  { %v12325_v58 = vld [vmem:[#allocation14 + $0xb0] sm:$0xff]  }
 0x331   :  { %3742 = vmatpush1.bf16.msra.mxu0 %v12252_v11  ;;  %v12326_v11 = vld [vmem:[#allocation14 + $0x68] sm:$0xff]  }
 0x332   :  { %3785 = vmatpush1.bf16.msra.mxu1 %v12255_v13  ;;  %3743 = vmatprep.subr.bf16.mxu0 %v12260_v14  ;;  %v12327_v13 = vld [vmem:[#allocation14 + $0x28] sm:$0xff]  }
 0x333   :  { %3786 = vmatprep.subr.bf16.mxu1 %v12263_v15  ;;  %v12328_v14 = vld [vmem:[#allocation14 + $0xe8] sm:$0xff]  }
 0x334   :  { %v12329_v15 = vld [vmem:[#allocation14 + $0xa8] sm:$0xff]  }
 0x335   :  { %3744 = vmatpush1.bf16.msra.mxu0 %v12258_v16  ;;  %v12330_v16 = vld [vmem:[#allocation14 + $0x60] sm:$0xff]  }
 0x336   :  { %3787 = vmatpush1.bf16.msra.mxu1 %v12261_v18  ;;  %3745 = vmatprep.subr.bf16.mxu0 %v12266_v42  ;;  %v12331_v18 = vld [vmem:[#allocation14 + $0x20] sm:$0xff]  }
 0x337   :  { %3788 = vmatprep.subr.bf16.mxu1 %v12269_v20  ;;  %v12332_v42 = vld [vmem:[#allocation14 + $0xe0] sm:$0xff]  }
 0x338   :  { %v12333_v20 = vld [vmem:[#allocation14 + $0xa0] sm:$0xff]  }
 0x339   :  { %3746 = vmatpush1.bf16.msra.mxu0 %v12264_v21  ;;  %v12334_v21 = vld [vmem:[#allocation14 + $0x58] sm:$0xff]  }
 0x33a   :  { %3789 = vmatpush1.bf16.msra.mxu1 %v12267_v22  ;;  %3747 = vmatprep.subr.bf16.mxu0 %v12272_v23  ;;  %v12335_v22 = vld [vmem:[#allocation14 + $0x18] sm:$0xff]  }
 0x33b   :  { %3790 = vmatprep.subr.bf16.mxu1 %v12275_v24  ;;  %v12336_v23 = vld [vmem:[#allocation14 + $0xd8] sm:$0xff]  }
 0x33c   :  { %v12337_v24 = vld [vmem:[#allocation14 + $0x98] sm:$0xff]  }
 0x33d   :  { %3748 = vmatpush2.bf16.msra.mxu0 %v12270_v17  ;;  %v12338_v17 = vld [vmem:[#allocation14 + $0x50] sm:$0xff]  }
 0x33e   :  { %3791 = vmatpush2.bf16.msra.mxu1 %v12273_v25  ;;  %3749 = vmatprep.subr.bf16.mxu0 %v12278_v26  ;;  %v12339_v25 = vld [vmem:[#allocation14 + $0x10] sm:$0xff]  }
 0x33f   :  { %3792 = vmatprep.subr.bf16.mxu1 %v12281_v27  ;;  %v12340_v26 = vld [vmem:[#allocation14 + $0xd0] sm:$0xff]  }
 0x340   :  { %v12341_v27 = vld [vmem:[#allocation14 + $0x90] sm:$0xff]  }
 0x341   :  { %3750 = vmatpush2.bf16.msra.mxu0 %v12276_v28  ;;  %v12342_v28 = vld [vmem:[#allocation14 + $0x48] sm:$0xff]  }
 0x342   :  { %3793 = vmatpush2.bf16.msra.mxu1 %v12279_v30  ;;  %3751 = vmatprep.subr.bf16.mxu0 %v12284_v31  ;;  %v12343_v30 = vld [vmem:[#allocation14 + $0x8] sm:$0xff]  }
 0x343   :  { %3794 = vmatprep.subr.bf16.mxu1 %v12287_v33  ;;  %v12344_v31 = vld [vmem:[#allocation14 + $0xc8] sm:$0xff]  }
 0x344   :  { %v12345_v33 = vld [vmem:[#allocation14 + $0x88] sm:$0xff]  }
 0x345   :  { %3752 = vmatpush2.bf16.msra.mxu0 %v12282_v34  ;;  %v12346_v34 = vld [vmem:[#allocation14 + $0x40] sm:$0xff]  }
 0x346   :  { %3795 = vmatpush2.bf16.msra.mxu1 %v12285_v35  ;;  %3753 = vmatprep.subr.bf16.mxu0 %v12290_v38  ;;  %v12348_v35 = vld [vmem:[#allocation14 + $0xc0] sm:$0xff]  }
 0x347   :  { %3796 = vmatprep.subr.bf16.mxu1 %v12293_v39  ;;  %v12347_v38 = vld [vmem:[#allocation14] sm:$0xff]  }
 0x348   :  { %v12349_v39 = vld [vmem:[#allocation14 + $0x80] sm:$0xff]  }
 0x349   :  { %3754 = vmatpush2.bf16.msra.mxu0 %v12288_v37  ;;  %v12350_v37 = vld [vmem:[#allocation14 + $0x178] sm:$0xff]  }
 0x34a   :  { %3797 = vmatpush2.bf16.msra.mxu1 %v12291_v40  ;;  %3755 = vmatprep.subr.bf16.mxu0 %v12296_v48  ;;  %v12353_v40 = vld [vmem:[#allocation14 + $0x1f8] sm:$0xff]  }
 0x34b   :  { %3798 = vmatprep.subr.bf16.mxu1 %v12299_v41 }
 0x34d   :  { %3756 = vmatpush2.bf16.msra.mxu0 %v12294_v43 }
 0x34e   :  { %3799 = vmatpush2.bf16.msra.mxu1 %v12297_v45  ;;  %3757 = vmatprep.subr.bf16.mxu0 %v12302_v46 }
 0x34f   :  { %3800 = vmatprep.subr.bf16.mxu1 %v12305_v47 }
 0x351   :  { %3758 = vmatpush2.bf16.msra.mxu0 %v12300_v49 }
 0x352   :  { %3801 = vmatpush2.bf16.msra.mxu1 %v12303_v51  ;;  %3759 = vmatprep.subr.bf16.mxu0 %v12308_v52 }
 0x353   :  { %3802 = vmatprep.subr.bf16.mxu1 %v12311_v50 }
 0x355   :  { %3760 = vmatpush2.bf16.msra.mxu0 %v12306_v55 }
 0x356   :  { %3803 = vmatpush2.bf16.msra.mxu1 %v12309_v56  ;;  %3761 = vmatprep.subr.bf16.mxu0 %v12314_v57 }
 0x357   :  { %3804 = vmatprep.subr.bf16.mxu1 %v12317_v59 }
 0x359   :  { %3762 = vmatpush2.bf16.msra.mxu0 %v12312_v61 }
 0x35a   :  { %3805 = vmatpush2.bf16.msra.mxu1 %v12315_v63  ;;  %10894 = vmatprep.subr.bf16.mxu0 %v12318_v5 }
 0x35b   :  { %10916 = vmatprep.subr.bf16.mxu1 %v12320_v54 }
 0x35c   :  { %3764 = vmatmul.mubr.bf16.vlgmr.msra.gmra.mxu0 %v3405_v0 }
 0x35d   :  { %3807 = vmatmul.mubr.bf16.vlgmr.msra.gmra.mxu1 %v3405_v0  ;;  %10895 = vmatpush3.bf16.msra.mxu0 %v12319_v7 }
 0x35e   :  { %10917 = vmatpush3.bf16.msra.mxu1 %v12321_v8  ;;  %10896 = vmatprep.subr.bf16.mxu0 %v12322_v4 }
 0x35f   :  { %10918 = vmatprep.subr.bf16.mxu1 %v12324_v10 }
 0x361   :  { %10897 = vmatpush3.bf16.msra.mxu0 %v12323_v9 }
 0x362   :  { %10919 = vmatpush3.bf16.msra.mxu1 %v12325_v58  ;;  %10898 = vmatprep.subr.bf16.mxu0 %v12326_v11 }
 0x363   :  { %10920 = vmatprep.subr.bf16.mxu1 %v12328_v14 }
 0x365   :  { %10899 = vmatpush3.bf16.msra.mxu0 %v12327_v13 }
 0x366   :  { %10921 = vmatpush3.bf16.msra.mxu1 %v12329_v15  ;;  %10900 = vmatprep.subr.bf16.mxu0 %v12330_v16 }
 0x367   :  { %10922 = vmatprep.subr.bf16.mxu1 %v12332_v42 }
 0x369   :  { %10901 = vmatpush3.bf16.msra.mxu0 %v12331_v18 }
 0x36a   :  { %10923 = vmatpush3.bf16.msra.mxu1 %v12333_v20  ;;  %10902 = vmatprep.subr.bf16.mxu0 %v12334_v21 }
 0x36b   :  { %10924 = vmatprep.subr.bf16.mxu1 %v12336_v23 }
 0x36d   :  { %10903 = vmatpush3.bf16.msra.mxu0 %v12335_v22 }
 0x36e   :  { %10925 = vmatpush3.bf16.msra.mxu1 %v12337_v24  ;;  %10904 = vmatprep.subr.bf16.mxu0 %v12338_v17 }
 0x36f   :  { %10926 = vmatprep.subr.bf16.mxu1 %v12340_v26 }
 0x371   :  { %10905 = vmatpush3.bf16.msra.mxu0 %v12339_v25 }
 0x372   :  { %10927 = vmatpush3.bf16.msra.mxu1 %v12341_v27  ;;  %10906 = vmatprep.subr.bf16.mxu0 %v12342_v28 }
 0x373   :  { %10928 = vmatprep.subr.bf16.mxu1 %v12344_v31 }
 0x375   :  { %10907 = vmatpush3.bf16.msra.mxu0 %v12343_v30 }
 0x376   :  { %10908 = vmatprep.subr.bf16.mxu0 %v12346_v34  ;;  %10929 = vmatpush3.bf16.msra.mxu1 %v12345_v33 }
 0x377   :  { %10930 = vmatprep.subr.bf16.mxu1 %v12348_v35 }
 0x379   :  { %10909 = vmatpush3.bf16.msra.mxu0 %v12347_v38 }
 0x37a   :  { %10931 = vmatpush3.bf16.msra.mxu1 %v12349_v39  ;;  %10938 = vmatprep.subr.bf16.mxu0 %v12350_v37 }
 0x37b   :  { %10960 = vmatprep.subr.bf16.mxu1 %v12353_v40 }
 0x39c   :  { %v2869_v48 = vpop.f32.mrf.mxu0  ;;  %v2912_v41 = vpop.f32.mrf.mxu1 }
 0x39e   :  { %v2871_v43 = vpop.f32.mrf.mxu0  ;;  %v2914_v45 = vpop.f32.mrf.mxu1 }
 0x3a0   :  { %v2873_v46 = vpop.f32.mrf.mxu0  ;;  %v2916_v47 = vpop.f32.mrf.mxu1 }
 0x3a2   :  { %v2875_v49 = vpop.f32.mrf.mxu0  ;;  %v2918_v51 = vpop.f32.mrf.mxu1 }
 0x3dc   :  { %v3275_v52 = vpop.f32.mrf.mxu0  ;;  %v3318_v50 = vpop.f32.mrf.mxu1 }
 0x3dd   :  { %v3276_v59 = vadd.f32 %v3275_v52, %v2869_v48  ;;  %v3319_v61 = vadd.f32 %v3318_v50, %v2912_v41 }
 0x3de   :  { %v3277_v53 = vpop.f32.mrf.mxu0  ;;  %v3320_v55 = vpop.f32.mrf.mxu1 }
 0x3df   :  { %v3278_v63 = vadd.f32 %v3277_v53, %v2871_v43  ;;  %v3321_v0 = vadd.f32 %v3320_v55, %v2914_v45 }
 0x3e0   :  { %v3279_v56 = vpop.f32.mrf.mxu0  ;;  %v3322_v57 = vpop.f32.mrf.mxu1 }
 0x3e1   :  { %v3280_v54 = vadd.f32 %v3279_v56, %v2873_v46  ;;  %v3323_v10 = vadd.f32 %v3322_v57, %v2916_v47 }
 0x3e2   :  { %v3281_v6 = vpop.f32.mrf.mxu0  ;;  %v3324_v60 = vpop.f32.mrf.mxu1 }
 0x3e3   :  { %v3282_v14 = vadd.f32 %v3281_v6, %v2875_v49  ;;  %v3325_v20 = vadd.f32 %v3324_v60, %v2918_v51 }
 0x41c   :  { %v3765_v62 = vpop.f32.mrf.mxu0 }
 0x41d   :  { %v3817_v2 = vadd.f32 %v3765_v62, %v3276_v59  ;;  %v3808_v3 = vpop.f32.mrf.mxu1 }
 0x41e   :  { %v3819_v5 = vadd.f32 %v3808_v3, %v3319_v61  ;;  %v3767_v7 = vpop.f32.mrf.mxu0 }
 0x41f   :  { %v3825_v8 = vadd.f32 %v3817_v2, %v13229_v29  ;;  %v3818_v4 = vadd.f32 %v3767_v7, %v3278_v63  ;;  %v3810_v9 = vpop.f32.mrf.mxu1  ;;  %v12351_v7 = vld [vmem:[#allocation14 + $0x138] sm:$0xff]  }
 0x420   :  { %v3827_v58 = vadd.f32 %v3819_v5, %v13231_v32  ;;  %v3820_v11 = vadd.f32 %v3810_v9, %v3321_v0  ;;  %v3769_v13 = vpop.f32.mrf.mxu0 }
 0x421   :  { %v3833_v15 = vmax.f32 %v3825_v8, 0.0  ;;  %v3826_v16 = vadd.f32 %v3818_v4, %v13235_v36  ;;  %v3821_v18 = vadd.f32 %v3769_v13, %v3280_v54  ;;  %v3812_v42 = vpop.f32.mrf.mxu1 }
 0x422   :  { %v3835_v21 = vmax.f32 %v3827_v58, 0.0  ;;  %v3828_v22 = vadd.f32 %v3820_v11, %v13237_v19  ;;  %v3823_v23 = vadd.f32 %v3812_v42, %v3323_v10  ;;  %v3771_v24 = vpop.f32.mrf.mxu0  ;;  %v12354_v10 = vld [vmem:[#allocation14 + $0x1b8] sm:$0xff]   ;;  %v12355_v58 = vld [vmem:[#allocation14 + $0x170] sm:$0xff]  }
 0x423   :  { %3842 = vst [vmem:[#allocation4 + $0x40] sm:$0xff] %v3833_v15  ;;  %v3834_v17 = vmax.f32 %v3826_v16, 0.0  ;;  %v3829_v25 = vadd.f32 %v3821_v18, %v13229_v29  ;;  %v3822_v26 = vadd.f32 %v3771_v24, %v3282_v14  ;;  %v3814_v27 = vpop.f32.mrf.mxu1  ;;  %v13053_v29 = vmov 1983009808   ;;  %v12358_v14 = vld [vmem:[#allocation14 + $0x1f0] sm:$0xff]   ;;  %v12360_v18 = vld [vmem:[#allocation14 + $0x168] sm:$0xff]  }
 0x424   :  { %3844 = vst [vmem:[#allocation4 + $0x50] sm:$0xff] %v3835_v21  ;;  %v3836_v28 = vmax.f32 %v3828_v22, 0.0  ;;  %v3831_v30 = vadd.f32 %v3823_v23, %v13231_v32  ;;  %v3824_v31 = vadd.f32 %v3814_v27, %v3325_v20  ;;  %v4013_v40 = vunpack.c.l.s4 %v13053_v29  ;;  %v12357_v15 = vld [vmem:[#allocation14 + $0x130] sm:$0xff]   ;;  %v12362_v20 = vld [vmem:[#allocation14 + $0x1e8] sm:$0xff]   ;;  %v12364_v22 = vld [vmem:[#allocation14 + $0x160] sm:$0xff]  }
 0x425   :  { %3843 = vst [vmem:[#allocation4 + $0x48] sm:$0xff] %v3834_v17  ;;  %v3837_v33 = vmax.f32 %v3829_v25, 0.0  ;;  %v3830_v34 = vadd.f32 %v3822_v26, %v13235_v36  ;;  %v12359_v42 = vld [vmem:[#allocation14 + $0x1b0] sm:$0xff]   ;;  %v12361_v21 = vld [vmem:[#allocation14 + $0x128] sm:$0xff]   ;;  %v12366_v24 = vld [vmem:[#allocation14 + $0x1e0] sm:$0xff]  }
 0x426   :  { %3845 = vst [vmem:[#allocation4 + $0x58] sm:$0xff] %v3836_v28  ;;  %v3839_v35 = vmax.f32 %v3831_v30, 0.0  ;;  %v3832_v38 = vadd.f32 %v3824_v31, %v13237_v19  ;;  %v4014_v32 = vunpack.c.0.s8 %v4013_v40  ;;  %v12363_v23 = vld [vmem:[#allocation14 + $0x1a8] sm:$0xff]   ;;  %v12365_v17 = vld [vmem:[#allocation14 + $0x120] sm:$0xff]   ;;  %v12368_v25 = vld [vmem:[#allocation14 + $0x158] sm:$0xff]  }
 0x427   :  { %3846 = vst [vmem:[#allocation4 + $0x60] sm:$0xff] %v3837_v33  ;;  %v3838_v39 = vmax.f32 %v3830_v34, 0.0  ;;  %v12367_v26 = vld [vmem:[#allocation14 + $0x1a0] sm:$0xff]   ;;  %v12370_v27 = vld [vmem:[#allocation14 + $0x1d8] sm:$0xff]   ;;  %v12372_v30 = vld [vmem:[#allocation14 + $0x150] sm:$0xff]  }
 0x428   :  { %3848 = vst [vmem:[#allocation4 + $0x70] sm:$0xff] %v3839_v35  ;;  %v3840_v37 = vmax.f32 %v3832_v38, 0.0  ;;  %v13329_v52 = vsub.s32 %v4014_v32, %v13167_v44  ;;  %v12369_v28 = vld [vmem:[#allocation14 + $0x118] sm:$0xff]   ;;  %v12374_v33 = vld [vmem:[#allocation14 + $0x1d0] sm:$0xff]   ;;  %v12376_v35 = vld [vmem:[#allocation14 + $0x148] sm:$0xff]  }
 0x429   :  { %3847 = vst [vmem:[#allocation4 + $0x68] sm:$0xff] %v3838_v39  ;;  %v12371_v31 = vld [vmem:[#allocation14 + $0x198] sm:$0xff]   ;;  %v12373_v34 = vld [vmem:[#allocation14 + $0x110] sm:$0xff]   ;;  %v12377_v29 = vld [vmem:[#allocation14 + $0x108] sm:$0xff]  }
 0x42a   :  { %3849 = vst [vmem:[#allocation4 + $0x78] sm:$0xff] %v3840_v37  ;;  %v12375_v39 = vld [vmem:[#allocation14 + $0x190] sm:$0xff]   ;;  %v12378_v37 = vld [vmem:[#allocation14 + $0x1c8] sm:$0xff]  }
 0x42d   :  { %v3916_v48 = vld [vmem:[#allocation4 + $0x40] ss:$8 sm:$0xf]  ;;  %v3920_v41 = vld [vmem:[#allocation4 + $0x41] ss:$8 sm:$0xf] }
 0x42e   :  { %3918 = vst.msk [vmem:[#allocation5 + $0x1] ss:$2 sm:$0xf] %vm13248_vm5, %v3916_v48  ;;  %3922 = vst.msk [vmem:[#allocation5 + $0x9] ss:$2 sm:$0xf] %vm13248_vm5, %v3920_v41 }
 0x42f   :  { %v3924_v36 = vld [vmem:[#allocation4 + $0x42] ss:$8 sm:$0xf]  ;;  %v3928_v43 = vld [vmem:[#allocation4 + $0x43] ss:$8 sm:$0xf] }
 0x430   :  { %3926 = vst.msk [vmem:[#allocation5 + $0x11] ss:$2 sm:$0xf] %vm13248_vm5, %v3924_v36  ;;  %3930 = vst.msk [vmem:[#allocation5 + $0x19] ss:$2 sm:$0xf] %vm13248_vm5, %v3928_v43 }
 0x431   :  { %v3932_v19 = vld [vmem:[#allocation4 + $0x44] ss:$8 sm:$0xf]  ;;  %v3936_v45 = vld [vmem:[#allocation4 + $0x45] ss:$8 sm:$0xf] }
 0x432   :  { %3934 = vst.msk [vmem:[#allocation5 + $0x21] ss:$2 sm:$0xf] %vm13248_vm5, %v3932_v19  ;;  %3938 = vst.msk [vmem:[#allocation5 + $0x29] ss:$2 sm:$0xf] %vm13248_vm5, %v3936_v45 }
 0x433   :  { %v3940_v46 = vld [vmem:[#allocation4 + $0x46] ss:$8 sm:$0xf]  ;;  %v3944_v47 = vld [vmem:[#allocation4 + $0x47] ss:$8 sm:$0xf] }
 0x434   :  { %3942 = vst.msk [vmem:[#allocation5 + $0x31] ss:$2 sm:$0xf] %vm13248_vm5, %v3940_v46  ;;  %3946 = vst.msk [vmem:[#allocation5 + $0x39] ss:$2 sm:$0xf] %vm13248_vm5, %v3944_v47 }
 0x435   :  { %v3948_v49 = vld [vmem:[#allocation4 + $0x60] ss:$8 sm:$0xf]  ;;  %v3952_v51 = vld [vmem:[#allocation4 + $0x61] ss:$8 sm:$0xf] }
 0x436   :  { %3950 = vst.msk [vmem:[#allocation5 + $0x41] ss:$2 sm:$0xf] %vm13248_vm5, %v3948_v49  ;;  %3954 = vst.msk [vmem:[#allocation5 + $0x49] ss:$2 sm:$0xf] %vm13248_vm5, %v3952_v51 }
 0x437   :  { %v3956_v50 = vld [vmem:[#allocation4 + $0x62] ss:$8 sm:$0xf]  ;;  %v3960_v53 = vld [vmem:[#allocation4 + $0x63] ss:$8 sm:$0xf] }
 0x438   :  { %3958 = vst.msk [vmem:[#allocation5 + $0x51] ss:$2 sm:$0xf] %vm13248_vm5, %v3956_v50  ;;  %3962 = vst.msk [vmem:[#allocation5 + $0x59] ss:$2 sm:$0xf] %vm13248_vm5, %v3960_v53 }
 0x439   :  { %v3964_v55 = vld [vmem:[#allocation4 + $0x64] ss:$8 sm:$0xf]  ;;  %v3968_v56 = vld [vmem:[#allocation4 + $0x65] ss:$8 sm:$0xf] }
 0x43a   :  { %3966 = vst.msk [vmem:[#allocation5 + $0x61] ss:$2 sm:$0xf] %vm13248_vm5, %v3964_v55  ;;  %3970 = vst.msk [vmem:[#allocation5 + $0x69] ss:$2 sm:$0xf] %vm13248_vm5, %v3968_v56 }
 0x43b   :  { %v3972_v44 = vld [vmem:[#allocation4 + $0x66] ss:$8 sm:$0xf]  ;;  %v3976_v57 = vld [vmem:[#allocation4 + $0x67] ss:$8 sm:$0xf] }
 0x43c   :  { %3974 = vst.msk [vmem:[#allocation5 + $0x71] ss:$2 sm:$0xf] %vm13248_vm5, %v3972_v44  ;;  %3978 = vst.msk [vmem:[#allocation5 + $0x79] ss:$2 sm:$0xf] %vm13248_vm5, %v3976_v57 }
 0x43d   :  { %v3979_v6 = vld [vmem:[#allocation5] sm:$0xff]  ;;  %v3980_v59 = vld [vmem:[#allocation5 + $0x8] sm:$0xff]  ;;  %v3981_v38 = vld [vmem:[#allocation5 + $0x10] sm:$0xff] }
 0x43e   :  { %v4018_v60 = vrot.slane %v3979_v6, %v13329_v52  ;;  %v4011_v61 = vcombine.high %v3979_v6, %v3979_v6  ;;  %v13349_v62 = vrot.slane %v3980_v59, %v13329_v52  ;;  %v4028_v63 = vcombine.high %v3980_v59, %v3980_v59  ;;  %v12380_v48 = vld [vmem:[#allocation14 + $0x140] sm:$0xff]   ;;  %v12379_v41 = vld [vmem:[#allocation14 + $0x188] sm:$0xff]   ;;  %v12384_v45 = vld [vmem:[#allocation14 + $0x278] sm:$0xff]  }
 0x43f   :  { %v4045_v40 = vcombine.high %v3981_v38, %v3981_v38  ;;  %v13360_v32 = vrot.slane %v3981_v38, %v13329_v52  ;;  %v12382_v36 = vld [vmem:[#allocation14 + $0x1c0] sm:$0xff]   ;;  %v12386_v49 = vld [vmem:[#allocation14 + $0x2f8] sm:$0xff]   ;;  %v12389_v55 = vld [vmem:[#allocation14 + $0x270] sm:$0xff]  }
 0x440   :  { %v4026_v2 = vcombine.high %v4018_v60, %v4018_v60  ;;  %v4025_v3 = vrot.slane %v4011_v61, %v13329_v52  ;;  %v4043_v0 = vcombine.high %v13349_v62, %v13349_v62  ;;  %v13355_v5 = vrot.slane %v4028_v63, %v13329_v52  ;;  %v12381_v43 = vld [vmem:[#allocation14 + $0x100] sm:$0xff]   ;;  %v12385_v51 = vld [vmem:[#allocation14 + $0x238] sm:$0xff]   ;;  %v12391_v6 = vld [vmem:[#allocation14 + $0x2f0] sm:$0xff]  }
 0x441   :  { %v4347_v8 = vpack.c.bf16 %v4018_v60, %v4018_v60  ;;  %v13363_v19 = vrot.slane %v4045_v40, %v13329_v52  ;;  %v12383_v46 = vld [vmem:[#allocation14 + $0x180] sm:$0xff]   ;;  %v4060_v47 = vcombine.high %v13360_v32, %v13360_v32  ;;  %v4351_v53 = vpack.c.bf16 %v13349_v62, %v13349_v62  ;;  %v12387_v44 = vld [vmem:[#allocation14 + $0x2b8] sm:$0xff]   ;;  %v12390_v60 = vld [vmem:[#allocation14 + $0x230] sm:$0xff]  }
 0x442   :  { %v4348_v12 = vpack.c.bf16 %v4026_v2, %v4026_v2  ;;  %v4027_v54 = vcombine.high %v4025_v3, %v4025_v3  ;;  %v4044_v4 = vcombine.high %v13355_v5, %v13355_v5  ;;  %v4352_v11 = vpack.c.bf16 %v4043_v0, %v4043_v0  ;;  %v12393_v61 = vld [vmem:[#allocation14 + $0x268] sm:$0xff]   ;;  %v12392_v62 = vld [vmem:[#allocation14 + $0x2b0] sm:$0xff]   ;;  %v12420_v38 = vld [vmem:[#allocation14 + $0x3b8] sm:$0xff]  }
 0x443   :  { %v4349_v13 = vpack.c.bf16 %v4025_v3, %v4025_v3  ;;  %v4061_v50 = vcombine.high %v13363_v19, %v13363_v19  ;;  %v4356_v56 = vpack.c.bf16 %v4060_v47, %v4060_v47  ;;  %v4353_v57 = vpack.c.bf16 %v13355_v5, %v13355_v5  ;;  %v12395_v63 = vld [vmem:[#allocation14 + $0x2e8] sm:$0xff]   ;;  %v12397_v3 = vld [vmem:[#allocation14 + $0x260] sm:$0xff]   ;;  %v12423_v40 = vld [vmem:[#allocation14 + $0x330] sm:$0xff]  }
 0x444   :  { %8546 = vmatprep.mubr.bf16.mxu0 %v4348_v12  ;;  %v4350_v9 = vpack.c.bf16 %v4027_v54, %v4027_v54  ;;  %v4354_v16 = vpack.c.bf16 %v4044_v4, %v4044_v4  ;;  %v12394_v2 = vld [vmem:[#allocation14 + $0x228] sm:$0xff]   ;;  %v12399_v5 = vld [vmem:[#allocation14 + $0x2e0] sm:$0xff]   ;;  %v12402_v4 = vld [vmem:[#allocation14 + $0x218] sm:$0xff]  }
 0x445   :  { %8547 = vmatmul.mubr.bf16.vlgmr.msra.gmra.mxu0 %v4347_v8  ;;  %v4358_v59 = vpack.c.bf16 %v4061_v50, %v4061_v50  ;;  %v12396_v0 = vld [vmem:[#allocation14 + $0x2a8] sm:$0xff]   ;;  %v12398_v12 = vld [vmem:[#allocation14 + $0x220] sm:$0xff]   ;;  %v12403_v8 = vld [vmem:[#allocation14 + $0x2d8] sm:$0xff]  }
 0x446   :  { %10939 = vmatpush3.bf16.msra.mxu0 %v12351_v7  ;;  %8586 = vmatprep.mubr.bf16.mxu1 %v4350_v9  ;;  %v12401_v7 = vld [vmem:[#allocation14 + $0x258] sm:$0xff]   ;;  %v12400_v54 = vld [vmem:[#allocation14 + $0x2a0] sm:$0xff]   ;;  %v12405_v9 = vld [vmem:[#allocation14 + $0x250] sm:$0xff]  }
 0x447   :  { %8626 = vmatprep.mubr.bf16.mxu0 %v4352_v11  ;;  %8587 = vmatmul.mubr.bf16.vlgmr.msra.gmra.mxu1 %v4349_v13  ;;  %v12406_v11 = vld [vmem:[#allocation14 + $0x210] sm:$0xff]   ;;  %v12409_v13 = vld [vmem:[#allocation14 + $0x248] sm:$0xff]   ;;  %v12434_v47 = vld [vmem:[#allocation14 + $0x358] sm:$0xff]  }
 0x448   :  { %10961 = vmatpush3.bf16.msra.mxu1 %v12354_v10  ;;  %10940 = vmatprep.subr.bf16.mxu0 %v12355_v58  ;;  %v12404_v10 = vld [vmem:[#allocation14 + $0x298] sm:$0xff]   ;;  %v12407_v58 = vld [vmem:[#allocation14 + $0x2d0] sm:$0xff]  }
 0x449   :  { %8666 = vmatprep.mubr.bf16.mxu1 %v4354_v16  ;;  %10962 = vmatprep.subr.bf16.mxu1 %v12358_v14  ;;  %v3982_v14 = vld [vmem:[#allocation5 + $0x18] sm:$0xff]  ;;  %v12411_v16 = vld [vmem:[#allocation14 + $0x2c8] sm:$0xff]  }
 0x44a   :  { %10941 = vmatpush3.bf16.msra.mxu0 %v12357_v15  ;;  %v12408_v15 = vld [vmem:[#allocation14 + $0x290] sm:$0xff]   ;;  %v12435_v50 = vld [vmem:[#allocation14 + $0x318] sm:$0xff]  }
 0x44b   :  { %10942 = vmatprep.subr.bf16.mxu0 %v12360_v18  ;;  %v12410_v18 = vld [vmem:[#allocation14 + $0x208] sm:$0xff]  }
 0x44c   :  { %10963 = vmatpush3.bf16.msra.mxu1 %v12359_v42  ;;  %v4062_v42 = vcombine.high %v3982_v14, %v3982_v14 }
 0x44d   :  { %10964 = vmatprep.subr.bf16.mxu1 %v12362_v20  ;;  %v12413_v20 = vld [vmem:[#allocation14 + $0x240] sm:$0xff]  }
 0x44e   :  { %10943 = vmatpush3.bf16.msra.mxu0 %v12361_v21  ;;  %v12412_v21 = vld [vmem:[#allocation14 + $0x288] sm:$0xff]  }
 0x44f   :  { %10944 = vmatprep.subr.bf16.mxu0 %v12364_v22  ;;  %v13374_v22 = vrot.slane %v3982_v14, %v13329_v52  ;;  %v12453_v14 = vld [vmem:[#allocation14 + $0x4b8] sm:$0xff]  }
 0x450   :  { %10965 = vmatpush3.bf16.msra.mxu1 %v12363_v23  ;;  %v12415_v23 = vld [vmem:[#allocation14 + $0x2c0] sm:$0xff]  }
 0x451   :  { %10966 = vmatprep.subr.bf16.mxu1 %v12366_v24  ;;  %v12414_v24 = vld [vmem:[#allocation14 + $0x200] sm:$0xff]  }
 0x452   :  { %10945 = vmatpush3.bf16.msra.mxu0 %v12365_v17  ;;  %v13377_v17 = vrot.slane %v4062_v42, %v13329_v52  ;;  %v12456_v42 = vld [vmem:[#allocation14 + $0x430] sm:$0xff]  }
 0x453   :  { %10946 = vmatprep.subr.bf16.mxu0 %v12368_v25  ;;  %v12417_v25 = vld [vmem:[#allocation14 + $0x378] sm:$0xff]  }
 0x454   :  { %10967 = vmatpush3.bf16.msra.mxu1 %v12367_v26  ;;  %v12416_v26 = vld [vmem:[#allocation14 + $0x280] sm:$0xff]  }
 0x455   :  { %10968 = vmatprep.subr.bf16.mxu1 %v12370_v27  ;;  %v4077_v27 = vcombine.high %v13374_v22, %v13374_v22 }
 0x456   :  { %10947 = vmatpush3.bf16.msra.mxu0 %v12369_v28  ;;  %v12419_v28 = vld [vmem:[#allocation14 + $0x3f8] sm:$0xff]  }
 0x457   :  { %10948 = vmatprep.subr.bf16.mxu0 %v12372_v30  ;;  %v12418_v30 = vld [vmem:[#allocation14 + $0x338] sm:$0xff]  }
 0x458   :  { %10969 = vmatpush3.bf16.msra.mxu1 %v12371_v31  ;;  %v4078_v31 = vcombine.high %v13377_v17, %v13377_v17 }
 0x459   :  { %10970 = vmatprep.subr.bf16.mxu1 %v12374_v33  ;;  %v4355_v33 = vpack.c.bf16 %v13360_v32, %v13360_v32  ;;  %v12428_v32 = vld [vmem:[#allocation14 + $0x3e8] sm:$0xff]  }
 0x45a   :  { %10949 = vmatpush3.bf16.msra.mxu0 %v12373_v34  ;;  %v12422_v34 = vld [vmem:[#allocation14 + $0x370] sm:$0xff]  }
 0x45b   :  { %10950 = vmatprep.subr.bf16.mxu0 %v12376_v35  ;;  %v4360_v35 = vpack.c.bf16 %v4077_v27, %v4077_v27  ;;  %v12467_v27 = vld [vmem:[#allocation14 + $0x458] sm:$0xff]  }
 0x45c   :  { %10971 = vmatpush3.bf16.msra.mxu1 %v12375_v39  ;;  %v4357_v39 = vpack.c.bf16 %v13363_v19, %v13363_v19  ;;  %v12429_v19 = vld [vmem:[#allocation14 + $0x3a8] sm:$0xff]  }
 0x45d   :  { %10972 = vmatprep.subr.bf16.mxu1 %v12378_v37  ;;  %v12424_v37 = vld [vmem:[#allocation14 + $0x3f0] sm:$0xff]  }
 0x45e   :  { %10951 = vmatpush3.bf16.msra.mxu0 %v12377_v29  ;;  %v4362_v29 = vpack.c.bf16 %v4078_v31, %v4078_v31  ;;  %v12468_v31 = vld [vmem:[#allocation14 + $0x418] sm:$0xff]  }
 0x45f   :  { %10952 = vmatprep.subr.bf16.mxu0 %v12380_v48  ;;  %v12426_v48 = vld [vmem:[#allocation14 + $0x368] sm:$0xff]  }
 0x460   :  { %10973 = vmatpush3.bf16.msra.mxu1 %v12379_v41  ;;  %v12425_v41 = vld [vmem:[#allocation14 + $0x3b0] sm:$0xff]  }
 0x461   :  { %10974 = vmatprep.subr.bf16.mxu1 %v12382_v36  ;;  %v12427_v36 = vld [vmem:[#allocation14 + $0x328] sm:$0xff]  }
 0x462   :  { %10953 = vmatpush3.bf16.msra.mxu0 %v12381_v43  ;;  %v12430_v43 = vld [vmem:[#allocation14 + $0x360] sm:$0xff]  }
 0x463   :  { %10982 = vmatprep.subr.bf16.mxu0 %v12384_v45  ;;  %v12432_v45 = vld [vmem:[#allocation14 + $0x3e0] sm:$0xff]  }
 0x464   :  { %10975 = vmatpush3.bf16.msra.mxu1 %v12383_v46  ;;  %v12431_v46 = vld [vmem:[#allocation14 + $0x320] sm:$0xff]  }
 0x465   :  { %8627 = vmatmul.mubr.bf16.vlgmr.msra.gmra.mxu0 %v4351_v53  ;;  %11004 = vmatprep.subr.bf16.mxu1 %v12386_v49  ;;  %v12433_v49 = vld [vmem:[#allocation14 + $0x3a0] sm:$0xff]   ;;  %v12438_v53 = vld [vmem:[#allocation14 + $0x350] sm:$0xff]  }
 0x466   :  { %10983 = vmatpush3.bf16.msra.mxu0 %v12385_v51  ;;  %8706 = vmatprep.mubr.bf16.mxu0 %v4356_v56  ;;  %v12436_v51 = vld [vmem:[#allocation14 + $0x3d8] sm:$0xff]   ;;  %v12440_v56 = vld [vmem:[#allocation14 + $0x3d0] sm:$0xff]  }
 0x467   :  { %8667 = vmatmul.mubr.bf16.vlgmr.msra.gmra.mxu1 %v4353_v57  ;;  %10984 = vmatprep.subr.bf16.mxu0 %v12389_v55  ;;  %v12437_v55 = vld [vmem:[#allocation14 + $0x398] sm:$0xff]   ;;  %v12442_v57 = vld [vmem:[#allocation14 + $0x348] sm:$0xff]  }
 0x468   :  { %11005 = vmatpush3.bf16.msra.mxu1 %v12387_v44  ;;  %8746 = vmatprep.mubr.bf16.mxu1 %v4358_v59  ;;  %v12439_v44 = vld [vmem:[#allocation14 + $0x310] sm:$0xff]  }
 0x469   :  { %11006 = vmatprep.subr.bf16.mxu1 %v12391_v6  ;;  %v3983_v6 = vld [vmem:[#allocation5 + $0x20] sm:$0xff]  ;;  %v12441_v59 = vld [vmem:[#allocation14 + $0x390] sm:$0xff]  }
 0x46a   :  { %10985 = vmatpush3.bf16.msra.mxu0 %v12390_v60  ;;  %v12444_v60 = vld [vmem:[#allocation14 + $0x3c8] sm:$0xff]  }
 0x46b   :  { %10986 = vmatprep.subr.bf16.mxu0 %v12393_v61  ;;  %v12443_v61 = vld [vmem:[#allocation14 + $0x308] sm:$0xff]  }
 0x46c   :  { %11007 = vmatpush3.bf16.msra.mxu1 %v12392_v62  ;;  %v4079_v62 = vcombine.high %v3983_v6, %v3983_v6 }
 0x46d   :  { %11008 = vmatprep.subr.bf16.mxu1 %v12395_v63  ;;  %v12446_v63 = vld [vmem:[#allocation14 + $0x340] sm:$0xff]  }
 0x46e   :  { %10987 = vmatpush3.bf16.msra.mxu0 %v12394_v2  ;;  %v12445_v2 = vld [vmem:[#allocation14 + $0x388] sm:$0xff]  }
 0x46f   :  { %10988 = vmatprep.subr.bf16.mxu0 %v12397_v3  ;;  %v13388_v3 = vrot.slane %v3983_v6, %v13329_v52  ;;  %v12486_v6 = vld [vmem:[#allocation14 + $0x5b8] sm:$0xff]  }
 0x470   :  { %11009 = vmatpush3.bf16.msra.mxu1 %v12396_v0  ;;  %v12448_v0 = vld [vmem:[#allocation14 + $0x3c0] sm:$0xff]  }
 0x471   :  { %11010 = vmatprep.subr.bf16.mxu1 %v12399_v5  ;;  %v12447_v5 = vld [vmem:[#allocation14 + $0x300] sm:$0xff]  }
 0x472   :  { %10989 = vmatpush3.bf16.msra.mxu0 %v12398_v12  ;;  %v13391_v12 = vrot.slane %v4079_v62, %v13329_v52  ;;  %v12489_v62 = vld [vmem:[#allocation14 + $0x530] sm:$0xff]  }
 0x473   :  { %10990 = vmatprep.subr.bf16.mxu0 %v12401_v7  ;;  %v12450_v7 = vld [vmem:[#allocation14 + $0x478] sm:$0xff]  }
 0x474   :  { %11011 = vmatpush3.bf16.msra.mxu1 %v12400_v54  ;;  %v12449_v54 = vld [vmem:[#allocation14 + $0x380] sm:$0xff]  }
 0x475   :  { %11012 = vmatprep.subr.bf16.mxu1 %v12403_v8  ;;  %v4094_v8 = vcombine.high %v13388_v3, %v13388_v3 }
 0x476   :  { %10991 = vmatpush3.bf16.msra.mxu0 %v12402_v4  ;;  %v12452_v4 = vld [vmem:[#allocation14 + $0x4f8] sm:$0xff]  }
 0x477   :  { %10992 = vmatprep.subr.bf16.mxu0 %v12405_v9  ;;  %v12451_v9 = vld [vmem:[#allocation14 + $0x438] sm:$0xff]  }
 0x478   :  { %11013 = vmatpush3.bf16.msra.mxu1 %v12404_v10  ;;  %v4095_v10 = vcombine.high %v13391_v12, %v13391_v12 }
 0x479   :  { %11014 = vmatprep.subr.bf16.mxu1 %v12407_v58  ;;  %v4359_v58 = vpack.c.bf16 %v13374_v22, %v13374_v22  ;;  %v12461_v22 = vld [vmem:[#allocation14 + $0x4e8] sm:$0xff]  }
 0x47a   :  { %10993 = vmatpush3.bf16.msra.mxu0 %v12406_v11  ;;  %v12455_v11 = vld [vmem:[#allocation14 + $0x470] sm:$0xff]  }
 0x47b   :  { %10994 = vmatprep.subr.bf16.mxu0 %v12409_v13  ;;  %v4364_v13 = vpack.c.bf16 %v4094_v8, %v4094_v8  ;;  %v12500_v8 = vld [vmem:[#allocation14 + $0x558] sm:$0xff]  }
 0x47c   :  { %11015 = vmatpush3.bf16.msra.mxu1 %v12408_v15  ;;  %v4361_v15 = vpack.c.bf16 %v13377_v17, %v13377_v17  ;;  %v12462_v17 = vld [vmem:[#allocation14 + $0x4a8] sm:$0xff]  }
 0x47d   :  { %11016 = vmatprep.subr.bf16.mxu1 %v12411_v16  ;;  %v12457_v16 = vld [vmem:[#allocation14 + $0x4f0] sm:$0xff]  }
 0x47e   :  { %10995 = vmatpush3.bf16.msra.mxu0 %v12410_v18  ;;  %v4366_v18 = vpack.c.bf16 %v4095_v10, %v4095_v10  ;;  %v12501_v10 = vld [vmem:[#allocation14 + $0x518] sm:$0xff]  }
 0x47f   :  { %10996 = vmatprep.subr.bf16.mxu0 %v12413_v20  ;;  %v12459_v20 = vld [vmem:[#allocation14 + $0x468] sm:$0xff]  }
 0x480   :  { %11017 = vmatpush3.bf16.msra.mxu1 %v12412_v21  ;;  %v12458_v21 = vld [vmem:[#allocation14 + $0x4b0] sm:$0xff]  }
 0x481   :  { %11018 = vmatprep.subr.bf16.mxu1 %v12415_v23  ;;  %v12460_v23 = vld [vmem:[#allocation14 + $0x428] sm:$0xff]  }
 0x482   :  { %10997 = vmatpush3.bf16.msra.mxu0 %v12414_v24  ;;  %v12463_v24 = vld [vmem:[#allocation14 + $0x460] sm:$0xff]  }
 0x483   :  { %11026 = vmatprep.subr.bf16.mxu0 %v12417_v25  ;;  %v12465_v25 = vld [vmem:[#allocation14 + $0x4e0] sm:$0xff]  }
 0x484   :  { %11019 = vmatpush3.bf16.msra.mxu1 %v12416_v26  ;;  %v12464_v26 = vld [vmem:[#allocation14 + $0x420] sm:$0xff]  }
 0x485   :  { %8707 = vmatmul.mubr.bf16.vlgmr.msra.gmra.mxu0 %v4355_v33  ;;  %11048 = vmatprep.subr.bf16.mxu1 %v12419_v28  ;;  %v12466_v28 = vld [vmem:[#allocation14 + $0x4a0] sm:$0xff]   ;;  %v12471_v33 = vld [vmem:[#allocation14 + $0x450] sm:$0xff]  }
 0x486   :  { %11027 = vmatpush3.bf16.msra.mxu0 %v12418_v30  ;;  %8786 = vmatprep.mubr.bf16.mxu0 %v4360_v35  ;;  %v12469_v30 = vld [vmem:[#allocation14 + $0x4d8] sm:$0xff]   ;;  %v12473_v35 = vld [vmem:[#allocation14 + $0x4d0] sm:$0xff]  }
 0x487   :  { %8747 = vmatmul.mubr.bf16.vlgmr.msra.gmra.mxu1 %v4357_v39  ;;  %11028 = vmatprep.subr.bf16.mxu0 %v12422_v34  ;;  %v12470_v34 = vld [vmem:[#allocation14 + $0x498] sm:$0xff]   ;;  %v12475_v39 = vld [vmem:[#allocation14 + $0x448] sm:$0xff]  }
 0x488   :  { %11049 = vmatpush3.bf16.msra.mxu1 %v12420_v38  ;;  %8826 = vmatprep.mubr.bf16.mxu1 %v4362_v29  ;;  %v12472_v38 = vld [vmem:[#allocation14 + $0x410] sm:$0xff]  }
 0x489   :  { %11050 = vmatprep.subr.bf16.mxu1 %v12424_v37  ;;  %v3984_v37 = vld [vmem:[#allocation5 + $0x28] sm:$0xff]  ;;  %v12474_v29 = vld [vmem:[#allocation14 + $0x490] sm:$0xff]  }
 0x48a   :  { %11029 = vmatpush3.bf16.msra.mxu0 %v12423_v40  ;;  %v12477_v40 = vld [vmem:[#allocation14 + $0x4c8] sm:$0xff]  }
 0x48b   :  { %11030 = vmatprep.subr.bf16.mxu0 %v12426_v48  ;;  %v12476_v48 = vld [vmem:[#allocation14 + $0x408] sm:$0xff]  }
 0x48c   :  { %11051 = vmatpush3.bf16.msra.mxu1 %v12425_v41  ;;  %v4096_v41 = vcombine.high %v3984_v37, %v3984_v37 }
 0x48d   :  { %11052 = vmatprep.subr.bf16.mxu1 %v12428_v32  ;;  %v12479_v32 = vld [vmem:[#allocation14 + $0x440] sm:$0xff]  }
 0x48e   :  { %11031 = vmatpush3.bf16.msra.mxu0 %v12427_v36  ;;  %v12478_v36 = vld [vmem:[#allocation14 + $0x488] sm:$0xff]  }
 0x48f   :  { %11032 = vmatprep.subr.bf16.mxu0 %v12430_v43  ;;  %v13402_v43 = vrot.slane %v3984_v37, %v13329_v52  ;;  %v12519_v37 = vld [vmem:[#allocation14 + $0x6b8] sm:$0xff]  }
 0x490   :  { %11053 = vmatpush3.bf16.msra.mxu1 %v12429_v19  ;;  %v12481_v19 = vld [vmem:[#allocation14 + $0x4c0] sm:$0xff]  }
 0x491   :  { %11054 = vmatprep.subr.bf16.mxu1 %v12432_v45  ;;  %v12480_v45 = vld [vmem:[#allocation14 + $0x400] sm:$0xff]  }
 0x492   :  { %11033 = vmatpush3.bf16.msra.mxu0 %v12431_v46  ;;  %v13405_v46 = vrot.slane %v4096_v41, %v13329_v52  ;;  %v12522_v41 = vld [vmem:[#allocation14 + $0x630] sm:$0xff]  }
 0x493   :  { %11034 = vmatprep.subr.bf16.mxu0 %v12434_v47  ;;  %v12483_v47 = vld [vmem:[#allocation14 + $0x578] sm:$0xff]  }
 0x494   :  { %11055 = vmatpush3.bf16.msra.mxu1 %v12433_v49  ;;  %v12482_v49 = vld [vmem:[#allocation14 + $0x480] sm:$0xff]  }
 0x495   :  { %11056 = vmatprep.subr.bf16.mxu1 %v12436_v51  ;;  %v4111_v51 = vcombine.high %v13402_v43, %v13402_v43 }
 0x496   :  { %11035 = vmatpush3.bf16.msra.mxu0 %v12435_v50  ;;  %v12485_v50 = vld [vmem:[#allocation14 + $0x5f8] sm:$0xff]  }
 0x497   :  { %11036 = vmatprep.subr.bf16.mxu0 %v12438_v53  ;;  %v12484_v53 = vld [vmem:[#allocation14 + $0x538] sm:$0xff]  }
 0x498   :  { %11057 = vmatpush3.bf16.msra.mxu1 %v12437_v55  ;;  %v4112_v55 = vcombine.high %v13405_v46, %v13405_v46 }
 0x499   :  { %11058 = vmatprep.subr.bf16.mxu1 %v12440_v56  ;;  %v4363_v56 = vpack.c.bf16 %v13388_v3, %v13388_v3  ;;  %v12494_v3 = vld [vmem:[#allocation14 + $0x5e8] sm:$0xff]  }
 0x49a   :  { %11037 = vmatpush3.bf16.msra.mxu0 %v12439_v44  ;;  %v12488_v44 = vld [vmem:[#allocation14 + $0x570] sm:$0xff]  }
 0x49b   :  { %11038 = vmatprep.subr.bf16.mxu0 %v12442_v57  ;;  %v4368_v57 = vpack.c.bf16 %v4111_v51, %v4111_v51  ;;  %v12533_v51 = vld [vmem:[#allocation14 + $0x658] sm:$0xff]  }
 0x49c   :  { %11059 = vmatpush3.bf16.msra.mxu1 %v12441_v59  ;;  %v4365_v59 = vpack.c.bf16 %v13391_v12, %v13391_v12  ;;  %v12495_v12 = vld [vmem:[#allocation14 + $0x5a8] sm:$0xff]  }
 0x49d   :  { %11060 = vmatprep.subr.bf16.mxu1 %v12444_v60  ;;  %v12490_v60 = vld [vmem:[#allocation14 + $0x5f0] sm:$0xff]  }
 0x49e   :  { %11039 = vmatpush3.bf16.msra.mxu0 %v12443_v61  ;;  %v4370_v61 = vpack.c.bf16 %v4112_v55, %v4112_v55  ;;  %v12534_v55 = vld [vmem:[#allocation14 + $0x618] sm:$0xff]  }
 0x49f   :  { %11040 = vmatprep.subr.bf16.mxu0 %v12446_v63  ;;  %v12492_v63 = vld [vmem:[#allocation14 + $0x568] sm:$0xff]  }
 0x4a0   :  { %11061 = vmatpush3.bf16.msra.mxu1 %v12445_v2  ;;  %v12491_v2 = vld [vmem:[#allocation14 + $0x5b0] sm:$0xff]  }
 0x4a1   :  { %11062 = vmatprep.subr.bf16.mxu1 %v12448_v0  ;;  %v12493_v0 = vld [vmem:[#allocation14 + $0x528] sm:$0xff]  }
 0x4a2   :  { %11041 = vmatpush3.bf16.msra.mxu0 %v12447_v5  ;;  %v12496_v5 = vld [vmem:[#allocation14 + $0x560] sm:$0xff]  }
 0x4a3   :  { %11070 = vmatprep.subr.bf16.mxu0 %v12450_v7  ;;  %v12498_v7 = vld [vmem:[#allocation14 + $0x5e0] sm:$0xff]  }
 0x4a4   :  { %11063 = vmatpush3.bf16.msra.mxu1 %v12449_v54  ;;  %v12497_v54 = vld [vmem:[#allocation14 + $0x520] sm:$0xff]  }
 0x4a5   :  { %8787 = vmatmul.mubr.bf16.vlgmr.msra.gmra.mxu0 %v4359_v58  ;;  %11092 = vmatprep.subr.bf16.mxu1 %v12452_v4  ;;  %v12499_v4 = vld [vmem:[#allocation14 + $0x5a0] sm:$0xff]   ;;  %v12504_v58 = vld [vmem:[#allocation14 + $0x550] sm:$0xff]  }
 0x4a6   :  { %11071 = vmatpush3.bf16.msra.mxu0 %v12451_v9  ;;  %8866 = vmatprep.mubr.bf16.mxu0 %v4364_v13  ;;  %v12502_v9 = vld [vmem:[#allocation14 + $0x5d8] sm:$0xff]   ;;  %v12506_v13 = vld [vmem:[#allocation14 + $0x5d0] sm:$0xff]  }
 0x4a7   :  { %8827 = vmatmul.mubr.bf16.vlgmr.msra.gmra.mxu1 %v4361_v15  ;;  %11072 = vmatprep.subr.bf16.mxu0 %v12455_v11  ;;  %v12503_v11 = vld [vmem:[#allocation14 + $0x598] sm:$0xff]   ;;  %v12508_v15 = vld [vmem:[#allocation14 + $0x548] sm:$0xff]  }
 0x4a8   :  { %11093 = vmatpush3.bf16.msra.mxu1 %v12453_v14  ;;  %8906 = vmatprep.mubr.bf16.mxu1 %v4366_v18  ;;  %v12505_v14 = vld [vmem:[#allocation14 + $0x510] sm:$0xff]  }
 0x4a9   :  { %11094 = vmatprep.subr.bf16.mxu1 %v12457_v16  ;;  %v3985_v16 = vld [vmem:[#allocation5 + $0x30] sm:$0xff] }
 0x4aa   :  { %11073 = vmatpush3.bf16.msra.mxu0 %v12456_v42  ;;  %v12507_v18 = vld [vmem:[#allocation14 + $0x590] sm:$0xff]   ;;  %v12510_v42 = vld [vmem:[#allocation14 + $0x5c8] sm:$0xff]  }
 0x4ab   :  { %11074 = vmatprep.subr.bf16.mxu0 %v12459_v20  ;;  %v12509_v20 = vld [vmem:[#allocation14 + $0x508] sm:$0xff]  }
 0x4ac   :  { %11095 = vmatpush3.bf16.msra.mxu1 %v12458_v21  ;;  %v4113_v21 = vcombine.high %v3985_v16, %v3985_v16 }
 0x4ad   :  { %11096 = vmatprep.subr.bf16.mxu1 %v12461_v22  ;;  %v12512_v22 = vld [vmem:[#allocation14 + $0x540] sm:$0xff]  }
 0x4ae   :  { %11075 = vmatpush3.bf16.msra.mxu0 %v12460_v23  ;;  %v12511_v23 = vld [vmem:[#allocation14 + $0x588] sm:$0xff]  }
 0x4af   :  { %11076 = vmatprep.subr.bf16.mxu0 %v12463_v24  ;;  %v13416_v24 = vrot.slane %v3985_v16, %v13329_v52  ;;  %v12552_v16 = vld [vmem:[#allocation14 + $0x7b8] sm:$0xff]  }
 0x4b0   :  { %11097 = vmatpush3.bf16.msra.mxu1 %v12462_v17  ;;  %v12514_v17 = vld [vmem:[#allocation14 + $0x5c0] sm:$0xff]  }
 0x4b1   :  { %11098 = vmatprep.subr.bf16.mxu1 %v12465_v25  ;;  %v12513_v25 = vld [vmem:[#allocation14 + $0x500] sm:$0xff]  }
 0x4b2   :  { %11077 = vmatpush3.bf16.msra.mxu0 %v12464_v26  ;;  %v13419_v26 = vrot.slane %v4113_v21, %v13329_v52 }
 0x4b3   :  { %11078 = vmatprep.subr.bf16.mxu0 %v12467_v27  ;;  %v12516_v27 = vld [vmem:[#allocation14 + $0x678] sm:$0xff]  }
 0x4b4   :  { %11099 = vmatpush3.bf16.msra.mxu1 %v12466_v28  ;;  %v12515_v28 = vld [vmem:[#allocation14 + $0x580] sm:$0xff]  }
 0x4b5   :  { %11100 = vmatprep.subr.bf16.mxu1 %v12469_v30  ;;  %v4128_v30 = vcombine.high %v13416_v24, %v13416_v24 }
 0x4b6   :  { %11079 = vmatpush3.bf16.msra.mxu0 %v12468_v31  ;;  %v12518_v31 = vld [vmem:[#allocation14 + $0x6f8] sm:$0xff]  }
 0x4b7   :  { %11080 = vmatprep.subr.bf16.mxu0 %v12471_v33  ;;  %v12517_v33 = vld [vmem:[#allocation14 + $0x638] sm:$0xff]  }
 0x4b8   :  { %11101 = vmatpush3.bf16.msra.mxu1 %v12470_v34  ;;  %v4129_v34 = vcombine.high %v13419_v26, %v13419_v26 }
 0x4b9   :  { %11102 = vmatprep.subr.bf16.mxu1 %v12473_v35  ;;  %v4367_v35 = vpack.c.bf16 %v13402_v43, %v13402_v43  ;;  %v12527_v43 = vld [vmem:[#allocation14 + $0x6e8] sm:$0xff]  }
 0x4ba   :  { %11081 = vmatpush3.bf16.msra.mxu0 %v12472_v38  ;;  %v12521_v38 = vld [vmem:[#allocation14 + $0x670] sm:$0xff]  }
 0x4bb   :  { %11082 = vmatprep.subr.bf16.mxu0 %v12475_v39  ;;  %v4372_v39 = vpack.c.bf16 %v4128_v30, %v4128_v30 }
 0x4bc   :  { %11103 = vmatpush3.bf16.msra.mxu1 %v12474_v29  ;;  %v4369_v29 = vpack.c.bf16 %v13405_v46, %v13405_v46  ;;  %v12528_v46 = vld [vmem:[#allocation14 + $0x6a8] sm:$0xff]  }
 0x4bd   :  { %11104 = vmatprep.subr.bf16.mxu1 %v12477_v40  ;;  %v12523_v40 = vld [vmem:[#allocation14 + $0x6f0] sm:$0xff]  }
 0x4be   :  { %11083 = vmatpush3.bf16.msra.mxu0 %v12476_v48  ;;  %v4374_v48 = vpack.c.bf16 %v4129_v34, %v4129_v34 }
 0x4bf   :  { %11084 = vmatprep.subr.bf16.mxu0 %v12479_v32  ;;  %v12525_v32 = vld [vmem:[#allocation14 + $0x668] sm:$0xff]  }
 0x4c0   :  { %11105 = vmatpush3.bf16.msra.mxu1 %v12478_v36  ;;  %v12524_v36 = vld [vmem:[#allocation14 + $0x6b0] sm:$0xff]  }
 0x4c1   :  { %11106 = vmatprep.subr.bf16.mxu1 %v12481_v19  ;;  %v12526_v19 = vld [vmem:[#allocation14 + $0x628] sm:$0xff]  }
 0x4c2   :  { %11085 = vmatpush3.bf16.msra.mxu0 %v12480_v45  ;;  %v12529_v45 = vld [vmem:[#allocation14 + $0x660] sm:$0xff]  }
 0x4c3   :  { %11114 = vmatprep.subr.bf16.mxu0 %v12483_v47  ;;  %v12531_v47 = vld [vmem:[#allocation14 + $0x6e0] sm:$0xff]  }
 0x4c4   :  { %11107 = vmatpush3.bf16.msra.mxu1 %v12482_v49  ;;  %v12530_v49 = vld [vmem:[#allocation14 + $0x620] sm:$0xff]  }
 0x4c5   :  { %8867 = vmatmul.mubr.bf16.vlgmr.msra.gmra.mxu0 %v4363_v56  ;;  %11136 = vmatprep.subr.bf16.mxu1 %v12485_v50  ;;  %v12532_v50 = vld [vmem:[#allocation14 + $0x6a0] sm:$0xff]   ;;  %v12537_v56 = vld [vmem:[#allocation14 + $0x650] sm:$0xff]  }
 0x4c6   :  { %11115 = vmatpush3.bf16.msra.mxu0 %v12484_v53  ;;  %8946 = vmatprep.mubr.bf16.mxu0 %v4368_v57  ;;  %v12535_v53 = vld [vmem:[#allocation14 + $0x6d8] sm:$0xff]   ;;  %v12539_v57 = vld [vmem:[#allocation14 + $0x6d0] sm:$0xff]  }
 0x4c7   :  { %8907 = vmatmul.mubr.bf16.vlgmr.msra.gmra.mxu1 %v4365_v59  ;;  %11116 = vmatprep.subr.bf16.mxu0 %v12488_v44  ;;  %v12536_v44 = vld [vmem:[#allocation14 + $0x698] sm:$0xff]   ;;  %v12541_v59 = vld [vmem:[#allocation14 + $0x648] sm:$0xff]  }
 0x4c8   :  { %11137 = vmatpush3.bf16.msra.mxu1 %v12486_v6  ;;  %8986 = vmatprep.mubr.bf16.mxu1 %v4370_v61  ;;  %v12538_v6 = vld [vmem:[#allocation14 + $0x610] sm:$0xff]  }
 0x4c9   :  { %11138 = vmatprep.subr.bf16.mxu1 %v12490_v60  ;;  %v3986_v60 = vld [vmem:[#allocation5 + $0x38] sm:$0xff] }
 0x4ca   :  { %11117 = vmatpush3.bf16.msra.mxu0 %v12489_v62  ;;  %v12540_v61 = vld [vmem:[#allocation14 + $0x690] sm:$0xff]   ;;  %v12543_v62 = vld [vmem:[#allocation14 + $0x6c8] sm:$0xff]  }
 0x4cb   :  { %11118 = vmatprep.subr.bf16.mxu0 %v12492_v63  ;;  %v12542_v63 = vld [vmem:[#allocation14 + $0x608] sm:$0xff]  }
 0x4cc   :  { %11139 = vmatpush3.bf16.msra.mxu1 %v12491_v2  ;;  %v4130_v2 = vcombine.high %v3986_v60, %v3986_v60 }
 0x4cd   :  { %11140 = vmatprep.subr.bf16.mxu1 %v12494_v3  ;;  %v12545_v3 = vld [vmem:[#allocation14 + $0x640] sm:$0xff]  }
 0x4ce   :  { %11119 = vmatpush3.bf16.msra.mxu0 %v12493_v0  ;;  %v12544_v0 = vld [vmem:[#allocation14 + $0x688] sm:$0xff]  }
 0x4cf   :  { %11120 = vmatprep.subr.bf16.mxu0 %v12496_v5  ;;  %v13430_v5 = vrot.slane %v3986_v60, %v13329_v52 }
 0x4d0   :  { %11141 = vmatpush3.bf16.msra.mxu1 %v12495_v12  ;;  %v12547_v12 = vld [vmem:[#allocation14 + $0x6c0] sm:$0xff]  }
 0x4d1   :  { %11142 = vmatprep.subr.bf16.mxu1 %v12498_v7  ;;  %v12546_v7 = vld [vmem:[#allocation14 + $0x600] sm:$0xff]  }
 0x4d2   :  { %11121 = vmatpush3.bf16.msra.mxu0 %v12497_v54  ;;  %v13433_v54 = vrot.slane %v4130_v2, %v13329_v52  ;;  %v12582_v2 = vld [vmem:[#allocation14 + $0x878] sm:$0xff]  }
 0x4d3   :  { %11122 = vmatprep.subr.bf16.mxu0 %v12500_v8  ;;  %v12549_v8 = vld [vmem:[#allocation14 + $0x778] sm:$0xff]  }
 0x4d4   :  { %11143 = vmatpush3.bf16.msra.mxu1 %v12499_v4  ;;  %v12548_v4 = vld [vmem:[#allocation14 + $0x680] sm:$0xff]  }
 0x4d5   :  { %11144 = vmatprep.subr.bf16.mxu1 %v12502_v9  ;;  %v4145_v9 = vcombine.high %v13430_v5, %v13430_v5 }
 0x4d6   :  { %11123 = vmatpush3.bf16.msra.mxu0 %v12501_v10  ;;  %v12551_v10 = vld [vmem:[#allocation14 + $0x7f8] sm:$0xff]  }
 0x4d7   :  { %11124 = vmatprep.subr.bf16.mxu0 %v12504_v58  ;;  %v12550_v58 = vld [vmem:[#allocation14 + $0x738] sm:$0xff]  }
 0x4d8   :  { %11145 = vmatpush3.bf16.msra.mxu1 %v12503_v11  ;;  %v4146_v11 = vcombine.high %v13433_v54, %v13433_v54 }
 0x4d9   :  { %11146 = vmatprep.subr.bf16.mxu1 %v12506_v13  ;;  %v4371_v13 = vpack.c.bf16 %v13416_v24, %v13416_v24 }
 0x4da   :  { %11125 = vmatpush3.bf16.msra.mxu0 %v12505_v14  ;;  %v12554_v14 = vld [vmem:[#allocation14 + $0x770] sm:$0xff]   ;;  %v4378_v21 = vpack.c.bf16 %v4146_v11, %v4146_v11 }
 0x4db   :  { %11126 = vmatprep.subr.bf16.mxu0 %v12508_v15  ;;  %v4376_v15 = vpack.c.bf16 %v4145_v9, %v4145_v9  ;;  %v12587_v9 = vld [vmem:[#allocation14 + $0x870] sm:$0xff]  }
 0x4dc   :  { %11147 = vmatpush3.bf16.msra.mxu1 %v12507_v18 }
 0x4dd   :  { %11148 = vmatprep.subr.bf16.mxu1 %v12510_v42  ;;  %v4373_v42 = vpack.c.bf16 %v13419_v26, %v13419_v26  ;;  %v12560_v26 = vld [vmem:[#allocation14 + $0x7e8] sm:$0xff]  }
 0x4de   :  { %11127 = vmatpush3.bf16.msra.mxu0 %v12509_v20  ;;  %v12556_v20 = vld [vmem:[#allocation14 + $0x7f0] sm:$0xff]  }
 0x4df   :  { %11128 = vmatprep.subr.bf16.mxu0 %v12512_v22  ;;  %v12555_v22 = vld [vmem:[#allocation14 + $0x730] sm:$0xff]  }
 0x4e0   :  { %11149 = vmatpush3.bf16.msra.mxu1 %v12511_v23  ;;  %v10380_v23 = vld [vmem:[#allocation15] ss:$0 sm:$0xff] }
 0x4e1   :  { %11150 = vmatprep.subr.bf16.mxu1 %v12514_v17 }
 0x4e2   :  { %11129 = vmatpush3.bf16.msra.mxu0 %v12513_v25  ;;  %v12558_v25 = vld [vmem:[#allocation14 + $0x768] sm:$0xff]  }
 0x4e3   :  { %11158 = vmatprep.subr.bf16.mxu0 %v12516_v27 }
 0x4e4   :  { %11151 = vmatpush3.bf16.msra.mxu1 %v12515_v28  ;;  %v12557_v28 = vld [vmem:[#allocation14 + $0x7b0] sm:$0xff]  }
 0x4e5   :  { %8947 = vmatmul.mubr.bf16.vlgmr.msra.gmra.mxu0 %v4367_v35  ;;  %11180 = vmatprep.subr.bf16.mxu1 %v12518_v31  ;;  %v12559_v35 = vld [vmem:[#allocation14 + $0x728] sm:$0xff]  }
 0x4e6   :  { %11159 = vmatpush3.bf16.msra.mxu0 %v12517_v33  ;;  %9026 = vmatprep.mubr.bf16.mxu0 %v4372_v39 }
 0x4e7   :  { %8987 = vmatmul.mubr.bf16.vlgmr.msra.gmra.mxu1 %v4369_v29  ;;  %11160 = vmatprep.subr.bf16.mxu0 %v12521_v38 }
 0x4e8   :  { %11181 = vmatpush3.bf16.msra.mxu1 %v12519_v37  ;;  %9066 = vmatprep.mubr.bf16.mxu1 %v4374_v48  ;;  %v12562_v37 = vld [vmem:[#allocation14 + $0x760] sm:$0xff]  }
 0x4e9   :  { %11182 = vmatprep.subr.bf16.mxu1 %v12523_v40  ;;  %v12561_v40 = vld [vmem:[#allocation14 + $0x7a8] sm:$0xff]  }
 0x4ea   :  { %11161 = vmatpush3.bf16.msra.mxu0 %v12522_v41  ;;  %v12564_v41 = vld [vmem:[#allocation14 + $0x7e0] sm:$0xff]  }
 0x4eb   :  { %11162 = vmatprep.subr.bf16.mxu0 %v12525_v32  ;;  %v12563_v32 = vld [vmem:[#allocation14 + $0x720] sm:$0xff]  }
 0x4ec   :  { %11183 = vmatpush3.bf16.msra.mxu1 %v12524_v36  ;;  %v12566_v36 = vld [vmem:[#allocation14 + $0x758] sm:$0xff]  }
 0x4ed   :  { %11184 = vmatprep.subr.bf16.mxu1 %v12527_v43  ;;  %v12565_v43 = vld [vmem:[#allocation14 + $0x7a0] sm:$0xff]  }
 0x4ee   :  { %11163 = vmatpush3.bf16.msra.mxu0 %v12526_v19  ;;  %v12568_v19 = vld [vmem:[#allocation14 + $0x7d8] sm:$0xff]  }
 0x4ef   :  { %11164 = vmatprep.subr.bf16.mxu0 %v12529_v45  ;;  %v12567_v45 = vld [vmem:[#allocation14 + $0x718] sm:$0xff]  }
 0x4f0   :  { %11185 = vmatpush3.bf16.msra.mxu1 %v12528_v46  ;;  %v12570_v46 = vld [vmem:[#allocation14 + $0x750] sm:$0xff]  }
 0x4f1   :  { %11186 = vmatprep.subr.bf16.mxu1 %v12531_v47  ;;  %v12569_v47 = vld [vmem:[#allocation14 + $0x798] sm:$0xff]  }
 0x4f2   :  { %11165 = vmatpush3.bf16.msra.mxu0 %v12530_v49  ;;  %v12572_v49 = vld [vmem:[#allocation14 + $0x7d0] sm:$0xff]  }
 0x4f3   :  { %11166 = vmatprep.subr.bf16.mxu0 %v12533_v51  ;;  %v12571_v51 = vld [vmem:[#allocation14 + $0x710] sm:$0xff]  }
 0x4f4   :  { %11187 = vmatpush3.bf16.msra.mxu1 %v12532_v50  ;;  %v12574_v50 = vld [vmem:[#allocation14 + $0x748] sm:$0xff]  }
 0x4f5   :  { %11188 = vmatprep.subr.bf16.mxu1 %v12535_v53  ;;  %v3987_v53 = vld [vmem:[#allocation5 + $0x40] sm:$0xff] }
 0x4f6   :  { %11167 = vmatpush3.bf16.msra.mxu0 %v12534_v55  ;;  %v12573_v55 = vld [vmem:[#allocation14 + $0x790] sm:$0xff]   ;;  %v13446_v60 = vrot.slane %v3987_v53, %v13329_v52 }
 0x4f7   :  { %11168 = vmatprep.subr.bf16.mxu0 %v12537_v56  ;;  %v12576_v56 = vld [vmem:[#allocation14 + $0x7c8] sm:$0xff]  }
 0x4f8   :  { %11189 = vmatpush3.bf16.msra.mxu1 %v12536_v44  ;;  %v12575_v44 = vld [vmem:[#allocation14 + $0x708] sm:$0xff]  }
 0x4f9   :  { %11190 = vmatprep.subr.bf16.mxu1 %v12539_v57  ;;  %v4147_v57 = vcombine.high %v3987_v53, %v3987_v53  ;;  %v12613_v53 = vld [vmem:[#allocation14 + $0x8c0] sm:$0xff]  }
 0x4fa   :  { %11169 = vmatpush3.bf16.msra.mxu0 %v12538_v6  ;;  %v12578_v6 = vld [vmem:[#allocation14 + $0x740] sm:$0xff]  }
 0x4fb   :  { %11170 = vmatprep.subr.bf16.mxu0 %v12541_v59  ;;  %v12577_v59 = vld [vmem:[#allocation14 + $0x788] sm:$0xff]  }
 0x4fc   :  { %11191 = vmatpush3.bf16.msra.mxu1 %v12540_v61  ;;  %v12580_v61 = vld [vmem:[#allocation14 + $0x7c0] sm:$0xff]  }
 0x4fd   :  { %11192 = vmatprep.subr.bf16.mxu1 %v12543_v62  ;;  %v12579_v62 = vld [vmem:[#allocation14 + $0x700] sm:$0xff]  }
 0x4fe   :  { %11171 = vmatpush3.bf16.msra.mxu0 %v12542_v63  ;;  %v13449_v63 = vrot.slane %v4147_v57, %v13329_v52  ;;  %v12614_v57 = vld [vmem:[#allocation14 + $0x880] sm:$0xff]  }
 0x4ff   :  { %11172 = vmatprep.subr.bf16.mxu0 %v12545_v3  ;;  %v12581_v3 = vld [vmem:[#allocation14 + $0x780] sm:$0xff]  }
 0x500   :  { %11193 = vmatpush3.bf16.msra.mxu1 %v12544_v0  ;;  %v4162_v0 = vcombine.high %v13446_v60, %v13446_v60 }
 0x501   :  { %11194 = vmatprep.subr.bf16.mxu1 %v12547_v12  ;;  %v12584_v12 = vld [vmem:[#allocation14 + $0x8f8] sm:$0xff]  }
 0x502   :  { %11173 = vmatpush3.bf16.msra.mxu0 %v12546_v7  ;;  %v12583_v7 = vld [vmem:[#allocation14 + $0x838] sm:$0xff]  }
 0x503   :  { %11202 = vmatprep.subr.bf16.mxu0 %v12549_v8  ;;  %v4163_v8 = vcombine.high %v13449_v63, %v13449_v63 }
 0x504   :  { %11195 = vmatpush3.bf16.msra.mxu1 %v12548_v4  ;;  %v4375_v4 = vpack.c.bf16 %v13430_v5, %v13430_v5  ;;  %v12591_v5 = vld [vmem:[#allocation14 + $0x868] sm:$0xff]  }
 0x505   :  { %9027 = vmatmul.mubr.bf16.vlgmr.msra.gmra.mxu0 %v4371_v13  ;;  %v10910_v18 = vpop.f32.mrf.mxu0  ;;  %11224 = vmatprep.subr.bf16.mxu1 %v12551_v10  ;;  %v4380_v10 = vpack.c.bf16 %v4162_v0, %v4162_v0  ;;  %v4377_v13 = vpack.c.bf16 %v13433_v54, %v13433_v54 }
 0x506   :  { %11203 = vmatpush3.bf16.msra.mxu0 %v12550_v58  ;;  %9106 = vmatprep.mubr.bf16.mxu0 %v4376_v15  ;;  %v12585_v58 = vld [vmem:[#allocation14 + $0x8b8] sm:$0xff]   ;;  %v4382_v15 = vpack.c.bf16 %v4163_v8, %v4163_v8  ;;  %v4381_v8 = vpack.c.bf16 %v13449_v63, %v13449_v63 }
 0x507   :  { %9067 = vmatmul.mubr.bf16.vlgmr.msra.gmra.mxu1 %v4373_v42  ;;  %v10911_v17 = vpop.f32.mrf.mxu0  ;;  %v10932_v24 = vpop.f32.mrf.mxu1  ;;  %11204 = vmatprep.subr.bf16.mxu0 %v12554_v14  ;;  %v12589_v14 = vld [vmem:[#allocation14 + $0x8f0] sm:$0xff]  }
 0x508   :  { %v10912_v27 = vadd.f32 %v10911_v17, %v10910_v18  ;;  %11225 = vmatpush3.bf16.msra.mxu1 %v12552_v16  ;;  %9146 = vmatprep.mubr.bf16.mxu1 %v4378_v21  ;;  %v12588_v16 = vld [vmem:[#allocation14 + $0x830] sm:$0xff]   ;;  %v12593_v17 = vld [vmem:[#allocation14 + $0x8e8] sm:$0xff]  }
 0x509   :  { %v10913_v30 = vpop.f32.mrf.mxu0  ;;  %v10933_v31 = vpop.f32.mrf.mxu1  ;;  %11226 = vmatprep.subr.bf16.mxu1 %v12556_v20  ;;  %v12590_v21 = vld [vmem:[#allocation14 + $0x8b0] sm:$0xff]  }
 0x50a   :  { %v8549_v33 = vadd.f32 %v10912_v27, %v10380_v23  ;;  %v10934_v34 = vadd.f32 %v10933_v31, %v10932_v24  ;;  %11205 = vmatpush3.bf16.msra.mxu0 %v12555_v22  ;;  %v12595_v30 = vld [vmem:[#allocation14 + $0x860] sm:$0xff]  }
 0x50b   :  { %v10914_v38 = vpop.f32.mrf.mxu0  ;;  %v10935_v39 = vpop.f32.mrf.mxu1  ;;  %11206 = vmatprep.subr.bf16.mxu0 %v12558_v25  ;;  %v12592_v25 = vld [vmem:[#allocation14 + $0x828] sm:$0xff]  }
 0x50c   :  { %v13443_v29 = vadd.f32 %v10934_v34, %v8549_v33  ;;  %11227 = vmatpush3.bf16.msra.mxu1 %v12557_v28  ;;  %v12597_v34 = vld [vmem:[#allocation14 + $0x8e0] sm:$0xff]   ;;  %v12599_v38 = vld [vmem:[#allocation14 + $0x858] sm:$0xff]  }
 0x50d   :  { %v10936_v48 = vpop.f32.mrf.mxu1  ;;  %11228 = vmatprep.subr.bf16.mxu1 %v12560_v26  ;;  %v12594_v26 = vld [vmem:[#allocation14 + $0x8a8] sm:$0xff]   ;;  %v12598_v39 = vld [vmem:[#allocation14 + $0x8a0] sm:$0xff]  }
 0x50e   :  { %11207 = vmatpush3.bf16.msra.mxu0 %v12559_v35  ;;  %v12596_v35 = vld [vmem:[#allocation14 + $0x820] sm:$0xff]   ;;  %v12602_v48 = vld [vmem:[#allocation14 + $0x898] sm:$0xff]  }
 0x50f   :  { %11208 = vmatprep.subr.bf16.mxu0 %v12562_v37  ;;  %v12601_v37 = vld [vmem:[#allocation14 + $0x8d8] sm:$0xff]  }
 0x510   :  { %11229 = vmatpush3.bf16.msra.mxu1 %v12561_v40  ;;  %v12603_v40 = vld [vmem:[#allocation14 + $0x850] sm:$0xff]  }
 0x511   :  { %11230 = vmatprep.subr.bf16.mxu1 %v12564_v41  ;;  %v12605_v41 = vld [vmem:[#allocation14 + $0x8d0] sm:$0xff]  }
 0x512   :  { %11209 = vmatpush3.bf16.msra.mxu0 %v12563_v32  ;;  %v12604_v32 = vld [vmem:[#allocation14 + $0x810] sm:$0xff]  }
 0x513   :  { %11210 = vmatprep.subr.bf16.mxu0 %v12566_v36  ;;  %v12607_v36 = vld [vmem:[#allocation14 + $0x848] sm:$0xff]  }
 0x514   :  { %11231 = vmatpush3.bf16.msra.mxu1 %v12565_v43  ;;  %v3988_v43 = vld [vmem:[#allocation5 + $0x48] sm:$0xff] }
 0x515   :  { %11232 = vmatprep.subr.bf16.mxu1 %v12568_v19  ;;  %v12606_v19 = vld [vmem:[#allocation14 + $0x890] sm:$0xff]  }
 0x516   :  { %11211 = vmatpush3.bf16.msra.mxu0 %v12567_v45  ;;  %v12609_v45 = vld [vmem:[#allocation14 + $0x8c8] sm:$0xff]  }
 0x517   :  { %11212 = vmatprep.subr.bf16.mxu0 %v12570_v46  ;;  %v12608_v46 = vld [vmem:[#allocation14 + $0x808] sm:$0xff]  }
 0x518   :  { %11233 = vmatpush3.bf16.msra.mxu1 %v12569_v47  ;;  %v4164_v47 = vcombine.high %v3988_v43, %v3988_v43 }
 0x519   :  { %11234 = vmatprep.subr.bf16.mxu1 %v12572_v49  ;;  %v12611_v49 = vld [vmem:[#allocation14 + $0x840] sm:$0xff]  }
 0x51a   :  { %11213 = vmatpush3.bf16.msra.mxu0 %v12571_v51  ;;  %v12610_v51 = vld [vmem:[#allocation14 + $0x888] sm:$0xff]  }
 0x51b   :  { %11214 = vmatprep.subr.bf16.mxu0 %v12574_v50  ;;  %v13463_v50 = vrot.slane %v3988_v43, %v13329_v52  ;;  %v12646_v43 = vld [vmem:[#allocation14 + $0x9c0] sm:$0xff]  }
 0x51c   :  { %11235 = vmatpush3.bf16.msra.mxu1 %v12573_v55  ;;  %v12612_v55 = vld [vmem:[#allocation14 + $0x800] sm:$0xff]  }
 0x51d   :  { %11236 = vmatprep.subr.bf16.mxu1 %v12576_v56  ;;  %v13466_v56 = vrot.slane %v4164_v47, %v13329_v52  ;;  %v12647_v47 = vld [vmem:[#allocation14 + $0x980] sm:$0xff]  }
 0x51e   :  { %11215 = vmatpush3.bf16.msra.mxu0 %v12575_v44  ;;  %v12615_v44 = vld [vmem:[#allocation14 + $0x978] sm:$0xff]  }
 0x51f   :  { %11216 = vmatprep.subr.bf16.mxu0 %v12578_v6  ;;  %v4179_v6 = vcombine.high %v13463_v50, %v13463_v50 }
 0x520   :  { %11237 = vmatpush3.bf16.msra.mxu1 %v12577_v59  ;;  %v12617_v59 = vld [vmem:[#allocation14 + $0x9f8] sm:$0xff]  }
 0x521   :  { %11238 = vmatprep.subr.bf16.mxu1 %v12580_v61  ;;  %v12616_v61 = vld [vmem:[#allocation14 + $0x938] sm:$0xff]   ;;  %v4384_v0 = vpack.c.bf16 %v4179_v6, %v4179_v6 }
 0x522   :  { %11217 = vmatpush3.bf16.msra.mxu0 %v12579_v62  ;;  %v4180_v62 = vcombine.high %v13466_v56, %v13466_v56 }
 0x523   :  { %11246 = vmatprep.subr.bf16.mxu0 %v12582_v2  ;;  %v4379_v2 = vpack.c.bf16 %v13446_v60, %v13446_v60  ;;  %v12624_v60 = vld [vmem:[#allocation14 + $0x968] sm:$0xff]  }
 0x524   :  { %11239 = vmatpush3.bf16.msra.mxu1 %v12581_v3  ;;  %v12620_v3 = vld [vmem:[#allocation14 + $0x970] sm:$0xff]  }
 0x525   :  { %v10954_v11 = vpop.f32.mrf.mxu0  ;;  %9107 = vmatmul.mubr.bf16.vlgmr.msra.gmra.mxu0 %v4375_v4  ;;  %11268 = vmatprep.subr.bf16.mxu1 %v12584_v12  ;;  %v12618_v12 = vld [vmem:[#allocation14 + $0x9b8] sm:$0xff]   ;;  %v12622_v4 = vld [vmem:[#allocation14 + $0x9f0] sm:$0xff]  }
 0x526   :  { %11247 = vmatpush3.bf16.msra.mxu0 %v12583_v7  ;;  %9186 = vmatprep.mubr.bf16.mxu0 %v4380_v10  ;;  %v12621_v10 = vld [vmem:[#allocation14 + $0x930] sm:$0xff]  }
 0x527   :  { %v10955_v18 = vpop.f32.mrf.mxu0  ;;  %v10976_v42 = vpop.f32.mrf.mxu1  ;;  %9147 = vmatmul.mubr.bf16.vlgmr.msra.gmra.mxu1 %v4377_v13  ;;  %11248 = vmatprep.subr.bf16.mxu0 %v12587_v9  ;;  %v4386_v9 = vpack.c.bf16 %v4180_v62, %v4180_v62  ;;  %v4385_v62 = vpack.c.bf16 %v13466_v56, %v13466_v56 }
 0x528   :  { %v10956_v20 = vadd.f32 %v10955_v18, %v10954_v11  ;;  %11269 = vmatpush3.bf16.msra.mxu1 %v12585_v58  ;;  %9226 = vmatprep.mubr.bf16.mxu1 %v4382_v15  ;;  %v12626_v18 = vld [vmem:[#allocation14 + $0x9e8] sm:$0xff]  }
 0x529   :  { %v10957_v22 = vpop.f32.mrf.mxu0  ;;  %v10977_v23 = vpop.f32.mrf.mxu1  ;;  %11270 = vmatprep.subr.bf16.mxu1 %v12589_v14  ;;  %v12623_v14 = vld [vmem:[#allocation14 + $0x9b0] sm:$0xff]  }
 0x52a   :  { %v8629_v54 = vadd.f32 %v10956_v20, %v13443_v29  ;;  %v10978_v24 = vadd.f32 %v10977_v23, %v10976_v42  ;;  %11249 = vmatpush3.bf16.msra.mxu0 %v12588_v16  ;;  %v12600_v29 = vld [vmem:[#allocation14 + $0x818] sm:$0xff]   ;;  %v12628_v22 = vld [vmem:[#allocation14 + $0x960] sm:$0xff]  }
 0x52b   :  { %v10958_v27 = vpop.f32.mrf.mxu0  ;;  %v10979_v28 = vpop.f32.mrf.mxu1  ;;  %11250 = vmatprep.subr.bf16.mxu0 %v12591_v5  ;;  %v12625_v5 = vld [vmem:[#allocation14 + $0x928] sm:$0xff]  }
 0x52c   :  { %v13460_v31 = vadd.f32 %v10978_v24, %v8629_v54  ;;  %11271 = vmatpush3.bf16.msra.mxu1 %v12590_v21  ;;  %v12630_v24 = vld [vmem:[#allocation14 + $0x9e0] sm:$0xff]   ;;  %v12632_v27 = vld [vmem:[#allocation14 + $0x958] sm:$0xff]  }
 0x52d   :  { %v10980_v33 = vpop.f32.mrf.mxu1  ;;  %11272 = vmatprep.subr.bf16.mxu1 %v12593_v17  ;;  %v12627_v17 = vld [vmem:[#allocation14 + $0x9a8] sm:$0xff]   ;;  %v12631_v28 = vld [vmem:[#allocation14 + $0x9a0] sm:$0xff]  }
 0x52e   :  { %11251 = vmatpush3.bf16.msra.mxu0 %v12592_v25  ;;  %v12629_v25 = vld [vmem:[#allocation14 + $0x920] sm:$0xff]   ;;  %v12635_v33 = vld [vmem:[#allocation14 + $0x998] sm:$0xff]  }
 0x52f   :  { %11252 = vmatprep.subr.bf16.mxu0 %v12595_v30  ;;  %v12634_v30 = vld [vmem:[#allocation14 + $0x9d8] sm:$0xff]  }
 0x530   :  { %11273 = vmatpush3.bf16.msra.mxu1 %v12594_v26  ;;  %v12636_v26 = vld [vmem:[#allocation14 + $0x950] sm:$0xff]  }
 0x531   :  { %11274 = vmatprep.subr.bf16.mxu1 %v12597_v34  ;;  %v12638_v34 = vld [vmem:[#allocation14 + $0x9d0] sm:$0xff]  }
 0x532   :  { %11253 = vmatpush3.bf16.msra.mxu0 %v12596_v35  ;;  %v12637_v35 = vld [vmem:[#allocation14 + $0x910] sm:$0xff]  }
 0x533   :  { %11254 = vmatprep.subr.bf16.mxu0 %v12599_v38  ;;  %v12640_v38 = vld [vmem:[#allocation14 + $0x948] sm:$0xff]  }
 0x534   :  { %11275 = vmatpush3.bf16.msra.mxu1 %v12598_v39  ;;  %v3989_v39 = vld [vmem:[#allocation5 + $0x50] sm:$0xff] }
 0x535   :  { %11276 = vmatprep.subr.bf16.mxu1 %v12601_v37  ;;  %v12639_v37 = vld [vmem:[#allocation14 + $0x990] sm:$0xff]  }
 0x536   :  { %11255 = vmatpush3.bf16.msra.mxu0 %v12600_v29  ;;  %v12642_v29 = vld [vmem:[#allocation14 + $0x9c8] sm:$0xff]  }
 0x537   :  { %11256 = vmatprep.subr.bf16.mxu0 %v12603_v40  ;;  %v12641_v40 = vld [vmem:[#allocation14 + $0x908] sm:$0xff]  }
 0x538   :  { %11277 = vmatpush3.bf16.msra.mxu1 %v12602_v48  ;;  %v4181_v48 = vcombine.high %v3989_v39, %v3989_v39 }
 0x539   :  { %11278 = vmatprep.subr.bf16.mxu1 %v12605_v41  ;;  %v12644_v41 = vld [vmem:[#allocation14 + $0x940] sm:$0xff]  }
 0x53a   :  { %11257 = vmatpush3.bf16.msra.mxu0 %v12604_v32  ;;  %v12643_v32 = vld [vmem:[#allocation14 + $0x988] sm:$0xff]  }
 0x53b   :  { %11258 = vmatprep.subr.bf16.mxu0 %v12607_v36  ;;  %v13480_v36 = vrot.slane %v3989_v39, %v13329_v52  ;;  %v12679_v39 = vld [vmem:[#allocation14 + $0xac0] sm:$0xff]  }
 0x53c   :  { %11279 = vmatpush3.bf16.msra.mxu1 %v12606_v19  ;;  %v12645_v19 = vld [vmem:[#allocation14 + $0x900] sm:$0xff]  }
 0x53d   :  { %11280 = vmatprep.subr.bf16.mxu1 %v12609_v45  ;;  %v13483_v45 = vrot.slane %v4181_v48, %v13329_v52  ;;  %v12680_v48 = vld [vmem:[#allocation14 + $0xa80] sm:$0xff]  }
 0x53e   :  { %11259 = vmatpush3.bf16.msra.mxu0 %v12608_v46  ;;  %v12648_v46 = vld [vmem:[#allocation14 + $0xa78] sm:$0xff]  }
 0x53f   :  { %11260 = vmatprep.subr.bf16.mxu0 %v12611_v49  ;;  %v4196_v49 = vcombine.high %v13480_v36, %v13480_v36 }
 0x540   :  { %11281 = vmatpush3.bf16.msra.mxu1 %v12610_v51  ;;  %v12650_v51 = vld [vmem:[#allocation14 + $0xaf8] sm:$0xff]  }
 0x541   :  { %11282 = vmatprep.subr.bf16.mxu1 %v12613_v53  ;;  %v12649_v53 = vld [vmem:[#allocation14 + $0xa38] sm:$0xff]   ;;  %v4388_v6 = vpack.c.bf16 %v4196_v49, %v4196_v49 }
 0x542   :  { %11261 = vmatpush3.bf16.msra.mxu0 %v12612_v55  ;;  %v4197_v55 = vcombine.high %v13483_v45, %v13483_v45 }
 0x543   :  { %11290 = vmatprep.subr.bf16.mxu0 %v12615_v44  ;;  %v4383_v44 = vpack.c.bf16 %v13463_v50, %v13463_v50  ;;  %v12657_v50 = vld [vmem:[#allocation14 + $0xa68] sm:$0xff]  }
 0x544   :  { %11283 = vmatpush3.bf16.msra.mxu1 %v12614_v57  ;;  %v12653_v57 = vld [vmem:[#allocation14 + $0xa70] sm:$0xff]  }
 0x545   :  { %v10998_v7 = vpop.f32.mrf.mxu0  ;;  %9187 = vmatmul.mubr.bf16.vlgmr.msra.gmra.mxu0 %v4379_v2  ;;  %11312 = vmatprep.subr.bf16.mxu1 %v12617_v59  ;;  %v12651_v59 = vld [vmem:[#allocation14 + $0xab8] sm:$0xff]   ;;  %v12655_v2 = vld [vmem:[#allocation14 + $0xaf0] sm:$0xff]  }
 0x546   :  { %11291 = vmatpush3.bf16.msra.mxu0 %v12616_v61  ;;  %9266 = vmatprep.mubr.bf16.mxu0 %v4384_v0  ;;  %v12654_v0 = vld [vmem:[#allocation14 + $0xa30] sm:$0xff]  }
 0x547   :  { %v10999_v58 = vpop.f32.mrf.mxu0  ;;  %v11020_v11 = vpop.f32.mrf.mxu1  ;;  %9227 = vmatmul.mubr.bf16.vlgmr.msra.gmra.mxu1 %v4381_v8  ;;  %11292 = vmatprep.subr.bf16.mxu0 %v12620_v3  ;;  %v4390_v3 = vpack.c.bf16 %v4197_v55, %v4197_v55  ;;  %v4389_v55 = vpack.c.bf16 %v13483_v45, %v13483_v45 }
 0x548   :  { %v11000_v13 = vadd.f32 %v10999_v58, %v10998_v7  ;;  %11313 = vmatpush3.bf16.msra.mxu1 %v12618_v12  ;;  %9306 = vmatprep.mubr.bf16.mxu1 %v4386_v9  ;;  %v12659_v58 = vld [vmem:[#allocation14 + $0xae8] sm:$0xff]  }
 0x549   :  { %v11001_v15 = vpop.f32.mrf.mxu0  ;;  %v11021_v16 = vpop.f32.mrf.mxu1  ;;  %11314 = vmatprep.subr.bf16.mxu1 %v12622_v4  ;;  %v12656_v4 = vld [vmem:[#allocation14 + $0xab0] sm:$0xff]  }
 0x54a   :  { %v8709_v63 = vadd.f32 %v11000_v13, %v13460_v31  ;;  %v11022_v42 = vadd.f32 %v11021_v16, %v11020_v11  ;;  %11293 = vmatpush3.bf16.msra.mxu0 %v12621_v10  ;;  %v12633_v31 = vld [vmem:[#allocation14 + $0x918] sm:$0xff]   ;;  %v12661_v15 = vld [vmem:[#allocation14 + $0xa60] sm:$0xff]  }
 0x54b   :  { %v11002_v20 = vpop.f32.mrf.mxu0  ;;  %v11023_v21 = vpop.f32.mrf.mxu1  ;;  %11294 = vmatprep.subr.bf16.mxu0 %v12624_v60  ;;  %v12658_v60 = vld [vmem:[#allocation14 + $0xa28] sm:$0xff]  }
 0x54c   :  { %v13477_v23 = vadd.f32 %v11022_v42, %v8709_v63  ;;  %11315 = vmatpush3.bf16.msra.mxu1 %v12623_v14  ;;  %v12663_v42 = vld [vmem:[#allocation14 + $0xae0] sm:$0xff]   ;;  %v12665_v20 = vld [vmem:[#allocation14 + $0xa58] sm:$0xff]  }
 0x54d   :  { %v11024_v54 = vpop.f32.mrf.mxu1  ;;  %11316 = vmatprep.subr.bf16.mxu1 %v12626_v18  ;;  %v12660_v18 = vld [vmem:[#allocation14 + $0xaa8] sm:$0xff]   ;;  %v12664_v21 = vld [vmem:[#allocation14 + $0xaa0] sm:$0xff]  }
 0x54e   :  { %11295 = vmatpush3.bf16.msra.mxu0 %v12625_v5  ;;  %v12662_v5 = vld [vmem:[#allocation14 + $0xa20] sm:$0xff]   ;;  %v12668_v54 = vld [vmem:[#allocation14 + $0xa98] sm:$0xff]  }
 0x54f   :  { %11296 = vmatprep.subr.bf16.mxu0 %v12628_v22  ;;  %v12667_v22 = vld [vmem:[#allocation14 + $0xad8] sm:$0xff]  }
 0x550   :  { %11317 = vmatpush3.bf16.msra.mxu1 %v12627_v17  ;;  %v12669_v17 = vld [vmem:[#allocation14 + $0xa50] sm:$0xff]  }
 0x551   :  { %11318 = vmatprep.subr.bf16.mxu1 %v12630_v24  ;;  %v12671_v24 = vld [vmem:[#allocation14 + $0xad0] sm:$0xff]  }
 0x552   :  { %11297 = vmatpush3.bf16.msra.mxu0 %v12629_v25  ;;  %v12670_v25 = vld [vmem:[#allocation14 + $0xa10] sm:$0xff]  }
 0x553   :  { %11298 = vmatprep.subr.bf16.mxu0 %v12632_v27  ;;  %v12673_v27 = vld [vmem:[#allocation14 + $0xa48] sm:$0xff]  }
 0x554   :  { %11319 = vmatpush3.bf16.msra.mxu1 %v12631_v28  ;;  %v3990_v28 = vld [vmem:[#allocation5 + $0x58] sm:$0xff] }
 0x555   :  { %11320 = vmatprep.subr.bf16.mxu1 %v12634_v30  ;;  %v12672_v30 = vld [vmem:[#allocation14 + $0xa90] sm:$0xff]  }
 0x556   :  { %11299 = vmatpush3.bf16.msra.mxu0 %v12633_v31  ;;  %v12675_v31 = vld [vmem:[#allocation14 + $0xac8] sm:$0xff]  }
 0x557   :  { %11300 = vmatprep.subr.bf16.mxu0 %v12636_v26  ;;  %v12674_v26 = vld [vmem:[#allocation14 + $0xa08] sm:$0xff]  }
 0x558   :  { %11321 = vmatpush3.bf16.msra.mxu1 %v12635_v33  ;;  %v4198_v33 = vcombine.high %v3990_v28, %v3990_v28 }
 0x559   :  { %11322 = vmatprep.subr.bf16.mxu1 %v12638_v34  ;;  %v12677_v34 = vld [vmem:[#allocation14 + $0xa40] sm:$0xff]  }
 0x55a   :  { %11301 = vmatpush3.bf16.msra.mxu0 %v12637_v35  ;;  %v12676_v35 = vld [vmem:[#allocation14 + $0xa88] sm:$0xff]  }
 0x55b   :  { %11302 = vmatprep.subr.bf16.mxu0 %v12640_v38  ;;  %v13497_v38 = vrot.slane %v3990_v28, %v13329_v52  ;;  %v12712_v28 = vld [vmem:[#allocation14 + $0xbc0] sm:$0xff]  }
 0x55c   :  { %11323 = vmatpush3.bf16.msra.mxu1 %v12639_v37  ;;  %v12678_v37 = vld [vmem:[#allocation14 + $0xa00] sm:$0xff]  }
 0x55d   :  { %11324 = vmatprep.subr.bf16.mxu1 %v12642_v29  ;;  %v13500_v29 = vrot.slane %v4198_v33, %v13329_v52  ;;  %v12713_v33 = vld [vmem:[#allocation14 + $0xb80] sm:$0xff]  }
 0x55e   :  { %11303 = vmatpush3.bf16.msra.mxu0 %v12641_v40  ;;  %v12681_v40 = vld [vmem:[#allocation14 + $0xb78] sm:$0xff]  }
 0x55f   :  { %11304 = vmatprep.subr.bf16.mxu0 %v12644_v41  ;;  %v4213_v41 = vcombine.high %v13497_v38, %v13497_v38 }
 0x560   :  { %11325 = vmatpush3.bf16.msra.mxu1 %v12643_v32  ;;  %v12683_v32 = vld [vmem:[#allocation14 + $0xbf8] sm:$0xff]  }
 0x561   :  { %11326 = vmatprep.subr.bf16.mxu1 %v12646_v43  ;;  %v12682_v43 = vld [vmem:[#allocation14 + $0xb38] sm:$0xff]   ;;  %v4392_v49 = vpack.c.bf16 %v4213_v41, %v4213_v41 }
 0x562   :  { %11305 = vmatpush3.bf16.msra.mxu0 %v12645_v19  ;;  %v4214_v19 = vcombine.high %v13500_v29, %v13500_v29 }
 0x563   :  { %11334 = vmatprep.subr.bf16.mxu0 %v12648_v46  ;;  %v4387_v46 = vpack.c.bf16 %v13480_v36, %v13480_v36  ;;  %v12690_v36 = vld [vmem:[#allocation14 + $0xb68] sm:$0xff]  }
 0x564   :  { %11327 = vmatpush3.bf16.msra.mxu1 %v12647_v47  ;;  %v12686_v47 = vld [vmem:[#allocation14 + $0xb70] sm:$0xff]  }
 0x565   :  { %v11042_v61 = vpop.f32.mrf.mxu0  ;;  %9267 = vmatmul.mubr.bf16.vlgmr.msra.gmra.mxu0 %v4383_v44  ;;  %11356 = vmatprep.subr.bf16.mxu1 %v12650_v51  ;;  %v12684_v51 = vld [vmem:[#allocation14 + $0xbb8] sm:$0xff]   ;;  %v12688_v44 = vld [vmem:[#allocation14 + $0xbf0] sm:$0xff]  }
 0x566   :  { %11335 = vmatpush3.bf16.msra.mxu0 %v12649_v53  ;;  %9346 = vmatprep.mubr.bf16.mxu0 %v4388_v6  ;;  %v12687_v6 = vld [vmem:[#allocation14 + $0xb30] sm:$0xff]  }
 0x567   :  { %v11043_v12 = vpop.f32.mrf.mxu0  ;;  %v11064_v7 = vpop.f32.mrf.mxu1  ;;  %9307 = vmatmul.mubr.bf16.vlgmr.msra.gmra.mxu1 %v4385_v62  ;;  %11336 = vmatprep.subr.bf16.mxu0 %v12653_v57  ;;  %v4394_v57 = vpack.c.bf16 %v4214_v19, %v4214_v19  ;;  %v4393_v19 = vpack.c.bf16 %v13500_v29, %v13500_v29 }
 0x568   :  { %v11044_v8 = vadd.f32 %v11043_v12, %v11042_v61  ;;  %11357 = vmatpush3.bf16.msra.mxu1 %v12651_v59  ;;  %9386 = vmatprep.mubr.bf16.mxu1 %v4390_v3  ;;  %v12692_v12 = vld [vmem:[#allocation14 + $0xbe8] sm:$0xff]  }
 0x569   :  { %v11045_v9 = vpop.f32.mrf.mxu0  ;;  %v11065_v10 = vpop.f32.mrf.mxu1  ;;  %11358 = vmatprep.subr.bf16.mxu1 %v12655_v2  ;;  %v12689_v2 = vld [vmem:[#allocation14 + $0xbb0] sm:$0xff]  }
 0x56a   :  { %v8789_v56 = vadd.f32 %v11044_v8, %v13477_v23  ;;  %v11066_v11 = vadd.f32 %v11065_v10, %v11064_v7  ;;  %11337 = vmatpush3.bf16.msra.mxu0 %v12654_v0  ;;  %v12666_v23 = vld [vmem:[#allocation14 + $0xa18] sm:$0xff]   ;;  %v12694_v9 = vld [vmem:[#allocation14 + $0xb60] sm:$0xff]  }
 0x56b   :  { %v11046_v13 = vpop.f32.mrf.mxu0  ;;  %v11067_v14 = vpop.f32.mrf.mxu1  ;;  %11338 = vmatprep.subr.bf16.mxu0 %v12657_v50  ;;  %v12691_v50 = vld [vmem:[#allocation14 + $0xb28] sm:$0xff]  }
 0x56c   :  { %v13494_v16 = vadd.f32 %v11066_v11, %v8789_v56  ;;  %11359 = vmatpush3.bf16.msra.mxu1 %v12656_v4  ;;  %v12696_v11 = vld [vmem:[#allocation14 + $0xbe0] sm:$0xff]   ;;  %v12698_v13 = vld [vmem:[#allocation14 + $0xb58] sm:$0xff]  }
 0x56d   :  { %v11068_v63 = vpop.f32.mrf.mxu1  ;;  %11360 = vmatprep.subr.bf16.mxu1 %v12659_v58  ;;  %v12693_v58 = vld [vmem:[#allocation14 + $0xba8] sm:$0xff]   ;;  %v12697_v14 = vld [vmem:[#allocation14 + $0xba0] sm:$0xff]  }
 0x56e   :  { %11339 = vmatpush3.bf16.msra.mxu0 %v12658_v60  ;;  %v12695_v60 = vld [vmem:[#allocation14 + $0xb20] sm:$0xff]   ;;  %v12701_v63 = vld [vmem:[#allocation14 + $0xb98] sm:$0xff]  }
 0x56f   :  { %11340 = vmatprep.subr.bf16.mxu0 %v12661_v15  ;;  %v12700_v15 = vld [vmem:[#allocation14 + $0xbd8] sm:$0xff]  }
 0x570   :  { %11361 = vmatpush3.bf16.msra.mxu1 %v12660_v18  ;;  %v12702_v18 = vld [vmem:[#allocation14 + $0xb50] sm:$0xff]  }
 0x571   :  { %11362 = vmatprep.subr.bf16.mxu1 %v12663_v42  ;;  %v12704_v42 = vld [vmem:[#allocation14 + $0xbd0] sm:$0xff]  }
 0x572   :  { %11341 = vmatpush3.bf16.msra.mxu0 %v12662_v5  ;;  %v12703_v5 = vld [vmem:[#allocation14 + $0xb10] sm:$0xff]  }
 0x573   :  { %11342 = vmatprep.subr.bf16.mxu0 %v12665_v20  ;;  %v12706_v20 = vld [vmem:[#allocation14 + $0xb48] sm:$0xff]  }
 0x574   :  { %11363 = vmatpush3.bf16.msra.mxu1 %v12664_v21  ;;  %v3991_v21 = vld [vmem:[#allocation5 + $0x60] sm:$0xff] }
 0x575   :  { %11364 = vmatprep.subr.bf16.mxu1 %v12667_v22  ;;  %v12705_v22 = vld [vmem:[#allocation14 + $0xb90] sm:$0xff]  }
 0x576   :  { %11343 = vmatpush3.bf16.msra.mxu0 %v12666_v23  ;;  %v12708_v23 = vld [vmem:[#allocation14 + $0xbc8] sm:$0xff]  }
 0x577   :  { %11344 = vmatprep.subr.bf16.mxu0 %v12669_v17  ;;  %v12707_v17 = vld [vmem:[#allocation14 + $0xb08] sm:$0xff]  }
 0x578   :  { %11365 = vmatpush3.bf16.msra.mxu1 %v12668_v54  ;;  %v4215_v54 = vcombine.high %v3991_v21, %v3991_v21 }
 0x579   :  { %11366 = vmatprep.subr.bf16.mxu1 %v12671_v24  ;;  %v12710_v24 = vld [vmem:[#allocation14 + $0xb40] sm:$0xff]  }
 0x57a   :  { %11345 = vmatpush3.bf16.msra.mxu0 %v12670_v25  ;;  %v12709_v25 = vld [vmem:[#allocation14 + $0xb88] sm:$0xff]  }
 0x57b   :  { %11346 = vmatprep.subr.bf16.mxu0 %v12673_v27  ;;  %v13514_v27 = vrot.slane %v3991_v21, %v13329_v52  ;;  %v12745_v21 = vld [vmem:[#allocation14 + $0xcc0] sm:$0xff]  }
 0x57c   :  { %11367 = vmatpush3.bf16.msra.mxu1 %v12672_v30  ;;  %v12711_v30 = vld [vmem:[#allocation14 + $0xb00] sm:$0xff]  }
 0x57d   :  { %11368 = vmatprep.subr.bf16.mxu1 %v12675_v31  ;;  %v13517_v31 = vrot.slane %v4215_v54, %v13329_v52  ;;  %v12746_v54 = vld [vmem:[#allocation14 + $0xc80] sm:$0xff]  }
 0x57e   :  { %11347 = vmatpush3.bf16.msra.mxu0 %v12674_v26  ;;  %v12714_v26 = vld [vmem:[#allocation14 + $0xc78] sm:$0xff]  }
 0x57f   :  { %11348 = vmatprep.subr.bf16.mxu0 %v12677_v34  ;;  %v4230_v34 = vcombine.high %v13514_v27, %v13514_v27 }
 0x580   :  { %11369 = vmatpush3.bf16.msra.mxu1 %v12676_v35  ;;  %v12716_v35 = vld [vmem:[#allocation14 + $0xcf8] sm:$0xff]  }
 0x581   :  { %11370 = vmatprep.subr.bf16.mxu1 %v12679_v39  ;;  %v12715_v39 = vld [vmem:[#allocation14 + $0xc38] sm:$0xff]   ;;  %v4396_v41 = vpack.c.bf16 %v4230_v34, %v4230_v34 }
 0x582   :  { %11349 = vmatpush3.bf16.msra.mxu0 %v12678_v37  ;;  %v4231_v37 = vcombine.high %v13517_v31, %v13517_v31 }
 0x583   :  { %11378 = vmatprep.subr.bf16.mxu0 %v12681_v40  ;;  %v4391_v40 = vpack.c.bf16 %v13497_v38, %v13497_v38  ;;  %v12723_v38 = vld [vmem:[#allocation14 + $0xc68] sm:$0xff]  }
 0x584   :  { %11371 = vmatpush3.bf16.msra.mxu1 %v12680_v48  ;;  %v12719_v48 = vld [vmem:[#allocation14 + $0xc70] sm:$0xff]  }
 0x585   :  { %v11086_v53 = vpop.f32.mrf.mxu0  ;;  %9347 = vmatmul.mubr.bf16.vlgmr.msra.gmra.mxu0 %v4387_v46  ;;  %11400 = vmatprep.subr.bf16.mxu1 %v12683_v32  ;;  %v12717_v32 = vld [vmem:[#allocation14 + $0xcb8] sm:$0xff]   ;;  %v12721_v46 = vld [vmem:[#allocation14 + $0xcf0] sm:$0xff]  }
 0x586   :  { %11379 = vmatpush3.bf16.msra.mxu0 %v12682_v43  ;;  %9426 = vmatprep.mubr.bf16.mxu0 %v4392_v49  ;;  %v12720_v49 = vld [vmem:[#allocation14 + $0xc30] sm:$0xff]  }
 0x587   :  { %v11087_v59 = vpop.f32.mrf.mxu0  ;;  %v11108_v61 = vpop.f32.mrf.mxu1  ;;  %9387 = vmatmul.mubr.bf16.vlgmr.msra.gmra.mxu1 %v4389_v55  ;;  %11380 = vmatprep.subr.bf16.mxu0 %v12686_v47  ;;  %v4398_v47 = vpack.c.bf16 %v4231_v37, %v4231_v37  ;;  %v4397_v37 = vpack.c.bf16 %v13517_v31, %v13517_v31 }
 0x588   :  { %v11088_v62 = vadd.f32 %v11087_v59, %v11086_v53  ;;  %11401 = vmatpush3.bf16.msra.mxu1 %v12684_v51  ;;  %9466 = vmatprep.mubr.bf16.mxu1 %v4394_v57  ;;  %v12725_v59 = vld [vmem:[#allocation14 + $0xce8] sm:$0xff]  }
 0x589   :  { %v11089_v3 = vpop.f32.mrf.mxu0  ;;  %v11109_v0 = vpop.f32.mrf.mxu1  ;;  %11402 = vmatprep.subr.bf16.mxu1 %v12688_v44  ;;  %v12722_v44 = vld [vmem:[#allocation14 + $0xcb0] sm:$0xff]  }
 0x58a   :  { %v8869_v45 = vadd.f32 %v11088_v62, %v13494_v16  ;;  %v11110_v7 = vadd.f32 %v11109_v0, %v11108_v61  ;;  %11381 = vmatpush3.bf16.msra.mxu0 %v12687_v6  ;;  %v12699_v16 = vld [vmem:[#allocation14 + $0xb18] sm:$0xff]   ;;  %v12727_v3 = vld [vmem:[#allocation14 + $0xc60] sm:$0xff]  }
 0x58b   :  { %v11090_v8 = vpop.f32.mrf.mxu0  ;;  %v11111_v4 = vpop.f32.mrf.mxu1  ;;  %11382 = vmatprep.subr.bf16.mxu0 %v12690_v36  ;;  %v12724_v36 = vld [vmem:[#allocation14 + $0xc28] sm:$0xff]  }
 0x58c   :  { %v13511_v10 = vadd.f32 %v11110_v7, %v8869_v45  ;;  %11403 = vmatpush3.bf16.msra.mxu1 %v12689_v2  ;;  %v12729_v7 = vld [vmem:[#allocation14 + $0xce0] sm:$0xff]   ;;  %v12731_v8 = vld [vmem:[#allocation14 + $0xc58] sm:$0xff]  }
 0x58d   :  { %v11112_v56 = vpop.f32.mrf.mxu1  ;;  %11404 = vmatprep.subr.bf16.mxu1 %v12692_v12  ;;  %v12726_v12 = vld [vmem:[#allocation14 + $0xca8] sm:$0xff]   ;;  %v12730_v4 = vld [vmem:[#allocation14 + $0xca0] sm:$0xff]  }
 0x58e   :  { %11383 = vmatpush3.bf16.msra.mxu0 %v12691_v50  ;;  %v12728_v50 = vld [vmem:[#allocation14 + $0xc20] sm:$0xff]   ;;  %v12734_v56 = vld [vmem:[#allocation14 + $0xc98] sm:$0xff]  }
 0x58f   :  { %11384 = vmatprep.subr.bf16.mxu0 %v12694_v9  ;;  %v12733_v9 = vld [vmem:[#allocation14 + $0xcd8] sm:$0xff]  }
 0x590   :  { %11405 = vmatpush3.bf16.msra.mxu1 %v12693_v58  ;;  %v12735_v58 = vld [vmem:[#allocation14 + $0xc50] sm:$0xff]  }
 0x591   :  { %11406 = vmatprep.subr.bf16.mxu1 %v12696_v11  ;;  %v12737_v11 = vld [vmem:[#allocation14 + $0xcd0] sm:$0xff]  }
 0x592   :  { %11385 = vmatpush3.bf16.msra.mxu0 %v12695_v60  ;;  %v12736_v60 = vld [vmem:[#allocation14 + $0xc10] sm:$0xff]  }
 0x593   :  { %11386 = vmatprep.subr.bf16.mxu0 %v12698_v13  ;;  %v12739_v13 = vld [vmem:[#allocation14 + $0xc48] sm:$0xff]  }
 0x594   :  { %11407 = vmatpush3.bf16.msra.mxu1 %v12697_v14  ;;  %v3992_v14 = vld [vmem:[#allocation5 + $0x68] sm:$0xff] }
 0x595   :  { %11408 = vmatprep.subr.bf16.mxu1 %v12700_v15  ;;  %v12738_v15 = vld [vmem:[#allocation14 + $0xc90] sm:$0xff]  }
 0x596   :  { %11387 = vmatpush3.bf16.msra.mxu0 %v12699_v16  ;;  %v12741_v16 = vld [vmem:[#allocation14 + $0xcc8] sm:$0xff]  }
 0x597   :  { %11388 = vmatprep.subr.bf16.mxu0 %v12702_v18  ;;  %v12740_v18 = vld [vmem:[#allocation14 + $0xc08] sm:$0xff]  }
 0x598   :  { %11409 = vmatpush3.bf16.msra.mxu1 %v12701_v63  ;;  %v4232_v63 = vcombine.high %v3992_v14, %v3992_v14 }
 0x599   :  { %11410 = vmatprep.subr.bf16.mxu1 %v12704_v42  ;;  %v12743_v42 = vld [vmem:[#allocation14 + $0xc40] sm:$0xff]  }
 0x59a   :  { %11389 = vmatpush3.bf16.msra.mxu0 %v12703_v5  ;;  %v12742_v5 = vld [vmem:[#allocation14 + $0xc88] sm:$0xff]  }
 0x59b   :  { %11390 = vmatprep.subr.bf16.mxu0 %v12706_v20  ;;  %v13531_v20 = vrot.slane %v3992_v14, %v13329_v52  ;;  %v12778_v14 = vld [vmem:[#allocation14 + $0xdc0] sm:$0xff]  }
 0x59c   :  { %11411 = vmatpush3.bf16.msra.mxu1 %v12705_v22  ;;  %v12744_v22 = vld [vmem:[#allocation14 + $0xc00] sm:$0xff]  }
 0x59d   :  { %11412 = vmatprep.subr.bf16.mxu1 %v12708_v23  ;;  %v13534_v23 = vrot.slane %v4232_v63, %v13329_v52  ;;  %v12779_v63 = vld [vmem:[#allocation14 + $0xd80] sm:$0xff]  }
 0x59e   :  { %11391 = vmatpush3.bf16.msra.mxu0 %v12707_v17  ;;  %v12747_v17 = vld [vmem:[#allocation14 + $0xd78] sm:$0xff]  }
 0x59f   :  { %11392 = vmatprep.subr.bf16.mxu0 %v12710_v24  ;;  %v4247_v24 = vcombine.high %v13531_v20, %v13531_v20 }
 0x5a0   :  { %11413 = vmatpush3.bf16.msra.mxu1 %v12709_v25  ;;  %v12749_v25 = vld [vmem:[#allocation14 + $0xdf8] sm:$0xff]  }
 0x5a1   :  { %11414 = vmatprep.subr.bf16.mxu1 %v12712_v28  ;;  %v12748_v28 = vld [vmem:[#allocation14 + $0xd38] sm:$0xff]   ;;  %v4400_v34 = vpack.c.bf16 %v4247_v24, %v4247_v24 }
 0x5a2   :  { %11393 = vmatpush3.bf16.msra.mxu0 %v12711_v30  ;;  %v4248_v30 = vcombine.high %v13534_v23, %v13534_v23 }
 0x5a3   :  { %11422 = vmatprep.subr.bf16.mxu0 %v12714_v26  ;;  %v4395_v26 = vpack.c.bf16 %v13514_v27, %v13514_v27  ;;  %v12756_v27 = vld [vmem:[#allocation14 + $0xd68] sm:$0xff]  }
 0x5a4   :  { %11415 = vmatpush3.bf16.msra.mxu1 %v12713_v33  ;;  %v12752_v33 = vld [vmem:[#allocation14 + $0xd70] sm:$0xff]  }
 0x5a5   :  { %v11130_v43 = vpop.f32.mrf.mxu0  ;;  %9427 = vmatmul.mubr.bf16.vlgmr.msra.gmra.mxu0 %v4391_v40  ;;  %11444 = vmatprep.subr.bf16.mxu1 %v12716_v35  ;;  %v12750_v35 = vld [vmem:[#allocation14 + $0xdb8] sm:$0xff]   ;;  %v12754_v40 = vld [vmem:[#allocation14 + $0xdf0] sm:$0xff]  }
 0x5a6   :  { %11423 = vmatpush3.bf16.msra.mxu0 %v12715_v39  ;;  %9506 = vmatprep.mubr.bf16.mxu0 %v4396_v41  ;;  %v12753_v41 = vld [vmem:[#allocation14 + $0xd30] sm:$0xff]  }
 0x5a7   :  { %v11131_v51 = vpop.f32.mrf.mxu0  ;;  %v11152_v53 = vpop.f32.mrf.mxu1  ;;  %9467 = vmatmul.mubr.bf16.vlgmr.msra.gmra.mxu1 %v4393_v19  ;;  %11424 = vmatprep.subr.bf16.mxu0 %v12719_v48  ;;  %v4402_v48 = vpack.c.bf16 %v4248_v30, %v4248_v30  ;;  %v4401_v30 = vpack.c.bf16 %v13534_v23, %v13534_v23 }
 0x5a8   :  { %v11132_v55 = vadd.f32 %v11131_v51, %v11130_v43  ;;  %11445 = vmatpush3.bf16.msra.mxu1 %v12717_v32  ;;  %9546 = vmatprep.mubr.bf16.mxu1 %v4398_v47  ;;  %v12758_v51 = vld [vmem:[#allocation14 + $0xde8] sm:$0xff]  }
 0x5a9   :  { %v11133_v57 = vpop.f32.mrf.mxu0  ;;  %v11153_v6 = vpop.f32.mrf.mxu1  ;;  %11446 = vmatprep.subr.bf16.mxu1 %v12721_v46  ;;  %v12755_v46 = vld [vmem:[#allocation14 + $0xdb0] sm:$0xff]  }
 0x5aa   :  { %v8949_v29 = vadd.f32 %v11132_v55, %v13511_v10  ;;  %v11154_v61 = vadd.f32 %v11153_v6, %v11152_v53  ;;  %11425 = vmatpush3.bf16.msra.mxu0 %v12720_v49  ;;  %v12732_v10 = vld [vmem:[#allocation14 + $0xc18] sm:$0xff]   ;;  %v12760_v57 = vld [vmem:[#allocation14 + $0xd60] sm:$0xff]  }
 0x5ab   :  { %v11134_v62 = vpop.f32.mrf.mxu0  ;;  %v11155_v2 = vpop.f32.mrf.mxu1  ;;  %11426 = vmatprep.subr.bf16.mxu0 %v12723_v38  ;;  %v12757_v38 = vld [vmem:[#allocation14 + $0xd28] sm:$0xff]  }
 0x5ac   :  { %v13528_v0 = vadd.f32 %v11154_v61, %v8949_v29  ;;  %11447 = vmatpush3.bf16.msra.mxu1 %v12722_v44  ;;  %v12762_v61 = vld [vmem:[#allocation14 + $0xde0] sm:$0xff]   ;;  %v12764_v62 = vld [vmem:[#allocation14 + $0xd58] sm:$0xff]  }
 0x5ad   :  { %v11156_v45 = vpop.f32.mrf.mxu1  ;;  %11448 = vmatprep.subr.bf16.mxu1 %v12725_v59  ;;  %v12759_v59 = vld [vmem:[#allocation14 + $0xda8] sm:$0xff]   ;;  %v12763_v2 = vld [vmem:[#allocation14 + $0xda0] sm:$0xff]  }
 0x5ae   :  { %11427 = vmatpush3.bf16.msra.mxu0 %v12724_v36  ;;  %v12761_v36 = vld [vmem:[#allocation14 + $0xd20] sm:$0xff]   ;;  %v12767_v45 = vld [vmem:[#allocation14 + $0xd98] sm:$0xff]  }
 0x5af   :  { %11428 = vmatprep.subr.bf16.mxu0 %v12727_v3  ;;  %v12766_v3 = vld [vmem:[#allocation14 + $0xdd8] sm:$0xff]  }
 0x5b0   :  { %11449 = vmatpush3.bf16.msra.mxu1 %v12726_v12  ;;  %v12768_v12 = vld [vmem:[#allocation14 + $0xd50] sm:$0xff]  }
 0x5b1   :  { %11450 = vmatprep.subr.bf16.mxu1 %v12729_v7  ;;  %v12770_v7 = vld [vmem:[#allocation14 + $0xdd0] sm:$0xff]  }
 0x5b2   :  { %11429 = vmatpush3.bf16.msra.mxu0 %v12728_v50  ;;  %v12769_v50 = vld [vmem:[#allocation14 + $0xd10] sm:$0xff]  }
 0x5b3   :  { %11430 = vmatprep.subr.bf16.mxu0 %v12731_v8  ;;  %v12772_v8 = vld [vmem:[#allocation14 + $0xd48] sm:$0xff]  }
 0x5b4   :  { %11451 = vmatpush3.bf16.msra.mxu1 %v12730_v4  ;;  %v3993_v4 = vld [vmem:[#allocation5 + $0x70] sm:$0xff] }
 0x5b5   :  { %11452 = vmatprep.subr.bf16.mxu1 %v12733_v9  ;;  %v12771_v9 = vld [vmem:[#allocation14 + $0xd90] sm:$0xff]  }
 0x5b6   :  { %11431 = vmatpush3.bf16.msra.mxu0 %v12732_v10  ;;  %v12774_v10 = vld [vmem:[#allocation14 + $0xdc8] sm:$0xff]  }
 0x5b7   :  { %11432 = vmatprep.subr.bf16.mxu0 %v12735_v58  ;;  %v12773_v58 = vld [vmem:[#allocation14 + $0xd08] sm:$0xff]  }
 0x5b8   :  { %11453 = vmatpush3.bf16.msra.mxu1 %v12734_v56  ;;  %v4249_v56 = vcombine.high %v3993_v4, %v3993_v4 }
 0x5b9   :  { %11454 = vmatprep.subr.bf16.mxu1 %v12737_v11  ;;  %v12776_v11 = vld [vmem:[#allocation14 + $0xd40] sm:$0xff]  }
 0x5ba   :  { %11433 = vmatpush3.bf16.msra.mxu0 %v12736_v60  ;;  %v12775_v60 = vld [vmem:[#allocation14 + $0xd88] sm:$0xff]  }
 0x5bb   :  { %11434 = vmatprep.subr.bf16.mxu0 %v12739_v13  ;;  %v13548_v13 = vrot.slane %v3993_v4, %v13329_v52  ;;  %v12811_v4 = vld [vmem:[#allocation14 + $0xec0] sm:$0xff]  }
 0x5bc   :  { %11455 = vmatpush3.bf16.msra.mxu1 %v12738_v15  ;;  %v12777_v15 = vld [vmem:[#allocation14 + $0xd00] sm:$0xff]  }
 0x5bd   :  { %11456 = vmatprep.subr.bf16.mxu1 %v12741_v16  ;;  %v13551_v16 = vrot.slane %v4249_v56, %v13329_v52  ;;  %v12812_v56 = vld [vmem:[#allocation14 + $0xe80] sm:$0xff]  }
 0x5be   :  { %11435 = vmatpush3.bf16.msra.mxu0 %v12740_v18  ;;  %v12780_v18 = vld [vmem:[#allocation14 + $0xe78] sm:$0xff]  }
 0x5bf   :  { %11436 = vmatprep.subr.bf16.mxu0 %v12743_v42  ;;  %v4264_v42 = vcombine.high %v13548_v13, %v13548_v13 }
 0x5c0   :  { %11457 = vmatpush3.bf16.msra.mxu1 %v12742_v5  ;;  %v12782_v5 = vld [vmem:[#allocation14 + $0xef8] sm:$0xff]  }
 0x5c1   :  { %11458 = vmatprep.subr.bf16.mxu1 %v12745_v21  ;;  %v12781_v21 = vld [vmem:[#allocation14 + $0xe38] sm:$0xff]   ;;  %v4404_v24 = vpack.c.bf16 %v4264_v42, %v4264_v42 }
 0x5c2   :  { %11437 = vmatpush3.bf16.msra.mxu0 %v12744_v22  ;;  %v4265_v22 = vcombine.high %v13551_v16, %v13551_v16  ;;  %v12816_v42 = vld [vmem:[#allocation14 + $0xfb8] sm:$0xff]  }
 0x5c3   :  { %11466 = vmatprep.subr.bf16.mxu0 %v12747_v17  ;;  %v4399_v17 = vpack.c.bf16 %v13531_v20, %v13531_v20  ;;  %v12789_v20 = vld [vmem:[#allocation14 + $0xe68] sm:$0xff]  }
 0x5c4   :  { %11459 = vmatpush3.bf16.msra.mxu1 %v12746_v54  ;;  %v12785_v54 = vld [vmem:[#allocation14 + $0xe70] sm:$0xff]  }
 0x5c5   :  { %v11174_v39 = vpop.f32.mrf.mxu0  ;;  %9507 = vmatmul.mubr.bf16.vlgmr.msra.gmra.mxu0 %v4395_v26  ;;  %11488 = vmatprep.subr.bf16.mxu1 %v12749_v25  ;;  %v12783_v25 = vld [vmem:[#allocation14 + $0xeb8] sm:$0xff]   ;;  %v12787_v26 = vld [vmem:[#allocation14 + $0xef0] sm:$0xff]  }
 0x5c6   :  { %11467 = vmatpush3.bf16.msra.mxu0 %v12748_v28  ;;  %9586 = vmatprep.mubr.bf16.mxu0 %v4400_v34  ;;  %v12786_v34 = vld [vmem:[#allocation14 + $0xe30] sm:$0xff]  }
 0x5c7   :  { %v11175_v32 = vpop.f32.mrf.mxu0  ;;  %v11196_v43 = vpop.f32.mrf.mxu1  ;;  %9547 = vmatmul.mubr.bf16.vlgmr.msra.gmra.mxu1 %v4397_v37  ;;  %11468 = vmatprep.subr.bf16.mxu0 %v12752_v33  ;;  %v4406_v33 = vpack.c.bf16 %v4265_v22, %v4265_v22  ;;  %v12820_v22 = vld [vmem:[#allocation14 + $0xff0] sm:$0xff]  }
 0x5c8   :  { %v11176_v19 = vadd.f32 %v11175_v32, %v11174_v39  ;;  %11489 = vmatpush3.bf16.msra.mxu1 %v12750_v35  ;;  %9626 = vmatprep.mubr.bf16.mxu1 %v4402_v48  ;;  %v12791_v32 = vld [vmem:[#allocation14 + $0xee8] sm:$0xff]  }
 0x5c9   :  { %v11177_v47 = vpop.f32.mrf.mxu0  ;;  %v11197_v49 = vpop.f32.mrf.mxu1  ;;  %11490 = vmatprep.subr.bf16.mxu1 %v12754_v40  ;;  %v12788_v40 = vld [vmem:[#allocation14 + $0xeb0] sm:$0xff]  }
 0x5ca   :  { %v9029_v31 = vadd.f32 %v11176_v19, %v13528_v0  ;;  %v11198_v53 = vadd.f32 %v11197_v49, %v11196_v43  ;;  %11469 = vmatpush3.bf16.msra.mxu0 %v12753_v41  ;;  %v12765_v0 = vld [vmem:[#allocation14 + $0xd18] sm:$0xff]   ;;  %v12793_v47 = vld [vmem:[#allocation14 + $0xe60] sm:$0xff]  }
 0x5cb   :  { %v11178_v55 = vpop.f32.mrf.mxu0  ;;  %v11199_v44 = vpop.f32.mrf.mxu1  ;;  %11470 = vmatprep.subr.bf16.mxu0 %v12756_v27  ;;  %v12790_v27 = vld [vmem:[#allocation14 + $0xe28] sm:$0xff]  }
 0x5cc   :  { %v13545_v6 = vadd.f32 %v11198_v53, %v9029_v31  ;;  %11491 = vmatpush3.bf16.msra.mxu1 %v12755_v46  ;;  %v12795_v53 = vld [vmem:[#allocation14 + $0xee0] sm:$0xff]   ;;  %v12797_v55 = vld [vmem:[#allocation14 + $0xe58] sm:$0xff]  }
 0x5cd   :  { %v11200_v29 = vpop.f32.mrf.mxu1  ;;  %11492 = vmatprep.subr.bf16.mxu1 %v12758_v51  ;;  %v12792_v51 = vld [vmem:[#allocation14 + $0xea8] sm:$0xff]   ;;  %v12796_v44 = vld [vmem:[#allocation14 + $0xea0] sm:$0xff]  }
 0x5ce   :  { %11471 = vmatpush3.bf16.msra.mxu0 %v12757_v38  ;;  %v12794_v38 = vld [vmem:[#allocation14 + $0xe20] sm:$0xff]   ;;  %v12800_v29 = vld [vmem:[#allocation14 + $0xe98] sm:$0xff]  }
 0x5cf   :  { %11472 = vmatprep.subr.bf16.mxu0 %v12760_v57  ;;  %v12799_v57 = vld [vmem:[#allocation14 + $0xed8] sm:$0xff]  }
 0x5d0   :  { %11493 = vmatpush3.bf16.msra.mxu1 %v12759_v59  ;;  %v12801_v59 = vld [vmem:[#allocation14 + $0xe50] sm:$0xff]  }
 0x5d1   :  { %11494 = vmatprep.subr.bf16.mxu1 %v12762_v61  ;;  %v12803_v61 = vld [vmem:[#allocation14 + $0xed0] sm:$0xff]  }
 0x5d2   :  { %11473 = vmatpush3.bf16.msra.mxu0 %v12761_v36  ;;  %v12802_v36 = vld [vmem:[#allocation14 + $0xe10] sm:$0xff]  }
 0x5d3   :  { %11474 = vmatprep.subr.bf16.mxu0 %v12764_v62  ;;  %v12805_v62 = vld [vmem:[#allocation14 + $0xe48] sm:$0xff]  }
 0x5d4   :  { %11495 = vmatpush3.bf16.msra.mxu1 %v12763_v2  ;;  %v3994_v2 = vld [vmem:[#allocation5 + $0x78] sm:$0xff] }
 0x5d5   :  { %11496 = vmatprep.subr.bf16.mxu1 %v12766_v3  ;;  %v12804_v3 = vld [vmem:[#allocation14 + $0xe90] sm:$0xff]  }
 0x5d6   :  { %11475 = vmatpush3.bf16.msra.mxu0 %v12765_v0  ;;  %v12807_v0 = vld [vmem:[#allocation14 + $0xec8] sm:$0xff]  }
 0x5d7   :  { %11476 = vmatprep.subr.bf16.mxu0 %v12768_v12  ;;  %v12806_v12 = vld [vmem:[#allocation14 + $0xe08] sm:$0xff]  }
 0x5d8   :  { %11497 = vmatpush3.bf16.msra.mxu1 %v12767_v45  ;;  %v4266_v45 = vcombine.high %v3994_v2, %v3994_v2 }
 0x5d9   :  { %11498 = vmatprep.subr.bf16.mxu1 %v12770_v7  ;;  %v12809_v7 = vld [vmem:[#allocation14 + $0xe40] sm:$0xff]  }
 0x5da   :  { %11477 = vmatpush3.bf16.msra.mxu0 %v12769_v50  ;;  %v12808_v50 = vld [vmem:[#allocation14 + $0xe88] sm:$0xff]  }
 0x5db   :  { %11478 = vmatprep.subr.bf16.mxu0 %v12772_v8  ;;  %v13565_v8 = vrot.slane %v3994_v2, %v13329_v52 }
 0x5dc   :  { %11499 = vmatpush3.bf16.msra.mxu1 %v12771_v9  ;;  %v12810_v9 = vld [vmem:[#allocation14 + $0xe00] sm:$0xff]  }
 0x5dd   :  { %11500 = vmatprep.subr.bf16.mxu1 %v12774_v10  ;;  %v13568_v10 = vrot.slane %v4266_v45, %v13329_v52  ;;  %v12818_v52 = vld [vmem:[#allocation14 + $0xf70] sm:$0xff]  }
 0x5de   :  { %11479 = vmatpush3.bf16.msra.mxu0 %v12773_v58  ;;  %v12813_v58 = vld [vmem:[#allocation14 + $0xf78] sm:$0xff]  }
 0x5df   :  { %11480 = vmatprep.subr.bf16.mxu0 %v12776_v11  ;;  %v4281_v11 = vcombine.high %v13565_v8, %v13565_v8 }
 0x5e0   :  { %11501 = vmatpush3.bf16.msra.mxu1 %v12775_v60  ;;  %v12815_v60 = vld [vmem:[#allocation14 + $0xff8] sm:$0xff]  }
 0x5e1   :  { %11502 = vmatprep.subr.bf16.mxu1 %v12778_v14  ;;  %v12814_v14 = vld [vmem:[#allocation14 + $0xf38] sm:$0xff]  }
 0x5e2   :  { %11481 = vmatpush3.bf16.msra.mxu0 %v12777_v15  ;;  %v4282_v15 = vcombine.high %v13568_v10, %v13568_v10 }
 0x5e3   :  { %11510 = vmatprep.subr.bf16.mxu0 %v12780_v18  ;;  %v4403_v18 = vpack.c.bf16 %v13548_v13, %v13548_v13  ;;  %v12822_v13 = vld [vmem:[#allocation14 + $0xf68] sm:$0xff]  }
 0x5e4   :  { %11503 = vmatpush3.bf16.msra.mxu1 %v12779_v63  ;;  %v4408_v63 = vpack.c.bf16 %v4281_v11, %v4281_v11 }
 0x5e5   :  { %v11218_v28 = vpop.f32.mrf.mxu0  ;;  %9587 = vmatmul.mubr.bf16.vlgmr.msra.gmra.mxu0 %v4399_v17  ;;  %11532 = vmatprep.subr.bf16.mxu1 %v12782_v5  ;;  %v4410_v17 = vpack.c.bf16 %v4282_v15, %v4282_v15 }
 0x5e6   :  { %11511 = vmatpush3.bf16.msra.mxu0 %v12781_v21  ;;  %9666 = vmatprep.mubr.bf16.mxu0 %v4404_v24  ;;  %v4405_v21 = vpack.c.bf16 %v13551_v16, %v13551_v16 }
 0x5e7   :  { %v11219_v35 = vpop.f32.mrf.mxu0  ;;  %v11240_v39 = vpop.f32.mrf.mxu1  ;;  %9627 = vmatmul.mubr.bf16.vlgmr.msra.gmra.mxu1 %v4401_v30  ;;  %11512 = vmatprep.subr.bf16.mxu0 %v12785_v54  ;;  %v12819_v54 = vld [vmem:[#allocation14 + $0xf30] sm:$0xff]  }
 0x5e8   :  { %v11220_v37 = vadd.f32 %v11219_v35, %v11218_v28  ;;  %11533 = vmatpush3.bf16.msra.mxu1 %v12783_v25  ;;  %9706 = vmatprep.mubr.bf16.mxu1 %v4406_v33  ;;  %v12821_v30 = vld [vmem:[#allocation14 + $0xfb0] sm:$0xff]  }
 0x5e9   :  { %v11221_v48 = vpop.f32.mrf.mxu0  ;;  %v11241_v41 = vpop.f32.mrf.mxu1  ;;  %11534 = vmatprep.subr.bf16.mxu1 %v12787_v26 }
 0x5ea   :  { %v9109_v23 = vadd.f32 %v11220_v37, %v13545_v6  ;;  %v11242_v43 = vadd.f32 %v11241_v41, %v11240_v39  ;;  %11513 = vmatpush3.bf16.msra.mxu0 %v12786_v34  ;;  %v12798_v6 = vld [vmem:[#allocation14 + $0xe18] sm:$0xff]   ;;  %v12824_v34 = vld [vmem:[#allocation14 + $0xfe8] sm:$0xff]  }
 0x5eb   :  { %v11222_v19 = vpop.f32.mrf.mxu0  ;;  %v11243_v46 = vpop.f32.mrf.mxu1  ;;  %11514 = vmatprep.subr.bf16.mxu0 %v12789_v20  ;;  %v12823_v39 = vld [vmem:[#allocation14 + $0xf28] sm:$0xff]  }
 0x5ec   :  { %v13562_v49 = vadd.f32 %v11242_v43, %v9109_v23  ;;  %11535 = vmatpush3.bf16.msra.mxu1 %v12788_v40  ;;  %v12826_v40 = vld [vmem:[#allocation14 + $0xf60] sm:$0xff]   ;;  %v12825_v41 = vld [vmem:[#allocation14 + $0xfa8] sm:$0xff]   ;;  %v12832_v46 = vld [vmem:[#allocation14 + $0xfd8] sm:$0xff]  }
 0x5ed   :  { %v11244_v31 = vpop.f32.mrf.mxu1  ;;  %11536 = vmatprep.subr.bf16.mxu1 %v12791_v32  ;;  %v12828_v23 = vld [vmem:[#allocation14 + $0xfe0] sm:$0xff]  }
 0x5ee   :  { %11515 = vmatpush3.bf16.msra.mxu0 %v12790_v27  ;;  %v12827_v43 = vld [vmem:[#allocation14 + $0xf20] sm:$0xff]   ;;  %v12830_v27 = vld [vmem:[#allocation14 + $0xf58] sm:$0xff]   ;;  %v12836_v31 = vld [vmem:[#allocation14 + $0xfd0] sm:$0xff]  }
 0x5ef   :  { %11516 = vmatprep.subr.bf16.mxu0 %v12793_v47  ;;  %v12829_v19 = vld [vmem:[#allocation14 + $0xfa0] sm:$0xff]   ;;  %v12831_v47 = vld [vmem:[#allocation14 + $0xf18] sm:$0xff]  }
 0x5f0   :  { %11537 = vmatpush3.bf16.msra.mxu1 %v12792_v51  ;;  %v12833_v51 = vld [vmem:[#allocation14 + $0xf98] sm:$0xff]  }
 0x5f1   :  { %11538 = vmatprep.subr.bf16.mxu1 %v12795_v53  ;;  %v12835_v53 = vld [vmem:[#allocation14 + $0xf10] sm:$0xff]  }
 0x5f2   :  { %11517 = vmatpush3.bf16.msra.mxu0 %v12794_v38  ;;  %v12838_v38 = vld [vmem:[#allocation14 + $0xf48] sm:$0xff]  }
 0x5f3   :  { %11518 = vmatprep.subr.bf16.mxu0 %v12797_v55  ;;  %v12837_v55 = vld [vmem:[#allocation14 + $0xf90] sm:$0xff]  }
 0x5f4   :  { %11539 = vmatpush3.bf16.msra.mxu1 %v12796_v44  ;;  %v12840_v44 = vld [vmem:[#allocation14 + $0xfc8] sm:$0xff]  }
 0x5f5   :  { %11540 = vmatprep.subr.bf16.mxu1 %v12799_v57  ;;  %v12839_v57 = vld [vmem:[#allocation14 + $0xf08] sm:$0xff]  }
 0x5f6   :  { %11519 = vmatpush3.bf16.msra.mxu0 %v12798_v6  ;;  %v12842_v6 = vld [vmem:[#allocation14 + $0xf40] sm:$0xff]  }
 0x5f7   :  { %11520 = vmatprep.subr.bf16.mxu0 %v12801_v59  ;;  %v12841_v59 = vld [vmem:[#allocation14 + $0xf88] sm:$0xff]  }
 0x5f8   :  { %11541 = vmatpush3.bf16.msra.mxu1 %v12800_v29  ;;  %v12844_v29 = vld [vmem:[#allocation14 + $0xfc0] sm:$0xff]  }
 0x5f9   :  { %11542 = vmatprep.subr.bf16.mxu1 %v12803_v61  ;;  %v12843_v61 = vld [vmem:[#allocation14 + $0xf00] sm:$0xff]  }
 0x5fa   :  { %11521 = vmatpush3.bf16.msra.mxu0 %v12802_v36  ;;  %v12845_v36 = vld [vmem:[#allocation14 + $0xf80] sm:$0xff]  }
 0x5fb   :  { %11522 = vmatprep.subr.bf16.mxu0 %v12805_v62  ;;  %v4407_v62 = vpack.c.bf16 %v13565_v8, %v13565_v8 }
 0x5fc   :  { %11543 = vmatpush3.bf16.msra.mxu1 %v12804_v3  ;;  %v4409_v3 = vpack.c.bf16 %v13568_v10, %v13568_v10 }
 0x5fd   :  { %11544 = vmatprep.subr.bf16.mxu1 %v12807_v0 }
 0x5fe   :  { %11523 = vmatpush3.bf16.msra.mxu0 %v12806_v12 }
 0x5ff   :  { %11524 = vmatprep.subr.bf16.mxu0 %v12809_v7 }
 0x600   :  { %11545 = vmatpush3.bf16.msra.mxu1 %v12808_v50 }
 0x601   :  { %11546 = vmatprep.subr.bf16.mxu1 %v12811_v4 }
 0x602   :  { %11525 = vmatpush3.bf16.msra.mxu0 %v12810_v9 }
 0x603   :  { %11554 = vmatprep.subr.bf16.mxu0 %v12813_v58 }
 0x604   :  { %11547 = vmatpush3.bf16.msra.mxu1 %v12812_v56 }
 0x605   :  { %v11262_v5 = vpop.f32.mrf.mxu0  ;;  %9667 = vmatmul.mubr.bf16.vlgmr.msra.gmra.mxu0 %v4403_v18  ;;  %11576 = vmatprep.subr.bf16.mxu1 %v12815_v60 }
 0x606   :  { %11555 = vmatpush3.bf16.msra.mxu0 %v12814_v14  ;;  %9746 = vmatprep.mubr.bf16.mxu0 %v4408_v63 }
 0x607   :  { %v11263_v24 = vpop.f32.mrf.mxu0  ;;  %v11284_v25 = vpop.f32.mrf.mxu1  ;;  %9707 = vmatmul.mubr.bf16.vlgmr.msra.gmra.mxu1 %v4405_v21  ;;  %11556 = vmatprep.subr.bf16.mxu0 %v12818_v52 }
 0x608   :  { %v11264_v28 = vadd.f32 %v11263_v24, %v11262_v5  ;;  %11577 = vmatpush3.bf16.msra.mxu1 %v12816_v42  ;;  %9786 = vmatprep.mubr.bf16.mxu1 %v4410_v17  ;;  %v9809_v24 = vld [vmem:[%s13663_s7 + $0x70] sm:$0xff] }
 0x609   :  { %v11265_v26 = vpop.f32.mrf.mxu0  ;;  %v11285_v33 = vpop.f32.mrf.mxu1  ;;  %11578 = vmatprep.subr.bf16.mxu1 %v12820_v22 }
 0x60a   :  { %v9189_v16 = vadd.f32 %v11264_v28, %v13562_v49  ;;  %v11286_v35 = vadd.f32 %v11285_v33, %v11284_v25  ;;  %11557 = vmatpush3.bf16.msra.mxu0 %v12819_v54  ;;  %v12834_v49 = vld [vmem:[#allocation14 + $0xf50] sm:$0xff]   ;;  %v9810_v54 = vld [vmem:[%s13663_s7 + $0x78] sm:$0xff] }
 0x60b   :  { %v11266_v20 = vpop.f32.mrf.mxu0  ;;  %v11287_v37 = vpop.f32.mrf.mxu1  ;;  %11558 = vmatprep.subr.bf16.mxu0 %v12822_v13  ;;  %v9808_v25 = vld [vmem:[%s13663_s7 + $0x68] sm:$0xff]  ;;  %v9807_v13 = vld [vmem:[%s13663_s7 + $0x60] sm:$0xff]  ;;  %v9806_v28 = vld [vmem:[%s13663_s7 + $0x58] sm:$0xff] }
 0x60c   :  { %v9229_v48 = vadd.f32 %v11286_v35, %v9189_v16  ;;  %11579 = vmatpush3.bf16.msra.mxu1 %v12821_v30  ;;  %v9805_v30 = vld [vmem:[%s13663_s7 + $0x50] sm:$0xff]  ;;  %v9804_v26 = vld [vmem:[%s13663_s7 + $0x48] sm:$0xff]  ;;  %v9803_v33 = vld [vmem:[%s13663_s7 + $0x40] sm:$0xff] }
 0x60d   :  { %v11288_v32 = vpop.f32.mrf.mxu1  ;;  %11580 = vmatprep.subr.bf16.mxu1 %v12824_v34  ;;  %v9802_v34 = vld [vmem:[%s13663_s7 + $0x38] sm:$0xff]  ;;  %v9801_v16 = vld [vmem:[%s13663_s7 + $0x30] sm:$0xff] }
 0x60e   :  { %11559 = vmatpush3.bf16.msra.mxu0 %v12823_v39  ;;  %v9800_v39 = vld [vmem:[%s13663_s7 + $0x28] sm:$0xff] }
 0x60f   :  { %11560 = vmatprep.subr.bf16.mxu0 %v12826_v40 }
 0x610   :  { %11581 = vmatpush3.bf16.msra.mxu1 %v12825_v41 }
 0x611   :  { %11582 = vmatprep.subr.bf16.mxu1 %v12828_v23 }
 0x612   :  { %11561 = vmatpush3.bf16.msra.mxu0 %v12827_v43  ;;  %v9799_v43 = vld [vmem:[%s13663_s7 + $0x20] sm:$0xff] }
 0x613   :  { %11562 = vmatprep.subr.bf16.mxu0 %v12830_v27 }
 0x614   :  { %11583 = vmatpush3.bf16.msra.mxu1 %v12829_v19 }
 0x615   :  { %11584 = vmatprep.subr.bf16.mxu1 %v12832_v46 }
 0x616   :  { %11563 = vmatpush3.bf16.msra.mxu0 %v12831_v47 }
 0x617   :  { %11564 = vmatprep.subr.bf16.mxu0 %v12834_v49  ;;  %v9798_v49 = vld [vmem:[%s13663_s7 + $0x18] sm:$0xff] }
 0x618   :  { %11585 = vmatpush3.bf16.msra.mxu1 %v12833_v51  ;;  %v9797_v51 = vld [vmem:[%s13663_s7 + $0x10] sm:$0xff] }
 0x619   :  { %11586 = vmatprep.subr.bf16.mxu1 %v12836_v31  ;;  %v9796_v31 = vld [vmem:[%s13663_s7 + $0x8] sm:$0xff] }
 0x61a   :  { %11565 = vmatpush3.bf16.msra.mxu0 %v12835_v53  ;;  %v9795_v53 = vld [vmem:[%s13663_s7] sm:$0xff]  ;;  %s13055_s7 = smov [#allocation18]  }
 0x61b   :  { %11566 = vmatprep.subr.bf16.mxu0 %v12838_v38  ;;  %s9901_s17 = sshll.u32 %s13055_s7, 4  ;;  %s9902_s17 = int_to_ptr.vmem [resolvable:$true] %s9901_s17 }
 0x61c   :  { %11587 = vmatpush3.bf16.msra.mxu1 %v12837_v55  ;;  %s12986_s19 = scalar_lea.vmem %s9902_s17, 32  ;;  %p12991_p8 = scmp.lt.s32.totalorder %s9902_s17, %s9902_s17 }
 0x61d   :  { %11588 = vmatprep.subr.bf16.mxu1 %v12840_v44  ;;  %p12987_p7 = scmp.ne.s32.totalorder %s9902_s17, %s12986_s19  ;;  %p12992_p9 = scmp.lt.s32.totalorder %s12986_s19, %s12986_s19 }
 0x61e   :  { %11567 = vmatpush3.bf16.msra.mxu0 %v12839_v57 }
 0x61f   :  { %11568 = vmatprep.subr.bf16.mxu0 %v12842_v6  ;;  %p12993_p10 = por %p12992_p9, %p12991_p8 }
 0x620   :  { %11589 = vmatpush3.bf16.msra.mxu1 %v12841_v59 }
 0x621   :  { %11590 = vmatprep.subr.bf16.mxu1 %v12844_v29  ;;  %p12994_p11 = pnand %p12993_p10, %p12987_p7 }
 0x622   :  { %11569 = vmatpush3.bf16.msra.mxu0 %v12843_v61 }
 0x623   :  { %11615 = vmatprep.subr.mxu0 %v13052_v1 }
 0x624   :  { %11591 = vmatpush3.bf16.msra.mxu1 %v12845_v36 }
 0x625   :  { %v11306_v2 = vpop.f32.mrf.mxu0  ;;  %9747 = vmatmul.mubr.bf16.vlgmr.msra.gmra.mxu0 %v4407_v62 }
 0x626   :  { %11616 = vmatpush3.msra.mxu0 %v9810_v54  ;;  %11647 = vmatprep.mubr.msk.f32.mxu0 %vm13054_vm6, %v13052_v1 }
 0x627   :  { %v11307_v0 = vpop.f32.mrf.mxu0  ;;  %v11328_v12 = vpop.f32.mrf.mxu1  ;;  %9787 = vmatmul.mubr.bf16.vlgmr.msra.gmra.mxu1 %v4409_v3  ;;  %11617 = vmatprep.subr.mxu0 %v13052_v1 }
 0x628   :  { %v11308_v45 = vadd.f32 %v11307_v0, %v11306_v2  ;;  %11618 = vmatpush3.msra.mxu0 %v9809_v24 }
 0x629   :  { %v11309_v7 = vpop.f32.mrf.mxu0  ;;  %v11329_v50 = vpop.f32.mrf.mxu1  ;;  %11619 = vmatprep.subr.mxu0 %v13052_v1 }
 0x62a   :  { %v9269_v4 = vadd.f32 %v11308_v45, %v9229_v48  ;;  %v11330_v9 = vadd.f32 %v11329_v50, %v11328_v12  ;;  %11620 = vmatpush3.msra.mxu0 %v9808_v25 }
 0x62b   :  { %v11310_v58 = vpop.f32.mrf.mxu0  ;;  %v11331_v56 = vpop.f32.mrf.mxu1  ;;  %11621 = vmatprep.subr.mxu0 %v13052_v1 }
 0x62c   :  { %v9309_v11 = vadd.f32 %v11330_v9, %v9269_v4  ;;  %11622 = vmatpush3.msra.mxu0 %v9807_v13 }
 0x62d   :  { %v11332_v8 = vpop.f32.mrf.mxu1  ;;  %11623 = vmatprep.subr.mxu0 %v13052_v1 }
 0x62e   :  { %11624 = vmatpush3.msra.mxu0 %v9806_v28 }
 0x62f   :  { %11625 = vmatprep.subr.mxu0 %v13052_v1 }
 0x630   :  { %11626 = vmatpush3.msra.mxu0 %v9805_v30 }
 0x631   :  { %11627 = vmatprep.subr.mxu0 %v13052_v1 }
 0x632   :  { %11628 = vmatpush3.msra.mxu0 %v9804_v26 }
 0x633   :  { %11629 = vmatprep.subr.mxu0 %v13052_v1 }
 0x634   :  { %11630 = vmatpush3.msra.mxu0 %v9803_v33 }
 0x635   :  { %11631 = vmatprep.subr.mxu0 %v13052_v1 }
 0x636   :  { %11632 = vmatpush3.msra.mxu0 %v9802_v34 }
 0x637   :  { %11633 = vmatprep.subr.mxu0 %v13052_v1 }
 0x638   :  { %11634 = vmatpush3.msra.mxu0 %v9801_v16 }
 0x639   :  { %11635 = vmatprep.subr.mxu0 %v13052_v1 }
 0x63a   :  { %11636 = vmatpush3.msra.mxu0 %v9800_v39 }
 0x63b   :  { %11637 = vmatprep.subr.mxu0 %v13052_v1 }
 0x63c   :  { %11638 = vmatpush3.msra.mxu0 %v9799_v43 }
 0x63d   :  { %11639 = vmatprep.subr.mxu0 %v13052_v1 }
 0x63e   :  { %11640 = vmatpush3.msra.mxu0 %v9798_v49 }
 0x63f   :  { %11641 = vmatprep.subr.mxu0 %v13052_v1 }
 0x640   :  { %11642 = vmatpush3.msra.mxu0 %v9797_v51 }
 0x641   :  { %11643 = vmatprep.subr.mxu0 %v13052_v1 }
 0x642   :  { %11644 = vmatpush3.msra.mxu0 %v9796_v31 }
 0x643   :  { %11645 = vmatprep.subr.mxu0 %v13052_v1 }
 0x644   :  { %11646 = vmatpush3.msra.mxu0 %v9795_v53 }
 0x645   :  { %v11350_v60 = vpop.f32.mrf.mxu0 }
 0x647   :  { %v11351_v14 = vpop.f32.mrf.mxu0  ;;  %v11372_v15 = vpop.f32.mrf.mxu1 }
 0x648   :  { %v11352_v18 = vadd.f32 %v11351_v14, %v11350_v60 }
 0x649   :  { %v11353_v52 = vpop.f32.mrf.mxu0  ;;  %v11373_v63 = vpop.f32.mrf.mxu1 }
 0x64a   :  { %v9349_v42 = vadd.f32 %v11352_v18, %v9309_v11  ;;  %v11374_v10 = vadd.f32 %v11373_v63, %v11372_v15 }
 0x64b   :  { %v11354_v5 = vpop.f32.mrf.mxu0  ;;  %v11375_v21 = vpop.f32.mrf.mxu1 }
 0x64c   :  { %v9389_v22 = vadd.f32 %v11374_v10, %v9349_v42 }
 0x64d   :  { %v11376_v17 = vpop.f32.mrf.mxu1 }
 0x665   :  { %v11394_v35 = vpop.f32.mrf.mxu0 }
 0x667   :  { %v11395_v20 = vpop.f32.mrf.mxu0  ;;  %v11416_v37 = vpop.f32.mrf.mxu1 }
 0x668   :  { %v11396_v40 = vadd.f32 %v11395_v20, %v11394_v35 }
 0x669   :  { %v11397_v48 = vpop.f32.mrf.mxu0  ;;  %v11417_v41 = vpop.f32.mrf.mxu1 }
 0x66a   :  { %v9429_v32 = vadd.f32 %v11396_v40, %v9389_v22  ;;  %v11418_v23 = vadd.f32 %v11417_v41, %v11416_v37  ;;  %v10893_v37 = vld [vmem:[#allocation17] ss:$0 sm:$0xff] }
 0x66b   :  { %v11398_v27 = vpop.f32.mrf.mxu0  ;;  %v11419_v19 = vpop.f32.mrf.mxu1 }
 0x66c   :  { %v9469_v46 = vadd.f32 %v11418_v23, %v9429_v32 }
 0x66d   :  { %v11420_v47 = vpop.f32.mrf.mxu1 }
 0x685   :  { %v11438_v38 = vpop.f32.mrf.mxu0 }
 0x687   :  { %v11439_v55 = vpop.f32.mrf.mxu0  ;;  %v11460_v44 = vpop.f32.mrf.mxu1 }
 0x688   :  { %v11440_v57 = vadd.f32 %v11439_v55, %v11438_v38 }
 0x689   :  { %v11441_v6 = vpop.f32.mrf.mxu0  ;;  %v11461_v59 = vpop.f32.mrf.mxu1 }
 0x68a   :  { %v9509_v29 = vadd.f32 %v11440_v57, %v9469_v46  ;;  %v11462_v61 = vadd.f32 %v11461_v59, %v11460_v44 }
 0x68b   :  { %v11442_v36 = vpop.f32.mrf.mxu0  ;;  %v11463_v62 = vpop.f32.mrf.mxu1 }
 0x68c   :  { %v9549_v2 = vadd.f32 %v11462_v61, %v9509_v29 }
 0x68d   :  { %v11464_v3 = vpop.f32.mrf.mxu1 }
 0x6a5   :  { %v11482_v0 = vpop.f32.mrf.mxu0 }
 0x6a7   :  { %v11483_v12 = vpop.f32.mrf.mxu0  ;;  %v11504_v45 = vpop.f32.mrf.mxu1 }
 0x6a8   :  { %v11484_v52 = vadd.f32 %v11483_v12, %v11482_v0 }
 0x6a9   :  { %v11485_v7 = vpop.f32.mrf.mxu0  ;;  %v11505_v50 = vpop.f32.mrf.mxu1 }
 0x6aa   :  { %v9589_v63 = vadd.f32 %v11484_v52, %v9549_v2  ;;  %v11506_v42 = vadd.f32 %v11505_v50, %v11504_v45 }
 0x6ab   :  { %v11486_v4 = vpop.f32.mrf.mxu0  ;;  %v11507_v1 = vpop.f32.mrf.mxu1 }
 0x6ac   :  { %v9629_v5 = vadd.f32 %v11506_v42, %v9589_v63 }
 0x6ad   :  { %v11508_v9 = vpop.f32.mrf.mxu1 }
 0x6c5   :  { %v11526_v58 = vpop.f32.mrf.mxu0 }
 0x6c7   :  { %v11527_v56 = vpop.f32.mrf.mxu0  ;;  %v11548_v11 = vpop.f32.mrf.mxu1 }
 0x6c8   :  { %v11528_v10 = vadd.f32 %v11527_v56, %v11526_v58 }
 0x6c9   :  { %v11529_v8 = vpop.f32.mrf.mxu0  ;;  %v11549_v60 = vpop.f32.mrf.mxu1 }
 0x6ca   :  { %v9669_v21 = vadd.f32 %v11528_v10, %v9629_v5  ;;  %v11550_v22 = vadd.f32 %v11549_v60, %v11548_v11 }
 0x6cb   :  { %v11530_v14 = vpop.f32.mrf.mxu0  ;;  %v11551_v15 = vpop.f32.mrf.mxu1 }
 0x6cc   :  { %v9709_v25 = vadd.f32 %v11550_v22, %v9669_v21 }
 0x6cd   :  { %v11552_v18 = vpop.f32.mrf.mxu1 }
 0x6e5   :  { %v11570_v17 = vpop.f32.mrf.mxu0 }
 0x6e7   :  { %v11571_v54 = vpop.f32.mrf.mxu0  ;;  %v11592_v24 = vpop.f32.mrf.mxu1 }
 0x6e8   :  { %v11572_v13 = vadd.f32 %v11571_v54, %v11570_v17 }
 0x6e9   :  { %v11573_v28 = vpop.f32.mrf.mxu0  ;;  %v11593_v30 = vpop.f32.mrf.mxu1 }
 0x6ea   :  { %v9749_v26 = vadd.f32 %v11572_v13, %v9709_v25  ;;  %v11594_v33 = vadd.f32 %v11593_v30, %v11592_v24 }
 0x6eb   :  { %v11574_v34 = vpop.f32.mrf.mxu0  ;;  %v11595_v16 = vpop.f32.mrf.mxu1 }
 0x6ec   :  { %v9789_v35 = vadd.f32 %v11594_v33, %v9749_v26 }
 0x6ed   :  { %v11596_v39 = vpop.f32.mrf.mxu1 }
 0x6ee   :  { %v9794_v20 = vmax.f32 %v9789_v35, 0.0 }
 0x6f0   :  { %11648 = vmatmul.mubr.f32.vlgmr.msra.gmra.mxu0 %v9794_v20 }
 0x7b0   :  { %v9884_v40 = vpop.f32.mrf.mxu0 }
 0x7b1   :  { %v9885_v48 = vadd.f32 %v10893_v37, %v9884_v40 }
 0x7b2   :  { %v11649_v41 = vpop.f32.mrf.mxu0 }
 0x7b3   :  { %9891 = vrot.lane.b32.xlu0 %v9885_v48, %s13056_s18  ;;  %9889 = vst.msk [vmem:[#allocation18] sm:$0x3] %vm9888_vm7, %v9885_v48 }
 0x7b4   :  { %12997 = shalt.err (!%p12994_p11)
}
 0x7b5   :  { %9904 = dma.vmem_to_hbm [thread:$0]  %s9902_s17, 32, %s13665_s9, [#allocation8]  }
 0x7b6   :  { %s13057_s1 = smov [#allocation19]  }
 0x7b7   :  { %s9911_s22 = sshll.u32 %s13057_s1, 4  ;;  %s9912_s22 = int_to_ptr.vmem [resolvable:$true] %s9911_s22 }
 0x7b8   :  { %s13006_s23 = scalar_lea.vmem %s9912_s22, 32  ;;  %p13011_p13 = scmp.lt.s32.totalorder %s9912_s22, %s9912_s22 }
 0x7b9   :  { %p13007_p12 = scmp.ne.s32.totalorder %s9912_s22, %s13006_s23  ;;  %p13012_p0 = scmp.lt.s32.totalorder %s13006_s23, %s13006_s23 }
 0x7bb   :  { %p13013_p1 = por %p13012_p0, %p13011_p13 }
 0x7bd   :  { %p13014_p2 = pnand %p13013_p1, %p13007_p12 }
 0x825   :  { %v9892_v32 = vpop.permute.xlu0 %9891 }
 0x826   :  { %9894 = vst.msk [vmem:[#allocation19] sm:$0x3] %vm9888_vm7, %v9892_v32 }
 0x827   :  { %13017 = shalt.err (!%p13014_p2)
}
 0x828   :  { %9914 = dma.vmem_to_hbm [thread:$0]  %s9912_s22, 32, %s13666_s10, [#allocation20]  }
 0x829   :  { %13034 = dma.done.wait [#allocation8], 32  }
 0x82a   :  { %13035 = vsyncadd [#allocation8], 4294967264 }
 0x82b   :  { %13036 = dma.done.wait [#allocation20], 32  }
 0x82c   :  { %13037 = vsyncadd [#allocation20], 4294967264 }
 0x82d   :  { %9921 = vsyncpa [#allocation7], 1 }
 0x82e   :  { %9922 = vsyncpa [#allocation10], 1 }
 0x82f   :  { %9923 = vsyncpa [#allocation13], 1 }
 0x830   :  { %9924 = vsyncpa [#allocation16], 1 }
 0x831   :  { %9925 = vsyncpa [#allocation8], 1 }
 0x832   :  { %9926 = vsyncpa [#allocation20], 1 }

</bundles_post_ra>
